<compile_context>
chip_gen: v5e
topology: v5e:2x2
jax: 0.10.0
libtpu: 0.0.40
codegen_flags: <defaults>
</compile_context>

<pallas_src>
import functools

import jax
import jax.numpy as jnp
from jax import lax
from jax.experimental import pallas as pl
from jax.experimental.pallas import tpu as pltpu


# -----------------------------------------------------------------------------
# Pallas kernel 1: tiled elementwise-difference reduction (L1 / squared).
# -----------------------------------------------------------------------------
def _diff_reduce_kernel(x_ref, y_ref, out_ref, *, mode):
    # x_ref, y_ref : (tile_rows, 128) f32 blocks.
    # out_ref      : (1, 1, 1) partial sum for this tile.
    d = x_ref[...] - y_ref[...]
    if mode == "l1":
        v = jnp.abs(d)
    else:  # "l2" / "fro" both accumulate squared differences
        v = d * d
    s = jnp.sum(v, axis=0, keepdims=True)   # (1, 128) sublane reduce (XLU)
    s = jnp.sum(s, axis=1, keepdims=True)   # (1, 1)   lane reduce
    out_ref[0] = s


def _pallas_diff_reduce(x, y, mode):
    """Returns sum(|x-y|) for mode='l1', sum((x-y)^2) for mode in {'l2','fro'}."""
    xf = x.reshape(-1).astype(jnp.float32)
    yf = y.reshape(-1).astype(jnp.float32)
    total = xf.shape[0]

    rows = -(-total // 128)
    tile_rows = min(2048, ((rows + 7) // 8) * 8)      # multiple of 8 sublanes, 1 MiB max
    rows_pad = -(-rows // tile_rows) * tile_rows
    t_pad = rows_pad * 128
    if t_pad != total:
        # zero padding contributes 0 to both |diff| and diff^2 sums.
        xf = jnp.pad(xf, (0, t_pad - total))
        yf = jnp.pad(yf, (0, t_pad - total))
    x2 = xf.reshape(rows_pad, 128)
    y2 = yf.reshape(rows_pad, 128)
    num_tiles = rows_pad // tile_rows

    # 2 inputs x 2 pipeline buffers x block bytes + headroom.
    vmem_bytes = 4 * tile_rows * 128 * 4 + (2 << 20)
    vmem_bytes = int(min(max(vmem_bytes, 4 << 20), 100 << 20))

    kernel = functools.partial(_diff_reduce_kernel, mode=mode)
    partial = pl.pallas_call(
        kernel,
        out_shape=jax.ShapeDtypeStruct((num_tiles, 1, 1), jnp.float32),
        grid=(num_tiles,),
        in_specs=[
            pl.BlockSpec((tile_rows, 128), lambda i: (i, 0)),
            pl.BlockSpec((tile_rows, 128), lambda i: (i, 0)),
        ],
        out_specs=pl.BlockSpec((1, 1, 1), lambda i: (i, 0, 0)),
        compiler_params=pltpu.CompilerParams(
            dimension_semantics=("parallel",),
            vmem_limit_bytes=vmem_bytes),
    )(x2, y2)
    return jnp.sum(partial)


def _criterion_from_sum(s, numel, criterion_type):
    """Finalize: mean for L1Loss/MSELoss, sqrt for 'fro' (torch.norm)."""
    if criterion_type in ("l1", "l2"):
        return s / numel
    return jnp.sqrt(s)


def _criterion_pallas(x, y, criterion_type):
    """Mirrors torch: L1Loss() / MSELoss() / torch.norm(x - y, p='fro')."""
    s = _pallas_diff_reduce(x, y, criterion_type)
    n = 1
    for d in x.shape:
        n *= d
    return _criterion_from_sum(s, n, criterion_type)


# -----------------------------------------------------------------------------
# Pallas kernel 2 (fused): per-image Gram(x), Gram(gt) and their criterion
# reduction — gram = (F @ F^T) / (C*H*W), F = (C, HW).  Gram matrices never
# leave VMEM.
# -----------------------------------------------------------------------------
def _gram_style_kernel(fx_ref, fgt_ref, out_ref, accx_ref, accgt_ref, *,
                       inv_norm, mode):
    # fx_ref, fgt_ref : (1, C, hw_tile) feature blocks (native NCHW-derived).
    # out_ref         : (1, 1, 1) per-image partial loss (|.| or (.)^2 sum).
    # accx_ref/accgt  : (C, C) f32 VMEM Gram accumulators.
    t = pl.program_id(1)

    @pl.when(t == 0)
    def _():
        accx_ref[...] = jnp.zeros_like(accx_ref)
        accgt_ref[...] = jnp.zeros_like(accgt_ref)

    # bf16 MXU feed, f32 accumulate; zero-padded HW columns contribute nothing.
    fx = fx_ref[0].astype(jnp.bfloat16)                    # (C, hw_tile)
    fgt = fgt_ref[0].astype(jnp.bfloat16)                  # (C, hw_tile)
    dims = (((1,), (1,)), ((), ()))                        # contract HW axis
    accx_ref[...] += lax.dot_general(fx, fx, dims,
                                     preferred_element_type=jnp.float32)
    accgt_ref[...] += lax.dot_general(fgt, fgt, dims,
                                      preferred_element_type=jnp.float32)

    @pl.when(t == pl.num_programs(1) - 1)
    def _():
        d = (accx_ref[...] - accgt_ref[...]) * inv_norm    # diff of normalized grams
        if mode == "l1":
            v = jnp.abs(d)
        else:  # "l2" / "fro"
            v = d * d
        s = jnp.sum(v, axis=0, keepdims=True)              # (1, C)
        s = jnp.sum(s, axis=1, keepdims=True)              # (1, 1)
        out_ref[0] = s


def _style_loss_layer_pallas(feat_x, feat_gt, criterion_type):
    """Style-loss contribution of one layer (before layer weight / mean / sqrt
    finalization), without materializing Gram matrices in HBM."""
    n, c, h, w = feat_x.shape
    hw = h * w
    # NCHW -> (N, C, HW) is a pure reshape (no transpose, no extra HBM pass).
    fx = feat_x.reshape(n, c, hw).astype(jnp.float32)
    fgt = feat_gt.reshape(n, c, hw).astype(jnp.float32)

    hw_pad = ((hw + 127) // 128) * 128
    if hw_pad != hw:
        fx = jnp.pad(fx, ((0, 0), (0, 0), (0, hw_pad - hw)))
        fgt = jnp.pad(fgt, ((0, 0), (0, 0), (0, hw_pad - hw)))
    hw_tile = 128
    for cand in (512, 384, 256, 128):                      # lane-aligned tiles
        if hw_pad % cand == 0:
            hw_tile = cand
            break
    n_tiles = hw_pad // hw_tile
    inv_norm = 1.0 / float(c * h * w)

    # 2 inputs x 2 pipeline buffers + 2 (C,C) accumulators + headroom.
    vmem_bytes = 2 * 2 * c * hw_tile * 4 + 2 * c * c * 4 + (2 << 20)
    vmem_bytes = int(min(max(vmem_bytes, 4 << 20), 100 << 20))

    kernel = functools.partial(_gram_style_kernel, inv_norm=inv_norm,
                               mode=criterion_type)
    partial = pl.pallas_call(
        kernel,
        out_shape=jax.ShapeDtypeStruct((n, 1, 1), jnp.float32),
        grid=(n, n_tiles),
        in_specs=[pl.BlockSpec((1, c, hw_tile), lambda i, t: (i, 0, t)),
                  pl.BlockSpec((1, c, hw_tile), lambda i, t: (i, 0, t))],
        out_specs=pl.BlockSpec((1, 1, 1), lambda i, t: (i, 0, 0)),
        scratch_shapes=[pltpu.VMEM((c, c), jnp.float32),
                        pltpu.VMEM((c, c), jnp.float32)],
        compiler_params=pltpu.CompilerParams(
            # batch axis sharded across TensorCores; hw axis is the reduction.
            dimension_semantics=("parallel", "arbitrary"),
            vmem_limit_bytes=vmem_bytes),
    )(fx, fgt)
    s = jnp.sum(partial)
    return _criterion_from_sum(s, n * c * c, criterion_type)


# -----------------------------------------------------------------------------
# VGG19 feature extractor (plain-JAX glue, deterministic synthetic weights).
# -----------------------------------------------------------------------------
_VGG19_LAYERS = [
    ("conv1_1", 3, 64), ("relu1_1",), ("conv1_2", 64, 64), ("relu1_2",), ("pool1",),
    ("conv2_1", 64, 128), ("relu2_1",), ("conv2_2", 128, 128), ("relu2_2",), ("pool2",),
    ("conv3_1", 128, 256), ("relu3_1",), ("conv3_2", 256, 256), ("relu3_2",),
    ("conv3_3", 256, 256), ("relu3_3",), ("conv3_4", 256, 256), ("relu3_4",), ("pool3",),
    ("conv4_1", 256, 512), ("relu4_1",), ("conv4_2", 512, 512), ("relu4_2",),
    ("conv4_3", 512, 512), ("relu4_3",), ("conv4_4", 512, 512), ("relu4_4",), ("pool4",),
    ("conv5_1", 512, 512), ("relu5_1",), ("conv5_2", 512, 512), ("relu5_2",),
    ("conv5_3", 512, 512), ("relu5_3",), ("conv5_4", 512, 512), ("relu5_4",), ("pool5",),
]

_IMAGENET_MEAN = jnp.array([0.485, 0.456, 0.406], dtype=jnp.float32)
_IMAGENET_STD = jnp.array([0.229, 0.224, 0.225], dtype=jnp.float32)


class VGGFeatureExtractor:
    """VGG19 truncated at the deepest requested layer, returns {name: feature}."""

    def __init__(self, layer_name_list, vgg_type="vgg19", use_input_norm=True,
                 range_norm=False, seed=0):
        if vgg_type != "vgg19":
            # TODO(synk): only plain vgg19 implemented (no bn / other depths).
            raise NotImplementedError("only vgg_type='vgg19' is implemented")
        self.layer_name_list = list(layer_name_list)
        self.use_input_norm = use_input_norm
        self.range_norm = range_norm

        names = [l[0] for l in _VGG19_LAYERS]
        max_idx = max(names.index(nm) for nm in self.layer_name_list)
        self.layers = _VGG19_LAYERS[: max_idx + 1]

        # Deterministic synthetic He-init weights (no checkpoint loading).
        key = jax.random.PRNGKey(seed)
        self.params = {}
        for layer in self.layers:
            if layer[0].startswith("conv"):
                name, cin, cout = layer
                key, wk = jax.random.split(key)
                w = jax.random.normal(wk, (cout, cin, 3, 3), jnp.float32)
                w = w * jnp.sqrt(2.0 / (cin * 9))
                self.params[name] = (w, jnp.zeros((cout,), jnp.float32))

    def __call__(self, x):
        x = x.astype(jnp.float32)
        if self.range_norm:
            x = (x + 1.0) / 2.0
        if self.use_input_norm:
            x = (x - _IMAGENET_MEAN.reshape(1, 3, 1, 1)) / _IMAGENET_STD.reshape(1, 3, 1, 1)
        out = {}
        for layer in self.layers:
            name = layer[0]
            if name.startswith("conv"):
                w, b = self.params[name]
                x = lax.conv_general_dilated(
                    x, w, window_strides=(1, 1), padding=((1, 1), (1, 1)),
                    dimension_numbers=("NCHW", "OIHW", "NCHW"))
                x = x + b.reshape(1, -1, 1, 1)
            elif name.startswith("relu"):
                x = jnp.maximum(x, 0.0)
            else:  # pool: 2x2 max pool, stride 2
                x = lax.reduce_window(
                    x, -jnp.inf, lax.max,
                    window_dimensions=(1, 1, 2, 2), window_strides=(1, 1, 2, 2),
                    padding="VALID")
            if name in self.layer_name_list:
                out[name] = x
        return out


# -----------------------------------------------------------------------------
# PerceptualLoss module (forward-pass equivalent of the PyTorch spec).
# -----------------------------------------------------------------------------
class PerceptualLoss:
    def __init__(self, layer_weights, vgg_type="vgg19", use_input_norm=True,
                 range_norm=False, perceptual_weight=1.0, style_weight=0.0,
                 criterion="l1", seed=0):
        if criterion not in ("l1", "l2", "fro"):
            raise NotImplementedError(f"{criterion} criterion has not been supported.")
        self.perceptual_weight = perceptual_weight
        self.style_weight = style_weight
        self.layer_weights = dict(layer_weights)
        self.criterion_type = criterion
        self.vgg = VGGFeatureExtractor(
            layer_name_list=list(layer_weights.keys()), vgg_type=vgg_type,
            use_input_norm=use_input_norm, range_norm=range_norm, seed=seed)

    def __call__(self, x, gt):
        x_features = self.vgg(x)
        gt_features = self.vgg(lax.stop_gradient(gt))

        # perceptual loss (tiled Pallas diff-reduce per layer)
        if self.perceptual_weight > 0:
            percep_loss = 0.0
            for k in x_features.keys():
                percep_loss = percep_loss + _criterion_pallas(
                    x_features[k], gt_features[k], self.criterion_type) * self.layer_weights[k]
            percep_loss = percep_loss * self.perceptual_weight
        else:
            percep_loss = None

        # style loss (fused Gram + criterion Pallas kernel, grams stay in VMEM)
        if self.style_weight > 0:
            style_loss = 0.0
            for k in x_features.keys():
                style_loss = style_loss + _style_loss_layer_pallas(
                    x_features[k], gt_features[k], self.criterion_type) * self.layer_weights[k]
            style_loss = style_loss * self.style_weight
        else:
            style_loss = None

        return percep_loss, style_loss


if __name__ == "__main__":
    key = jax.random.PRNGKey(0)
    k1, k2 = jax.random.split(key)
    # Small 3-channel images; conv2_2 features: (2, 128, 16, 16),
    # conv5_4 features: (2, 512, 2, 2).
    x = jax.random.uniform(k1, (2, 3, 32, 32), dtype=jnp.float32)
    gt = jax.random.uniform(k2, (2, 3, 32, 32), dtype=jnp.float32)

    loss_mod = PerceptualLoss(
        layer_weights={"conv2_2": 0.5, "conv5_4": 1.0},
        vgg_type="vgg19", use_input_norm=True, range_norm=False,
        perceptual_weight=1.0, style_weight=1.0, criterion="l1")

    loss_fn = jax.jit(lambda a, b: loss_mod(a, b))
    percep, style = loss_fn(x, gt)
    jax.block_until_ready((percep, style))
    print("KERNEL_OK")
</pallas_src>

<mosaic_0001>
module attributes {stable_mosaic.version = 11 : i64} {
  func.func @_gram_style_kernel(%arg0: i32, %arg1: i32, %arg2: memref<1x128x256xf32, #tpu.memory_space<vmem>>, %arg3: memref<1x128x256xf32, #tpu.memory_space<vmem>>, %arg4: memref<1x1x1xf32, #tpu.memory_space<vmem>>, %arg5: memref<128x128xf32, #tpu.memory_space<vmem>>, %arg6: memref<128x128xf32, #tpu.memory_space<vmem>>) attributes {dimension_semantics = [#tpu.dimension_semantics<parallel>, #tpu.dimension_semantics<arbitrary>], iteration_bounds = array<i64: 2, 1>, scalar_prefetch = 0 : i64, scratch_operands = 2 : i64, tpu.core_type = #tpu.core_type<tc>, window_params = [{transform_indices = @transform_0, window_bounds = array<i64: 1, 128, 256>}, {transform_indices = @transform_1, window_bounds = array<i64: 1, 128, 256>}, {transform_indices = @transform_2, window_bounds = array<i64: 1, 1, 1>}]} {
    %c0_i32 = arith.constant 0 : i32
    %0 = arith.cmpi eq, %arg1, %c0_i32 : i32
    %1 = arith.extui %0 : i1 to i32
    %c0_i32_0 = arith.constant 0 : i32
    %2 = arith.cmpi ne, %1, %c0_i32_0 : i32
    scf.if %2 {
      %cst_17 = arith.constant 0.000000e+00 : f32
      %20 = vector.broadcast %cst_17 : f32 to vector<128x128xf32>
      %c0_18 = arith.constant 0 : index
      %c0_19 = arith.constant 0 : index
      %21 = vector.load %arg5[%c0_18, %c0_19] : memref<128x128xf32, #tpu.memory_space<vmem>>, vector<128x128xf32>
      tpu.vector_store %arg5[%c0_18, %c0_19], %20 {strides = array<i32>} : memref<128x128xf32, #tpu.memory_space<vmem>>, vector<128x128xf32>,
      %cst_20 = arith.constant 0.000000e+00 : f32
      %22 = vector.broadcast %cst_20 : f32 to vector<128x128xf32>
      %c0_21 = arith.constant 0 : index
      %c0_22 = arith.constant 0 : index
      %23 = vector.load %arg6[%c0_21, %c0_22] : memref<128x128xf32, #tpu.memory_space<vmem>>, vector<128x128xf32>
      tpu.vector_store %arg6[%c0_21, %c0_22], %22 {strides = array<i32>} : memref<128x128xf32, #tpu.memory_space<vmem>>, vector<128x128xf32>,
    } else {
    }
    %c0 = arith.constant 0 : index
    %c0_1 = arith.constant 0 : index
    %c0_2 = arith.constant 0 : index
    %3 = vector.load %arg2[%c0, %c0_1, %c0_2] : memref<1x128x256xf32, #tpu.memory_space<vmem>>, vector<1x128x256xf32>
    %4 = vector.shape_cast %3 : vector<1x128x256xf32> to vector<128x256xf32>
    %5 = arith.truncf %4 : vector<128x256xf32> to vector<128x256xbf16>
    %c0_3 = arith.constant 0 : index
    %c0_4 = arith.constant 0 : index
    %c0_5 = arith.constant 0 : index
    %6 = vector.load %arg3[%c0_3, %c0_4, %c0_5] : memref<1x128x256xf32, #tpu.memory_space<vmem>>, vector<1x128x256xf32>
    %7 = vector.shape_cast %6 : vector<1x128x256xf32> to vector<128x256xf32>
    %8 = arith.truncf %7 : vector<128x256xf32> to vector<128x256xbf16>
    %c0_6 = arith.constant 0 : index
    %c0_7 = arith.constant 0 : index
    %9 = vector.load %arg5[%c0_6, %c0_7] : memref<128x128xf32, #tpu.memory_space<vmem>>, vector<128x128xf32>
    %cst = arith.constant dense<0.000000e+00> : vector<128x128xf32>
    %10 = tpu.matmul %5, %5, %cst {dimension_numbers = #tpu.dot_dimension_numbers<[1], [1], [0], [0], [0, 0, 1, 0], [], []>} : vector<128x256xbf16>, vector<128x256xbf16>, vector<128x128xf32> -> vector<128x128xf32>
    %11 = arith.addf %9, %10 : vector<128x128xf32>
    %c0_8 = arith.constant 0 : index
    %c0_9 = arith.constant 0 : index
    %12 = vector.load %arg5[%c0_8, %c0_9] : memref<128x128xf32, #tpu.memory_space<vmem>>, vector<128x128xf32>
    tpu.vector_store %arg5[%c0_8, %c0_9], %11 {strides = array<i32>} : memref<128x128xf32, #tpu.memory_space<vmem>>, vector<128x128xf32>,
    %c0_10 = arith.constant 0 : index
    %c0_11 = arith.constant 0 : index
    %13 = vector.load %arg6[%c0_10, %c0_11] : memref<128x128xf32, #tpu.memory_space<vmem>>, vector<128x128xf32>
    %cst_12 = arith.constant dense<0.000000e+00> : vector<128x128xf32>
    %14 = tpu.matmul %8, %8, %cst_12 {dimension_numbers = #tpu.dot_dimension_numbers<[1], [1], [0], [0], [0, 0, 1, 0], [], []>} : vector<128x256xbf16>, vector<128x256xbf16>, vector<128x128xf32> -> vector<128x128xf32>
    %15 = arith.addf %13, %14 : vector<128x128xf32>
    %c0_13 = arith.constant 0 : index
    %c0_14 = arith.constant 0 : index
    %16 = vector.load %arg6[%c0_13, %c0_14] : memref<128x128xf32, #tpu.memory_space<vmem>>, vector<128x128xf32>
    tpu.vector_store %arg6[%c0_13, %c0_14], %15 {strides = array<i32>} : memref<128x128xf32, #tpu.memory_space<vmem>>, vector<128x128xf32>,
    %c0_i32_15 = arith.constant 0 : i32
    %17 = arith.cmpi eq, %arg1, %c0_i32_15 : i32
    %18 = arith.extui %17 : i1 to i32
    %c0_i32_16 = arith.constant 0 : i32
    %19 = arith.cmpi ne, %18, %c0_i32_16 : i32
    scf.if %19 {
      %c0_17 = arith.constant 0 : index
      %c0_18 = arith.constant 0 : index
      %20 = vector.load %arg5[%c0_17, %c0_18] : memref<128x128xf32, #tpu.memory_space<vmem>>, vector<128x128xf32>
      %c0_19 = arith.constant 0 : index
      %c0_20 = arith.constant 0 : index
      %21 = vector.load %arg6[%c0_19, %c0_20] : memref<128x128xf32, #tpu.memory_space<vmem>>, vector<128x128xf32>
      %22 = arith.subf %20, %21 : vector<128x128xf32>
      %cst_21 = arith.constant 3.05175781E-5 : f32
      %23 = vector.broadcast %cst_21 : f32 to vector<128x128xf32>
      %24 = arith.mulf %22, %23 : vector<128x128xf32>
      %25 = math.absf %24 : vector<128x128xf32>
      %cst_22 = arith.constant dense<0.000000e+00> : vector<128xf32>
      %26 = vector.multi_reduction <add>, %25, %cst_22 [0] : vector<128x128xf32> to vector<128xf32>
      %27 = vector.shape_cast %26 : vector<128xf32> to vector<1x128xf32>
      %cst_23 = arith.constant dense<0.000000e+00> : vector<1xf32>
      %28 = vector.multi_reduction <add>, %27, %cst_23 [1] : vector<1x128xf32> to vector<1xf32>
      %29 = vector.shape_cast %28 : vector<1xf32> to vector<1x1xf32>
      %c0_24 = arith.constant 0 : index
      %c0_25 = arith.constant 0 : index
      %c0_26 = arith.constant 0 : index
      %30 = vector.load %arg4[%c0_24, %c0_25, %c0_26] : memref<1x1x1xf32, #tpu.memory_space<vmem>>, vector<1x1x1xf32>
      %31 = vector.shape_cast %30 : vector<1x1x1xf32> to vector<1x1xf32>
      %32 = vector.shape_cast %29 : vector<1x1xf32> to vector<1x1x1xf32>
      tpu.vector_store %arg4[%c0_24, %c0_25, %c0_26], %32 {strides = array<i32>} : memref<1x1x1xf32, #tpu.memory_space<vmem>>, vector<1x1x1xf32>,
    } else {
    }
    return
  }
  func.func @transform_0(%arg0: i32, %arg1: i32) -> (i32, i32, i32) {
    %c0_i32 = arith.constant 0 : i32
    %c0_i32_0 = arith.constant 0 : i32
    return %arg0, %c0_i32, %arg1 : i32, i32, i32
  }
  func.func @transform_1(%arg0: i32, %arg1: i32) -> (i32, i32, i32) {
    %c0_i32 = arith.constant 0 : i32
    %c0_i32_0 = arith.constant 0 : i32
    return %arg0, %c0_i32, %arg1 : i32, i32, i32
  }
  func.func @transform_2(%arg0: i32, %arg1: i32) -> (i32, i32, i32) {
    %c0_i32 = arith.constant 0 : i32
    %c0_i32_0 = arith.constant 0 : i32
    %c0_i32_1 = arith.constant 0 : i32
    return %arg0, %c0_i32, %c0_i32_0 : i32, i32, i32
  }
}

module attributes {stable_mosaic.version = 11 : i64} {
  func.func @_gram_style_kernel(%arg0: i32, %arg1: i32, %arg2: memref<1x512x128xf32, #tpu.memory_space<vmem>>, %arg3: memref<1x512x128xf32, #tpu.memory_space<vmem>>, %arg4: memref<1x1x1xf32, #tpu.memory_space<vmem>>, %arg5: memref<512x512xf32, #tpu.memory_space<vmem>>, %arg6: memref<512x512xf32, #tpu.memory_space<vmem>>) attributes {dimension_semantics = [#tpu.dimension_semantics<parallel>, #tpu.dimension_semantics<arbitrary>], iteration_bounds = array<i64: 2, 1>, scalar_prefetch = 0 : i64, scratch_operands = 2 : i64, tpu.core_type = #tpu.core_type<tc>, window_params = [{transform_indices = @transform_0, window_bounds = array<i64: 1, 512, 128>}, {transform_indices = @transform_1, window_bounds = array<i64: 1, 512, 128>}, {transform_indices = @transform_2, window_bounds = array<i64: 1, 1, 1>}]} {
    %c0_i32 = arith.constant 0 : i32
    %0 = arith.cmpi eq, %arg1, %c0_i32 : i32
    %1 = arith.extui %0 : i1 to i32
    %c0_i32_0 = arith.constant 0 : i32
    %2 = arith.cmpi ne, %1, %c0_i32_0 : i32
    scf.if %2 {
      %cst_17 = arith.constant 0.000000e+00 : f32
      %20 = vector.broadcast %cst_17 : f32 to vector<512x512xf32>
      %c0_18 = arith.constant 0 : index
      %c0_19 = arith.constant 0 : index
      %21 = vector.load %arg5[%c0_18, %c0_19] : memref<512x512xf32, #tpu.memory_space<vmem>>, vector<512x512xf32>
      tpu.vector_store %arg5[%c0_18, %c0_19], %20 {strides = array<i32>} : memref<512x512xf32, #tpu.memory_space<vmem>>, vector<512x512xf32>,
      %cst_20 = arith.constant 0.000000e+00 : f32
      %22 = vector.broadcast %cst_20 : f32 to vector<512x512xf32>
      %c0_21 = arith.constant 0 : index
      %c0_22 = arith.constant 0 : index
      %23 = vector.load %arg6[%c0_21, %c0_22] : memref<512x512xf32, #tpu.memory_space<vmem>>, vector<512x512xf32>
      tpu.vector_store %arg6[%c0_21, %c0_22], %22 {strides = array<i32>} : memref<512x512xf32, #tpu.memory_space<vmem>>, vector<512x512xf32>,
    } else {
    }
    %c0 = arith.constant 0 : index
    %c0_1 = arith.constant 0 : index
    %c0_2 = arith.constant 0 : index
    %3 = vector.load %arg2[%c0, %c0_1, %c0_2] : memref<1x512x128xf32, #tpu.memory_space<vmem>>, vector<1x512x128xf32>
    %4 = vector.shape_cast %3 : vector<1x512x128xf32> to vector<512x128xf32>
    %5 = arith.truncf %4 : vector<512x128xf32> to vector<512x128xbf16>
    %c0_3 = arith.constant 0 : index
    %c0_4 = arith.constant 0 : index
    %c0_5 = arith.constant 0 : index
    %6 = vector.load %arg3[%c0_3, %c0_4, %c0_5] : memref<1x512x128xf32, #tpu.memory_space<vmem>>, vector<1x512x128xf32>
    %7 = vector.shape_cast %6 : vector<1x512x128xf32> to vector<512x128xf32>
    %8 = arith.truncf %7 : vector<512x128xf32> to vector<512x128xbf16>
    %c0_6 = arith.constant 0 : index
    %c0_7 = arith.constant 0 : index
    %9 = vector.load %arg5[%c0_6, %c0_7] : memref<512x512xf32, #tpu.memory_space<vmem>>, vector<512x512xf32>
    %cst = arith.constant dense<0.000000e+00> : vector<512x512xf32>
    %10 = tpu.matmul %5, %5, %cst {dimension_numbers = #tpu.dot_dimension_numbers<[1], [1], [0], [0], [0, 0, 1, 0], [], []>} : vector<512x128xbf16>, vector<512x128xbf16>, vector<512x512xf32> -> vector<512x512xf32>
    %11 = arith.addf %9, %10 : vector<512x512xf32>
    %c0_8 = arith.constant 0 : index
    %c0_9 = arith.constant 0 : index
    %12 = vector.load %arg5[%c0_8, %c0_9] : memref<512x512xf32, #tpu.memory_space<vmem>>, vector<512x512xf32>
    tpu.vector_store %arg5[%c0_8, %c0_9], %11 {strides = array<i32>} : memref<512x512xf32, #tpu.memory_space<vmem>>, vector<512x512xf32>,
    %c0_10 = arith.constant 0 : index
    %c0_11 = arith.constant 0 : index
    %13 = vector.load %arg6[%c0_10, %c0_11] : memref<512x512xf32, #tpu.memory_space<vmem>>, vector<512x512xf32>
    %cst_12 = arith.constant dense<0.000000e+00> : vector<512x512xf32>
    %14 = tpu.matmul %8, %8, %cst_12 {dimension_numbers = #tpu.dot_dimension_numbers<[1], [1], [0], [0], [0, 0, 1, 0], [], []>} : vector<512x128xbf16>, vector<512x128xbf16>, vector<512x512xf32> -> vector<512x512xf32>
    %15 = arith.addf %13, %14 : vector<512x512xf32>
    %c0_13 = arith.constant 0 : index
    %c0_14 = arith.constant 0 : index
    %16 = vector.load %arg6[%c0_13, %c0_14] : memref<512x512xf32, #tpu.memory_space<vmem>>, vector<512x512xf32>
    tpu.vector_store %arg6[%c0_13, %c0_14], %15 {strides = array<i32>} : memref<512x512xf32, #tpu.memory_space<vmem>>, vector<512x512xf32>,
    %c0_i32_15 = arith.constant 0 : i32
    %17 = arith.cmpi eq, %arg1, %c0_i32_15 : i32
    %18 = arith.extui %17 : i1 to i32
    %c0_i32_16 = arith.constant 0 : i32
    %19 = arith.cmpi ne, %18, %c0_i32_16 : i32
    scf.if %19 {
      %c0_17 = arith.constant 0 : index
      %c0_18 = arith.constant 0 : index
      %20 = vector.load %arg5[%c0_17, %c0_18] : memref<512x512xf32, #tpu.memory_space<vmem>>, vector<512x512xf32>
      %c0_19 = arith.constant 0 : index
      %c0_20 = arith.constant 0 : index
      %21 = vector.load %arg6[%c0_19, %c0_20] : memref<512x512xf32, #tpu.memory_space<vmem>>, vector<512x512xf32>
      %22 = arith.subf %20, %21 : vector<512x512xf32>
      %cst_21 = arith.constant 4.8828125E-4 : f32
      %23 = vector.broadcast %cst_21 : f32 to vector<512x512xf32>
      %24 = arith.mulf %22, %23 : vector<512x512xf32>
      %25 = math.absf %24 : vector<512x512xf32>
      %cst_22 = arith.constant dense<0.000000e+00> : vector<512xf32>
      %26 = vector.multi_reduction <add>, %25, %cst_22 [0] : vector<512x512xf32> to vector<512xf32>
      %27 = vector.shape_cast %26 : vector<512xf32> to vector<1x512xf32>
      %cst_23 = arith.constant dense<0.000000e+00> : vector<1xf32>
      %28 = vector.multi_reduction <add>, %27, %cst_23 [1] : vector<1x512xf32> to vector<1xf32>
      %29 = vector.shape_cast %28 : vector<1xf32> to vector<1x1xf32>
      %c0_24 = arith.constant 0 : index
      %c0_25 = arith.constant 0 : index
      %c0_26 = arith.constant 0 : index
      %30 = vector.load %arg4[%c0_24, %c0_25, %c0_26] : memref<1x1x1xf32, #tpu.memory_space<vmem>>, vector<1x1x1xf32>
      %31 = vector.shape_cast %30 : vector<1x1x1xf32> to vector<1x1xf32>
      %32 = vector.shape_cast %29 : vector<1x1xf32> to vector<1x1x1xf32>
      tpu.vector_store %arg4[%c0_24, %c0_25, %c0_26], %32 {strides = array<i32>} : memref<1x1x1xf32, #tpu.memory_space<vmem>>, vector<1x1x1xf32>,
    } else {
    }
    return
  }
  func.func @transform_0(%arg0: i32, %arg1: i32) -> (i32, i32, i32) {
    %c0_i32 = arith.constant 0 : i32
    %c0_i32_0 = arith.constant 0 : i32
    return %arg0, %c0_i32, %arg1 : i32, i32, i32
  }
  func.func @transform_1(%arg0: i32, %arg1: i32) -> (i32, i32, i32) {
    %c0_i32 = arith.constant 0 : i32
    %c0_i32_0 = arith.constant 0 : i32
    return %arg0, %c0_i32, %arg1 : i32, i32, i32
  }
  func.func @transform_2(%arg0: i32, %arg1: i32) -> (i32, i32, i32) {
    %c0_i32 = arith.constant 0 : i32
    %c0_i32_0 = arith.constant 0 : i32
    %c0_i32_1 = arith.constant 0 : i32
    return %arg0, %c0_i32, %c0_i32_0 : i32, i32, i32
  }
}

module attributes {stable_mosaic.version = 11 : i64} {
  func.func @_diff_reduce_kernel(%arg0: i32, %arg1: memref<32x128xf32, #tpu.memory_space<vmem>>, %arg2: memref<32x128xf32, #tpu.memory_space<vmem>>, %arg3: memref<1x1x1xf32, #tpu.memory_space<vmem>>) attributes {dimension_semantics = [#tpu.dimension_semantics<parallel>], iteration_bounds = array<i64: 1>, scalar_prefetch = 0 : i64, scratch_operands = 0 : i64, tpu.core_type = #tpu.core_type<tc>, window_params = [{transform_indices = @transform_0, window_bounds = array<i64: 32, 128>}, {transform_indices = @transform_1, window_bounds = array<i64: 32, 128>}, {transform_indices = @transform_2, window_bounds = array<i64: 1, 1, 1>}]} {
    %c0 = arith.constant 0 : index
    %c0_0 = arith.constant 0 : index
    %0 = vector.load %arg1[%c0, %c0_0] : memref<32x128xf32, #tpu.memory_space<vmem>>, vector<32x128xf32>
    %c0_1 = arith.constant 0 : index
    %c0_2 = arith.constant 0 : index
    %1 = vector.load %arg2[%c0_1, %c0_2] : memref<32x128xf32, #tpu.memory_space<vmem>>, vector<32x128xf32>
    %2 = arith.subf %0, %1 : vector<32x128xf32>
    %3 = math.absf %2 : vector<32x128xf32>
    %cst = arith.constant dense<0.000000e+00> : vector<128xf32>
    %4 = vector.multi_reduction <add>, %3, %cst [0] : vector<32x128xf32> to vector<128xf32>
    %5 = vector.shape_cast %4 : vector<128xf32> to vector<1x128xf32>
    %cst_3 = arith.constant dense<0.000000e+00> : vector<1xf32>
    %6 = vector.multi_reduction <add>, %5, %cst_3 [1] : vector<1x128xf32> to vector<1xf32>
    %7 = vector.shape_cast %6 : vector<1xf32> to vector<1x1xf32>
    %c0_4 = arith.constant 0 : index
    %c0_5 = arith.constant 0 : index
    %c0_6 = arith.constant 0 : index
    %8 = vector.load %arg3[%c0_4, %c0_5, %c0_6] : memref<1x1x1xf32, #tpu.memory_space<vmem>>, vector<1x1x1xf32>
    %9 = vector.shape_cast %8 : vector<1x1x1xf32> to vector<1x1xf32>
    %10 = vector.shape_cast %7 : vector<1x1xf32> to vector<1x1x1xf32>
    tpu.vector_store %arg3[%c0_4, %c0_5, %c0_6], %10 {strides = array<i32>} : memref<1x1x1xf32, #tpu.memory_space<vmem>>, vector<1x1x1xf32>,
    return
  }
  func.func @transform_0(%arg0: i32) -> (i32, i32) {
    %c0_i32 = arith.constant 0 : i32
    %c0_i32_0 = arith.constant 0 : i32
    return %arg0, %c0_i32 : i32, i32
  }
  func.func @transform_1(%arg0: i32) -> (i32, i32) {
    %c0_i32 = arith.constant 0 : i32
    %c0_i32_0 = arith.constant 0 : i32
    return %arg0, %c0_i32 : i32, i32
  }
  func.func @transform_2(%arg0: i32) -> (i32, i32, i32) {
    %c0_i32 = arith.constant 0 : i32
    %c0_i32_0 = arith.constant 0 : i32
    %c0_i32_1 = arith.constant 0 : i32
    return %arg0, %c0_i32, %c0_i32_0 : i32, i32, i32
  }
}

module attributes {stable_mosaic.version = 11 : i64} {
  func.func @_diff_reduce_kernel(%arg0: i32, %arg1: memref<512x128xf32, #tpu.memory_space<vmem>>, %arg2: memref<512x128xf32, #tpu.memory_space<vmem>>, %arg3: memref<1x1x1xf32, #tpu.memory_space<vmem>>) attributes {dimension_semantics = [#tpu.dimension_semantics<parallel>], iteration_bounds = array<i64: 1>, scalar_prefetch = 0 : i64, scratch_operands = 0 : i64, tpu.core_type = #tpu.core_type<tc>, window_params = [{transform_indices = @transform_0, window_bounds = array<i64: 512, 128>}, {transform_indices = @transform_1, window_bounds = array<i64: 512, 128>}, {transform_indices = @transform_2, window_bounds = array<i64: 1, 1, 1>}]} {
    %c0 = arith.constant 0 : index
    %c0_0 = arith.constant 0 : index
    %0 = vector.load %arg1[%c0, %c0_0] : memref<512x128xf32, #tpu.memory_space<vmem>>, vector<512x128xf32>
    %c0_1 = arith.constant 0 : index
    %c0_2 = arith.constant 0 : index
    %1 = vector.load %arg2[%c0_1, %c0_2] : memref<512x128xf32, #tpu.memory_space<vmem>>, vector<512x128xf32>
    %2 = arith.subf %0, %1 : vector<512x128xf32>
    %3 = math.absf %2 : vector<512x128xf32>
    %cst = arith.constant dense<0.000000e+00> : vector<128xf32>
    %4 = vector.multi_reduction <add>, %3, %cst [0] : vector<512x128xf32> to vector<128xf32>
    %5 = vector.shape_cast %4 : vector<128xf32> to vector<1x128xf32>
    %cst_3 = arith.constant dense<0.000000e+00> : vector<1xf32>
    %6 = vector.multi_reduction <add>, %5, %cst_3 [1] : vector<1x128xf32> to vector<1xf32>
    %7 = vector.shape_cast %6 : vector<1xf32> to vector<1x1xf32>
    %c0_4 = arith.constant 0 : index
    %c0_5 = arith.constant 0 : index
    %c0_6 = arith.constant 0 : index
    %8 = vector.load %arg3[%c0_4, %c0_5, %c0_6] : memref<1x1x1xf32, #tpu.memory_space<vmem>>, vector<1x1x1xf32>
    %9 = vector.shape_cast %8 : vector<1x1x1xf32> to vector<1x1xf32>
    %10 = vector.shape_cast %7 : vector<1x1xf32> to vector<1x1x1xf32>
    tpu.vector_store %arg3[%c0_4, %c0_5, %c0_6], %10 {strides = array<i32>} : memref<1x1x1xf32, #tpu.memory_space<vmem>>, vector<1x1x1xf32>,
    return
  }
  func.func @transform_0(%arg0: i32) -> (i32, i32) {
    %c0_i32 = arith.constant 0 : i32
    %c0_i32_0 = arith.constant 0 : i32
    return %arg0, %c0_i32 : i32, i32
  }
  func.func @transform_1(%arg0: i32) -> (i32, i32) {
    %c0_i32 = arith.constant 0 : i32
    %c0_i32_0 = arith.constant 0 : i32
    return %arg0, %c0_i32 : i32, i32
  }
  func.func @transform_2(%arg0: i32) -> (i32, i32, i32) {
    %c0_i32 = arith.constant 0 : i32
    %c0_i32_0 = arith.constant 0 : i32
    %c0_i32_1 = arith.constant 0 : i32
    return %arg0, %c0_i32, %c0_i32_0 : i32, i32, i32
  }
}

</mosaic_0001>

<bundles_post_ra>
// kernel: _lambda_.6
= control target key start
LH: loop header
LB: loop body
LE: loop exit
PB: predicated region body
PF: predicated region fallthrough
CT: control target
= control target key end

     0   :  { %s891_s9 = smov 0   ;;  %s893_s10 = smov 0   ;;  %s1079_s0 = inlined_call_operand.vmem [shape: f32[2,128,256], index: 0, kind: input, shape index: {}]   ;;  %s1080_s1 = inlined_call_operand.vmem [shape: f32[2,128,256], index: 1, kind: input, shape index: {}]   ;;  %s1081_s2 = inlined_call_operand.vmem [shape: f32[2,1,1], index: 2, kind: output, shape index: {}]  }
   0x1   :  { %s895_s11 = smov 0  }
   0x2 LB: > { %s24_s12 = sadd.s32 1, %s870_s10  ;;  %p819_p0 = scmp.ge.s32.totalorder %s874_s11, 1  ;;  %s874_s11 = sphi %s895_s11, %s12_s11   ;;  %s870_s10 = sphi %s893_s10, %s1083_s10   ;;  %s866_s9 = sphi %s891_s9, %s1082_s9  }
   0x3   : > { %p26_p1 = scmp.ge.s32.totalorder %s24_s12, 2  ;;  %p148_p2 = scmp.lt.s32.totalorder %s874_s11, 3 }
   0x5   : > { %s1085_s12 = smov (%p26_p1, %s24_s12), 0  ;;  %p149_p3 = pnand %p819_p0, %p148_p2 }
   0x6   : > { %p182_p4 = scmp.lt.s32.totalorder (!%p149_p3), %s866_s9, 1 }
   0x7   : > { %152 = sbr.rel (%p149_p3) target bundleno = 474 (0x1da), region = 28 }
   0xc   : > { %s1087_s9 = smov (!%p182_p4, %s866_s9), 1  ;;  %vm734_vm0 = vcmask 0  }
   0xd   : > { %s826_s13 = sshll.u32 %s1087_s9, 8  ;;  %s203_s22 = scalar_lea.vmem %s1081_s2, %s1087_s9 }
   0xe   : > { %s915_s16 = scalar_lea.vmem %s1079_s0, %s826_s13  ;;  %s920_s19 = scalar_lea.vmem %s1080_s1, %s826_s13 }
   0xf   : > { %v268_v0 = vld [vmem:[%s915_s16 + $0xe0] sm:$0xff]  ;;  %v270_v1 = vld [vmem:[%s915_s16 + $0xf0] sm:$0xff]  ;;  %v269_v2 = vld [vmem:[%s915_s16 + $0xe8] sm:$0xff] }
  0x10   : > { %v925_v3 = vpack.c.bf16 %v270_v1, %v268_v0  ;;  %v271_v4 = vld [vmem:[%s915_s16 + $0xf8] sm:$0xff]  ;;  %v316_v5 = vld [vmem:[%s920_s19 + $0xe0] sm:$0xff]  ;;  %v318_v6 = vld [vmem:[%s920_s19 + $0xf0] sm:$0xff] }
  0x11   : > { %v930_v7 = vpack.c.bf16 %v271_v4, %v269_v2  ;;  %v932_v8 = vpack.c.bf16 %v318_v6, %v316_v5  ;;  %v317_v9 = vld [vmem:[%s920_s19 + $0xe8] sm:$0xff]  ;;  %v319_v10 = vld [vmem:[%s920_s19 + $0xf8] sm:$0xff]  ;;  %v264_v12 = vld [vmem:[%s915_s16 + $0xc0] sm:$0xff] }
  0x12   : > { %352 = vmatpush.bf16.xpose.msra.mxu0 %v925_v3  ;;  %v937_v11 = vpack.c.bf16 %v319_v10, %v317_v9  ;;  %v266_v13 = vld [vmem:[%s915_s16 + $0xd0] sm:$0xff]  ;;  %v265_v14 = vld [vmem:[%s915_s16 + $0xc8] sm:$0xff]  ;;  %v267_v15 = vld [vmem:[%s915_s16 + $0xd8] sm:$0xff] }
  0x13   : > { %401 = vmatpush.bf16.xpose.msra.mxu1 %v930_v7  ;;  %498 = vmatpush.bf16.xpose.msra.mxu2 %v932_v8  ;;  %v312_v16 = vld [vmem:[%s920_s19 + $0xc0] sm:$0xff]  ;;  %v314_v17 = vld [vmem:[%s920_s19 + $0xd0] sm:$0xff]  ;;  %v313_v18 = vld [vmem:[%s920_s19 + $0xc8] sm:$0xff]  ;;  %v950_v20 = vpack.c.bf16 %v266_v13, %v264_v12  ;;  %v952_v21 = vpack.c.bf16 %v267_v15, %v265_v14 }
  0x14   : > { %547 = vmatpush.bf16.xpose.msra.mxu3 %v937_v11  ;;  %v315_v19 = vld [vmem:[%s920_s19 + $0xd8] sm:$0xff]  ;;  %v954_v22 = vpack.c.bf16 %v314_v17, %v312_v16  ;;  %v260_v24 = vld [vmem:[%s915_s16 + $0xa0] sm:$0xff]  ;;  %v262_v25 = vld [vmem:[%s915_s16 + $0xb0] sm:$0xff] }
  0x15   : > { %v956_v23 = vpack.c.bf16 %v315_v19, %v313_v18  ;;  %v261_v26 = vld [vmem:[%s915_s16 + $0xa8] sm:$0xff]  ;;  %v263_v27 = vld [vmem:[%s915_s16 + $0xb8] sm:$0xff]  ;;  %v308_v28 = vld [vmem:[%s920_s19 + $0xa0] sm:$0xff]  ;;  %v970_v32 = vpack.c.bf16 %v262_v25, %v260_v24 }
  0x16   : > { %v310_v29 = vld [vmem:[%s920_s19 + $0xb0] sm:$0xff]  ;;  %v309_v30 = vld [vmem:[%s920_s19 + $0xa8] sm:$0xff]  ;;  %v311_v31 = vld [vmem:[%s920_s19 + $0xb8] sm:$0xff]  ;;  %v972_v33 = vpack.c.bf16 %v263_v27, %v261_v26 }
  0x17   : > { %v974_v34 = vpack.c.bf16 %v310_v29, %v308_v28  ;;  %v976_v35 = vpack.c.bf16 %v311_v31, %v309_v30  ;;  %v256_v36 = vld [vmem:[%s915_s16 + $0x80] sm:$0xff]  ;;  %v258_v37 = vld [vmem:[%s915_s16 + $0x90] sm:$0xff]  ;;  %v257_v38 = vld [vmem:[%s915_s16 + $0x88] sm:$0xff] }
  0x18   : > { %v259_v39 = vld [vmem:[%s915_s16 + $0x98] sm:$0xff]  ;;  %v304_v40 = vld [vmem:[%s920_s19 + $0x80] sm:$0xff]  ;;  %v306_v41 = vld [vmem:[%s920_s19 + $0x90] sm:$0xff]  ;;  %v990_v44 = vpack.c.bf16 %v258_v37, %v256_v36 }
  0x19   : > { %v305_v42 = vld [vmem:[%s920_s19 + $0x88] sm:$0xff]  ;;  %v307_v43 = vld [vmem:[%s920_s19 + $0x98] sm:$0xff]  ;;  %v992_v45 = vpack.c.bf16 %v259_v39, %v257_v38  ;;  %v994_v46 = vpack.c.bf16 %v306_v41, %v304_v40  ;;  %v252_v48 = vld [vmem:[%s915_s16 + $0x60] sm:$0xff] }
  0x1a   : > { %353 = vmatpush.bf16.xpose.msra.mxu0 %v950_v20  ;;  %v996_v47 = vpack.c.bf16 %v307_v43, %v305_v42  ;;  %v254_v49 = vld [vmem:[%s915_s16 + $0x70] sm:$0xff]  ;;  %v253_v50 = vld [vmem:[%s915_s16 + $0x68] sm:$0xff]  ;;  %v255_v51 = vld [vmem:[%s915_s16 + $0x78] sm:$0xff] }
  0x1b   : > { %402 = vmatpush.bf16.xpose.msra.mxu1 %v952_v21  ;;  %499 = vmatpush.bf16.xpose.msra.mxu2 %v954_v22  ;;  %v300_v52 = vld [vmem:[%s920_s19 + $0x60] sm:$0xff]  ;;  %v302_v53 = vld [vmem:[%s920_s19 + $0x70] sm:$0xff]  ;;  %v301_v54 = vld [vmem:[%s920_s19 + $0x68] sm:$0xff]  ;;  %v1010_v56 = vpack.c.bf16 %v254_v49, %v252_v48  ;;  %v1012_v57 = vpack.c.bf16 %v255_v51, %v253_v50 }
  0x1c   : > { %548 = vmatpush.bf16.xpose.msra.mxu3 %v956_v23  ;;  %v303_v55 = vld [vmem:[%s920_s19 + $0x78] sm:$0xff]  ;;  %v1014_v58 = vpack.c.bf16 %v302_v53, %v300_v52  ;;  %v248_v60 = vld [vmem:[%s915_s16 + $0x40] sm:$0xff]  ;;  %v250_v61 = vld [vmem:[%s915_s16 + $0x50] sm:$0xff] }
  0x1d   : > { %v1016_v59 = vpack.c.bf16 %v303_v55, %v301_v54  ;;  %v249_v62 = vld [vmem:[%s915_s16 + $0x48] sm:$0xff]  ;;  %v251_v63 = vld [vmem:[%s915_s16 + $0x58] sm:$0xff]  ;;  %v296_v0 = vld [vmem:[%s920_s19 + $0x40] sm:$0xff]  ;;  %v276_v5 = vpack.c.bf16 %v250_v61, %v248_v60 }
  0x1e   : > { %v298_v1 = vld [vmem:[%s920_s19 + $0x50] sm:$0xff]  ;;  %v297_v2 = vld [vmem:[%s920_s19 + $0x48] sm:$0xff]  ;;  %v299_v4 = vld [vmem:[%s920_s19 + $0x58] sm:$0xff]  ;;  %v277_v6 = vpack.c.bf16 %v251_v63, %v249_v62 }
  0x1f   : > { %v324_v9 = vpack.c.bf16 %v298_v1, %v296_v0  ;;  %v325_v10 = vpack.c.bf16 %v299_v4, %v297_v2  ;;  %v244_v12 = vld [vmem:[%s915_s16 + $0x20] sm:$0xff]  ;;  %v246_v13 = vld [vmem:[%s915_s16 + $0x30] sm:$0xff]  ;;  %v245_v14 = vld [vmem:[%s915_s16 + $0x28] sm:$0xff] }
  0x20   : > { %v247_v15 = vld [vmem:[%s915_s16 + $0x38] sm:$0xff]  ;;  %v292_v16 = vld [vmem:[%s920_s19 + $0x20] sm:$0xff]  ;;  %v294_v17 = vld [vmem:[%s920_s19 + $0x30] sm:$0xff]  ;;  %v274_v24 = vpack.c.bf16 %v246_v13, %v244_v12 }
  0x21   : > { %v293_v18 = vld [vmem:[%s920_s19 + $0x28] sm:$0xff]  ;;  %v295_v19 = vld [vmem:[%s920_s19 + $0x38] sm:$0xff]  ;;  %v275_v25 = vpack.c.bf16 %v247_v15, %v245_v14  ;;  %v322_v26 = vpack.c.bf16 %v294_v17, %v292_v16  ;;  %v240_v28 = vld [vmem:[%s915_s16] sm:$0xff] }
  0x22   : > { %354 = vmatpush.bf16.xpose.msra.mxu0 %v970_v32  ;;  %v323_v27 = vpack.c.bf16 %v295_v19, %v293_v18  ;;  %v242_v29 = vld [vmem:[%s915_s16 + $0x10] sm:$0xff]  ;;  %v241_v30 = vld [vmem:[%s915_s16 + $0x8] sm:$0xff]  ;;  %v243_v31 = vld [vmem:[%s915_s16 + $0x18] sm:$0xff] }
  0x23   : > { %403 = vmatpush.bf16.xpose.msra.mxu1 %v972_v33  ;;  %500 = vmatpush.bf16.xpose.msra.mxu2 %v974_v34  ;;  %v288_v36 = vld [vmem:[%s920_s19] sm:$0xff]  ;;  %v290_v37 = vld [vmem:[%s920_s19 + $0x10] sm:$0xff]  ;;  %v289_v38 = vld [vmem:[%s920_s19 + $0x8] sm:$0xff]  ;;  %v272_v40 = vpack.c.bf16 %v242_v29, %v240_v28  ;;  %v273_v41 = vpack.c.bf16 %v243_v31, %v241_v30 }
  0x24   : > { %549 = vmatpush.bf16.xpose.msra.mxu3 %v976_v35  ;;  %v291_v39 = vld [vmem:[%s920_s19 + $0x18] sm:$0xff]  ;;  %v320_v42 = vpack.c.bf16 %v290_v37, %v288_v36 }
  0x25   : > { %v321_v43 = vpack.c.bf16 %v291_v39, %v289_v38 }
  0x2a   : > { %355 = vmatpush.bf16.xpose.msra.mxu0 %v990_v44 }
  0x2b   : > { %404 = vmatpush.bf16.xpose.msra.mxu1 %v992_v45  ;;  %501 = vmatpush.bf16.xpose.msra.mxu2 %v994_v46 }
  0x2c   : > { %550 = vmatpush.bf16.xpose.msra.mxu3 %v996_v47 }
  0x32   : > { %356 = vmatpush.bf16.xpose.msra.mxu0 %v1010_v56 }
  0x33   : > { %405 = vmatpush.bf16.xpose.msra.mxu1 %v1012_v57  ;;  %502 = vmatpush.bf16.xpose.msra.mxu2 %v1014_v58 }
  0x34   : > { %551 = vmatpush.bf16.xpose.msra.mxu3 %v1016_v59 }
  0x3a   : > { %357 = vmatpush.bf16.xpose.msra.mxu0 %v276_v5 }
  0x3b   : > { %406 = vmatpush.bf16.xpose.msra.mxu1 %v277_v6  ;;  %503 = vmatpush.bf16.xpose.msra.mxu2 %v324_v9 }
  0x3c   : > { %552 = vmatpush.bf16.xpose.msra.mxu3 %v325_v10 }
  0x42   : > { %358 = vmatpush.bf16.xpose.msra.mxu0 %v274_v24 }
  0x43   : > { %407 = vmatpush.bf16.xpose.msra.mxu1 %v275_v25  ;;  %504 = vmatpush.bf16.xpose.msra.mxu2 %v322_v26 }
  0x44   : > { %553 = vmatpush.bf16.xpose.msra.mxu3 %v323_v27 }
  0x4a   : > { %359 = vmatpush.bf16.xpose.msra.mxu0 %v272_v40 }
  0x4b   : > { %408 = vmatpush.bf16.xpose.msra.mxu1 %v273_v41  ;;  %505 = vmatpush.bf16.xpose.msra.mxu2 %v320_v42 }
  0x4c   : > { %554 = vmatpush.bf16.xpose.msra.mxu3 %v321_v43 }
  0x51   : > { %360 = vmatmul.bf16.vlgmr.msra.gmra.mxu0 %v272_v40 }
  0x52   : > { %409 = vmatmul.bf16.vlgmr.msra.gmra.mxu1 %v273_v41  ;;  %506 = vmatmul.bf16.vlgmr.msra.gmra.mxu2 %v320_v42 }
  0x53   : > { %555 = vmatmul.bf16.vlgmr.msra.gmra.mxu3 %v321_v43 }
  0x61   : > { %365 = vmatmul.bf16.gmra.mxu0 %v274_v24 }
  0x62   : > { %414 = vmatmul.bf16.gmra.mxu1 %v275_v25  ;;  %511 = vmatmul.bf16.gmra.mxu2 %v322_v26 }
  0x63   : > { %560 = vmatmul.bf16.gmra.mxu3 %v323_v27 }
  0x71   : > { %370 = vmatmul.bf16.gmra.mxu0 %v276_v5 }
  0x72   : > { %419 = vmatmul.bf16.gmra.mxu1 %v277_v6  ;;  %516 = vmatmul.bf16.gmra.mxu2 %v324_v9 }
  0x73   : > { %565 = vmatmul.bf16.gmra.mxu3 %v325_v10 }
  0x81   : > { %375 = vmatmul.bf16.gmra.mxu0 %v1010_v56 }
  0x82   : > { %424 = vmatmul.bf16.gmra.mxu1 %v1012_v57  ;;  %521 = vmatmul.bf16.gmra.mxu2 %v1014_v58 }
  0x83   : > { %570 = vmatmul.bf16.gmra.mxu3 %v1016_v59 }
  0x91   : > { %380 = vmatmul.bf16.gmra.mxu0 %v990_v44 }
  0x92   : > { %429 = vmatmul.bf16.gmra.mxu1 %v992_v45  ;;  %526 = vmatmul.bf16.gmra.mxu2 %v994_v46 }
  0x93   : > { %575 = vmatmul.bf16.gmra.mxu3 %v996_v47 }
  0xa1   : > { %385 = vmatmul.bf16.gmra.mxu0 %v970_v32 }
  0xa2   : > { %434 = vmatmul.bf16.gmra.mxu1 %v972_v33  ;;  %531 = vmatmul.bf16.gmra.mxu2 %v974_v34 }
  0xa3   : > { %580 = vmatmul.bf16.gmra.mxu3 %v976_v35 }
  0xb1   : > { %390 = vmatmul.bf16.gmra.mxu0 %v950_v20 }
  0xb2   : > { %439 = vmatmul.bf16.gmra.mxu1 %v952_v21  ;;  %536 = vmatmul.bf16.gmra.mxu2 %v954_v22 }
  0xb3   : > { %585 = vmatmul.bf16.gmra.mxu3 %v956_v23 }
  0xc1   : > { %395 = vmatmul.bf16.gmra.mxu0 %v925_v3 }
  0xc2   : > { %444 = vmatmul.bf16.gmra.mxu1 %v930_v7  ;;  %541 = vmatmul.bf16.gmra.mxu2 %v932_v8 }
  0xc3   : > { %590 = vmatmul.bf16.gmra.mxu3 %v937_v11 }
  0xce   : > { %v361_v32 = vpop.f32.mrf.mxu0 }
  0xcf   : > { %v410_v33 = vpop.f32.mrf.mxu1 }
  0xd0   : > { %v411_v34 = vadd.f32 %v410_v33, %v361_v32 }
  0xd5   : > { %v507_v35 = vpop.f32.mrf.mxu2 }
  0xd6   : > { %v556_v44 = vpop.f32.mrf.mxu3  ;;  %v363_v20 = vpop.f32.mrf.mxu0 }
  0xd7   : > { %v557_v45 = vadd.f32 %v556_v44, %v507_v35  ;;  %v412_v21 = vpop.f32.mrf.mxu1 }
  0xd8   : > { %v413_v46 = vadd.f32 %v412_v21, %v363_v20 }
  0xd9   : > { %v663_v22 = vsub.f32 %v411_v34, %v557_v45 }
  0xdb   : > { %v679_v50 = vmul.f32 3.0517578e-05, %v663_v22 }
  0xdd   : > { %v509_v47 = vpop.f32.mrf.mxu2  ;;  %v695_v11 = vand.u32 2147483647, %v679_v50 }
  0xde   : > { %v558_v23 = vpop.f32.mrf.mxu3  ;;  %v366_v48 = vpop.f32.mrf.mxu0 }
  0xdf   : > { %v559_v3 = vadd.f32 %v558_v23, %v509_v47  ;;  %v415_v49 = vpop.f32.mrf.mxu1 }
  0xe0   : > { %v416_v7 = vadd.f32 %v415_v49, %v366_v48 }
  0xe1   : > { %v664_v8 = vsub.f32 %v413_v46, %v559_v3 }
  0xe3   : > { %v680_v51 = vmul.f32 3.0517578e-05, %v664_v8 }
  0xe5   : > { %v696_v52 = vand.u32 2147483647, %v680_v51  ;;  %v512_v53 = vpop.f32.mrf.mxu2 }
  0xe6   : > { %v561_v54 = vpop.f32.mrf.mxu3  ;;  %v368_v55 = vpop.f32.mrf.mxu0 }
  0xe7   : > { %v711_v56 = vadd.f32 %v696_v52, %v695_v11  ;;  %v562_v57 = vadd.f32 %v561_v54, %v512_v53  ;;  %v417_v58 = vpop.f32.mrf.mxu1 }
  0xe8   : > { %v418_v59 = vadd.f32 %v417_v58, %v368_v55 }
  0xe9   : > { %v665_v60 = vsub.f32 %v416_v7, %v562_v57 }
  0xeb   : > { %v681_v61 = vmul.f32 3.0517578e-05, %v665_v60 }
  0xed   : > { %v697_v62 = vand.u32 2147483647, %v681_v61  ;;  %v514_v63 = vpop.f32.mrf.mxu2 }
  0xee   : > { %v563_v0 = vpop.f32.mrf.mxu3  ;;  %v371_v1 = vpop.f32.mrf.mxu0 }
  0xef   : > { %v712_v2 = vadd.f32 %v711_v56, %v697_v62  ;;  %v564_v4 = vadd.f32 %v563_v0, %v514_v63  ;;  %v420_v5 = vpop.f32.mrf.mxu1 }
  0xf0   : > { %v421_v6 = vadd.f32 %v420_v5, %v371_v1 }
  0xf1   : > { %v666_v9 = vsub.f32 %v418_v59, %v564_v4 }
  0xf3   : > { %v682_v10 = vmul.f32 3.0517578e-05, %v666_v9 }
  0xf5   : > { %v698_v12 = vand.u32 2147483647, %v682_v10  ;;  %v517_v13 = vpop.f32.mrf.mxu2 }
  0xf6   : > { %v566_v14 = vpop.f32.mrf.mxu3  ;;  %v373_v15 = vpop.f32.mrf.mxu0 }
  0xf7   : > { %v713_v16 = vadd.f32 %v712_v2, %v698_v12  ;;  %v567_v17 = vadd.f32 %v566_v14, %v517_v13  ;;  %v422_v18 = vpop.f32.mrf.mxu1 }
  0xf8   : > { %v423_v50 = vadd.f32 %v422_v18, %v373_v15 }
  0xf9   : > { %v667_v19 = vsub.f32 %v421_v6, %v567_v17 }
  0xfb   : > { %v683_v24 = vmul.f32 3.0517578e-05, %v667_v19 }
  0xfd   : > { %v699_v25 = vand.u32 2147483647, %v683_v24  ;;  %v519_v26 = vpop.f32.mrf.mxu2 }
  0xfe   : > { %v568_v27 = vpop.f32.mrf.mxu3  ;;  %v376_v28 = vpop.f32.mrf.mxu0 }
  0xff   : > { %v714_v29 = vadd.f32 %v713_v16, %v699_v25  ;;  %v425_v30 = vpop.f32.mrf.mxu1  ;;  %v569_v7 = vadd.f32 %v568_v27, %v519_v26 }
 0x100   : > { %v426_v8 = vadd.f32 %v425_v30, %v376_v28 }
 0x101   : > { %v668_v52 = vsub.f32 %v423_v50, %v569_v7 }
 0x103   : > { %v684_v61 = vmul.f32 3.0517578e-05, %v668_v52 }
 0x105   : > { %v522_v31 = vpop.f32.mrf.mxu2  ;;  %v700_v9 = vand.u32 2147483647, %v684_v61 }
 0x106   : > { %v571_v36 = vpop.f32.mrf.mxu3  ;;  %v378_v37 = vpop.f32.mrf.mxu0 }
 0x107   : > { %v427_v38 = vpop.f32.mrf.mxu1  ;;  %v572_v51 = vadd.f32 %v571_v36, %v522_v31  ;;  %v715_v25 = vadd.f32 %v714_v29, %v700_v9 }
 0x108   : > { %v428_v56 = vadd.f32 %v427_v38, %v378_v37 }
 0x109   : > { %v669_v55 = vsub.f32 %v426_v8, %v572_v51 }
 0x10b   : > { %v685_v0 = vmul.f32 3.0517578e-05, %v669_v55 }
 0x10d   : > { %v524_v39 = vpop.f32.mrf.mxu2  ;;  %v701_v15 = vand.u32 2147483647, %v685_v0 }
 0x10e   : > { %v573_v40 = vpop.f32.mrf.mxu3  ;;  %v381_v41 = vpop.f32.mrf.mxu0 }
 0x10f   : > { %v430_v42 = vpop.f32.mrf.mxu1  ;;  %v574_v53 = vadd.f32 %v573_v40, %v524_v39  ;;  %v716_v37 = vadd.f32 %v715_v25, %v701_v15 }
 0x110   : > { %v431_v57 = vadd.f32 %v430_v42, %v381_v41 }
 0x111   : > { %v670_v62 = vsub.f32 %v428_v56, %v574_v53 }
 0x113   : > { %v686_v10 = vmul.f32 3.0517578e-05, %v670_v62 }
 0x115   : > { %v527_v43 = vpop.f32.mrf.mxu2  ;;  %v702_v26 = vand.u32 2147483647, %v686_v10 }
 0x116   : > { %v576_v32 = vpop.f32.mrf.mxu3  ;;  %v383_v33 = vpop.f32.mrf.mxu0 }
 0x117   : > { %v432_v34 = vpop.f32.mrf.mxu1  ;;  %v577_v58 = vadd.f32 %v576_v32, %v527_v43  ;;  %v717_v32 = vadd.f32 %v716_v37, %v702_v26 }
 0x118   : > { %v433_v2 = vadd.f32 %v432_v34, %v383_v33 }
 0x119   : > { %v671_v1 = vsub.f32 %v431_v57, %v577_v58 }
 0x11b   : > { %v687_v16 = vmul.f32 3.0517578e-05, %v671_v1 }
 0x11d   : > { %v529_v35 = vpop.f32.mrf.mxu2  ;;  %v703_v38 = vand.u32 2147483647, %v687_v16 }
 0x11e   : > { %v578_v44 = vpop.f32.mrf.mxu3  ;;  %v386_v20 = vpop.f32.mrf.mxu0 }
 0x11f   : > { %v435_v45 = vpop.f32.mrf.mxu1  ;;  %v579_v63 = vadd.f32 %v578_v44, %v529_v35  ;;  %v718_v29 = vadd.f32 %v717_v32, %v703_v38 }
 0x120   : > { %v436_v4 = vadd.f32 %v435_v45, %v386_v20 }
 0x121   : > { %v672_v13 = vsub.f32 %v433_v2, %v579_v63 }
 0x123   : > { %v688_v30 = vmul.f32 3.0517578e-05, %v672_v13 }
 0x125   : > { %v532_v21 = vpop.f32.mrf.mxu2  ;;  %v704_v34 = vand.u32 2147483647, %v688_v30 }
 0x126   : > { %v581_v46 = vpop.f32.mrf.mxu3  ;;  %v388_v22 = vpop.f32.mrf.mxu0 }
 0x127   : > { %v437_v47 = vpop.f32.mrf.mxu1  ;;  %v582_v5 = vadd.f32 %v581_v46, %v532_v21 }
 0x128   : > { %v438_v18 = vadd.f32 %v437_v47, %v388_v22  ;;  %v719_v22 = vadd.f32 %v718_v29, %v704_v34 }
 0x129   : > { %v673_v17 = vsub.f32 %v436_v4, %v582_v5 }
 0x12b   : > { %v689_v39 = vmul.f32 3.0517578e-05, %v673_v17 }
 0x12d   : > { %v534_v23 = vpop.f32.mrf.mxu2  ;;  %v705_v45 = vand.u32 2147483647, %v689_v39 }
 0x12e   : > { %v583_v48 = vpop.f32.mrf.mxu3  ;;  %v391_v3 = vpop.f32.mrf.mxu0 }
 0x12f   : > { %v440_v49 = vpop.f32.mrf.mxu1  ;;  %v584_v14 = vadd.f32 %v583_v48, %v534_v23 }
 0x130   : > { %v441_v19 = vadd.f32 %v440_v49, %v391_v3  ;;  %v720_v49 = vadd.f32 %v719_v22, %v705_v45 }
 0x131   : > { %v674_v31 = vsub.f32 %v438_v18, %v584_v14 }
 0x133   : > { %v690_v35 = vmul.f32 3.0517578e-05, %v674_v31 }
 0x135   : > { %v537_v11 = vpop.f32.mrf.mxu2  ;;  %v706_v47 = vand.u32 2147483647, %v690_v35 }
 0x136   : > { %v586_v54 = vpop.f32.mrf.mxu3  ;;  %v393_v59 = vpop.f32.mrf.mxu0 }
 0x137   : > { %v442_v60 = vpop.f32.mrf.mxu1  ;;  %v587_v24 = vadd.f32 %v586_v54, %v537_v11  ;;  %v721_v11 = vadd.f32 %v720_v49, %v706_v47 }
 0x138   : > { %v443_v41 = vadd.f32 %v442_v60, %v393_v59 }
 0x139   : > { %v675_v40 = vsub.f32 %v441_v19, %v587_v24 }
 0x13b   : > { %v691_v21 = vmul.f32 3.0517578e-05, %v675_v40 }
 0x13d   : > { %v539_v6 = vpop.f32.mrf.mxu2  ;;  %v707_v7 = vand.u32 2147483647, %v691_v21 }
 0x13e   : > { %v588_v12 = vpop.f32.mrf.mxu3  ;;  %v396_v27 = vpop.f32.mrf.mxu0 }
 0x13f   : > { %v445_v28 = vpop.f32.mrf.mxu1  ;;  %v589_v36 = vadd.f32 %v588_v12, %v539_v6  ;;  %v722_v55 = vadd.f32 %v721_v11, %v707_v7 }
 0x140   : > { %v446_v42 = vadd.f32 %v445_v28, %v396_v27 }
 0x141   : > { %v676_v44 = vsub.f32 %v443_v41, %v589_v36 }
 0x143   : > { %v692_v23 = vmul.f32 3.0517578e-05, %v676_v44 }
 0x145   : > { %v542_v43 = vpop.f32.mrf.mxu2  ;;  %v708_v52 = vand.u32 2147483647, %v692_v23 }
 0x146   : > { %v591_v33 = vpop.f32.mrf.mxu3  ;;  %v398_v48 = vpop.f32.mrf.mxu0 }
 0x147   : > { %v592_v20 = vadd.f32 %v591_v33, %v542_v43  ;;  %v447_v3 = vpop.f32.mrf.mxu1  ;;  %v723_v58 = vadd.f32 %v722_v55, %v708_v52 }
 0x148   : > { %v448_v53 = vadd.f32 %v447_v3, %v398_v48 }
 0x149   : > { %v677_v46 = vsub.f32 %v446_v42, %v592_v20 }
 0x14b   : > { %v693_v50 = vmul.f32 3.0517578e-05, %v677_v46 }
 0x14d   : > { %v544_v8 = vpop.f32.mrf.mxu2  ;;  %v709_v56 = vand.u32 2147483647, %v693_v50 }
 0x14e   : > { %v593_v51 = vpop.f32.mrf.mxu3 }
 0x14f   : > { %v594_v54 = vadd.f32 %v593_v51, %v544_v8  ;;  %v724_v60 = vadd.f32 %v723_v58, %v709_v56 }
 0x151   : > { %v678_v57 = vsub.f32 %v448_v53, %v594_v54 }
 0x153   : > { %v694_v59 = vmul.f32 3.0517578e-05, %v678_v57 }
 0x155   : > { %v710_v61 = vand.u32 2147483647, %v694_v59 }
 0x157   : > { %v725_v62 = vadd.f32 %v724_v60, %v710_v61 }
 0x159   : > { %v726_v63 = vrot.slane %v725_v62, 4 }
 0x15b   : > { %v727_v0 = vadd.f32 %v726_v63, %v725_v62 }
 0x15d   : > { %v728_v1 = vrot.slane %v727_v0, 2 }
 0x15f   : > { %v729_v2 = vadd.f32 %v728_v1, %v727_v0 }
 0x161   : > { %v730_v4 = vrot.slane %v729_v2, 1 }
 0x163   : > { %v731_v5 = vadd.f32 %v730_v4, %v729_v2 }
 0x165   : > { %732 = vadd.xlane.f32.xlu0 %v731_v5 }
 0x1d8   : > { %v733_v6 = vpop.xlane.xlu0 %732 }
 0x1d9   : > { %735 = vst.msk [vmem:[%s203_s22] sm:$0x1] %vm734_vm0, %v733_v6 }
 0x1da PF: > { %s12_s11 = sadd.s32 1, %s874_s11   ;;  %s1082_s9 = smov %s870_s10 }
 0x1db   : > { %p9_p5 = scmp.ge.s32.totalorder %s12_s11, 4   ;;  %s1083_s10 = smov %s1085_s12 }
 0x1dd   :  { %11 = sbr.rel (!%p9_p5) target bundleno = 2 (0x2), region = 69 }

// kernel: _lambda_.7
= control target key start
LH: loop header
LB: loop body
LE: loop exit
PB: predicated region body
PF: predicated region fallthrough
CT: control target
= control target key end

     0   :  { %s5511_s9 = smov 0   ;;  %s5513_s10 = smov 0   ;;  %s6955_s0 = inlined_call_operand.vmem [shape: f32[2,512,128], index: 0, kind: input, shape index: {}]   ;;  %s6956_s1 = inlined_call_operand.vmem [shape: f32[2,512,128], index: 1, kind: input, shape index: {}]   ;;  %s6957_s2 = inlined_call_operand.vmem [shape: f32[2,1,1], index: 2, kind: output, shape index: {}]  }
   0x1   :  { %s5515_s11 = smov 0  }
   0x2 LB: > { %s24_s12 = sadd.s32 1, %s5490_s10  ;;  %p5439_p0 = scmp.ge.s32.totalorder %s5494_s11, 1  ;;  %s5494_s11 = sphi %s5515_s11, %s12_s11   ;;  %s5490_s10 = sphi %s5513_s10, %s7461_s10   ;;  %s5486_s9 = sphi %s5511_s9, %s7460_s9  }
   0x3   : > { %p26_p1 = scmp.ge.s32.totalorder %s24_s12, 2  ;;  %p144_p2 = scmp.lt.s32.totalorder %s5494_s11, 3 }
   0x5   : > { %s7463_s12 = smov (%p26_p1, %s24_s12), 0  ;;  %p145_p3 = pnand %p5439_p0, %p144_p2 }
   0x7   : > { %148 = sbr.rel (%p145_p3) target bundleno = 1374 (0x55e), region = 28 }
   0xc   : > { %p175_p4 = scmp.lt.s32.totalorder %s5486_s9, 1  ;;  %vm5354_vm0 = vcmask 0  }
   0xe   : > { %s7465_s9 = smov (!%p175_p4, %s5486_s9), 1 }
   0xf   : > { %s5446_s13 = sshll.u32 %s7465_s9, 9  ;;  %s193_s22 = scalar_lea.vmem %s6957_s2, %s7465_s9 }
  0x10   : > { %s5537_s16 = scalar_lea.vmem %s6955_s0, %s5446_s13  ;;  %s5680_s19 = scalar_lea.vmem %s6956_s1, %s5446_s13 }
  0x11   : > { %v724_v0 = vld [vmem:[%s5537_s16 + $0x70] sm:$0xff]  ;;  %v725_v1 = vld [vmem:[%s5537_s16 + $0x78] sm:$0xff]  ;;  %v722_v12 = vld [vmem:[%s5537_s16 + $0x60] sm:$0xff] }
  0x12   : > { %v740_v2 = vld [vmem:[%s5537_s16 + $0xf0] sm:$0xff]  ;;  %v5542_v3 = vpack.c.bf16 %v725_v1, %v724_v0  ;;  %v741_v4 = vld [vmem:[%s5537_s16 + $0xf8] sm:$0xff]  ;;  %v723_v13 = vld [vmem:[%s5537_s16 + $0x68] sm:$0xff] }
  0x13   : > { %v756_v5 = vld [vmem:[%s5537_s16 + $0x170] sm:$0xff]  ;;  %v757_v6 = vld [vmem:[%s5537_s16 + $0x178] sm:$0xff]  ;;  %v5547_v7 = vpack.c.bf16 %v741_v4, %v740_v2  ;;  %v738_v14 = vld [vmem:[%s5537_s16 + $0xe0] sm:$0xff]  ;;  %v5567_v20 = vpack.c.bf16 %v723_v13, %v722_v12 }
  0x14   : > { %v5549_v8 = vpack.c.bf16 %v757_v6, %v756_v5  ;;  %v772_v9 = vld [vmem:[%s5537_s16 + $0x1f0] sm:$0xff]  ;;  %v773_v10 = vld [vmem:[%s5537_s16 + $0x1f8] sm:$0xff]  ;;  %1158 = vmatpush.bf16.xpose.msra.mxu0 %v5542_v3  ;;  %v739_v15 = vld [vmem:[%s5537_s16 + $0xe8] sm:$0xff] }
  0x15   : > { %v5554_v11 = vpack.c.bf16 %v773_v10, %v772_v9  ;;  %1327 = vmatpush.bf16.xpose.msra.mxu1 %v5547_v7  ;;  %v754_v16 = vld [vmem:[%s5537_s16 + $0x160] sm:$0xff]  ;;  %v755_v17 = vld [vmem:[%s5537_s16 + $0x168] sm:$0xff]  ;;  %v5569_v21 = vpack.c.bf16 %v739_v15, %v738_v14  ;;  %v720_v24 = vld [vmem:[%s5537_s16 + $0x50] sm:$0xff] }
  0x16   : > { %1496 = vmatpush.bf16.xpose.msra.mxu2 %v5549_v8  ;;  %v770_v18 = vld [vmem:[%s5537_s16 + $0x1e0] sm:$0xff]  ;;  %v771_v19 = vld [vmem:[%s5537_s16 + $0x1e8] sm:$0xff]  ;;  %v5571_v22 = vpack.c.bf16 %v755_v17, %v754_v16  ;;  %v721_v25 = vld [vmem:[%s5537_s16 + $0x58] sm:$0xff] }
  0x17   : > { %1665 = vmatpush.bf16.xpose.msra.mxu3 %v5554_v11  ;;  %v5573_v23 = vpack.c.bf16 %v771_v19, %v770_v18  ;;  %v736_v26 = vld [vmem:[%s5537_s16 + $0xd0] sm:$0xff]  ;;  %v737_v27 = vld [vmem:[%s5537_s16 + $0xd8] sm:$0xff]  ;;  %v5587_v32 = vpack.c.bf16 %v721_v25, %v720_v24  ;;  %v718_v36 = vld [vmem:[%s5537_s16 + $0x40] sm:$0xff] }
  0x18   : > { %v752_v28 = vld [vmem:[%s5537_s16 + $0x150] sm:$0xff]  ;;  %v753_v29 = vld [vmem:[%s5537_s16 + $0x158] sm:$0xff]  ;;  %v5589_v33 = vpack.c.bf16 %v737_v27, %v736_v26  ;;  %v719_v37 = vld [vmem:[%s5537_s16 + $0x48] sm:$0xff] }
  0x19   : > { %v768_v30 = vld [vmem:[%s5537_s16 + $0x1d0] sm:$0xff]  ;;  %v769_v31 = vld [vmem:[%s5537_s16 + $0x1d8] sm:$0xff]  ;;  %v5591_v34 = vpack.c.bf16 %v753_v29, %v752_v28  ;;  %v734_v38 = vld [vmem:[%s5537_s16 + $0xc0] sm:$0xff]  ;;  %v5607_v44 = vpack.c.bf16 %v719_v37, %v718_v36 }
  0x1a   : > { %v5593_v35 = vpack.c.bf16 %v769_v31, %v768_v30  ;;  %v735_v39 = vld [vmem:[%s5537_s16 + $0xc8] sm:$0xff]  ;;  %v750_v40 = vld [vmem:[%s5537_s16 + $0x140] sm:$0xff]  ;;  %v716_v48 = vld [vmem:[%s5537_s16 + $0x30] sm:$0xff] }
  0x1b   : > { %v751_v41 = vld [vmem:[%s5537_s16 + $0x148] sm:$0xff]  ;;  %v766_v42 = vld [vmem:[%s5537_s16 + $0x1c0] sm:$0xff]  ;;  %v5609_v45 = vpack.c.bf16 %v735_v39, %v734_v38  ;;  %v717_v49 = vld [vmem:[%s5537_s16 + $0x38] sm:$0xff] }
  0x1c   : > { %1159 = vmatpush.bf16.xpose.msra.mxu0 %v5567_v20  ;;  %v767_v43 = vld [vmem:[%s5537_s16 + $0x1c8] sm:$0xff]  ;;  %v5611_v46 = vpack.c.bf16 %v751_v41, %v750_v40  ;;  %v732_v50 = vld [vmem:[%s5537_s16 + $0xb0] sm:$0xff]  ;;  %v733_v51 = vld [vmem:[%s5537_s16 + $0xb8] sm:$0xff]  ;;  %v5627_v56 = vpack.c.bf16 %v717_v49, %v716_v48 }
  0x1d   : > { %1328 = vmatpush.bf16.xpose.msra.mxu1 %v5569_v21  ;;  %v5613_v47 = vpack.c.bf16 %v767_v43, %v766_v42  ;;  %v748_v52 = vld [vmem:[%s5537_s16 + $0x130] sm:$0xff]  ;;  %v749_v53 = vld [vmem:[%s5537_s16 + $0x138] sm:$0xff]  ;;  %v5629_v57 = vpack.c.bf16 %v733_v51, %v732_v50  ;;  %v714_v60 = vld [vmem:[%s5537_s16 + $0x20] sm:$0xff] }
  0x1e   : > { %1497 = vmatpush.bf16.xpose.msra.mxu2 %v5571_v22  ;;  %v764_v54 = vld [vmem:[%s5537_s16 + $0x1b0] sm:$0xff]  ;;  %v765_v55 = vld [vmem:[%s5537_s16 + $0x1b8] sm:$0xff]  ;;  %v5631_v58 = vpack.c.bf16 %v749_v53, %v748_v52  ;;  %v715_v61 = vld [vmem:[%s5537_s16 + $0x28] sm:$0xff] }
  0x1f   : > { %1666 = vmatpush.bf16.xpose.msra.mxu3 %v5573_v23  ;;  %v5633_v59 = vpack.c.bf16 %v765_v55, %v764_v54  ;;  %v730_v62 = vld [vmem:[%s5537_s16 + $0xa0] sm:$0xff]  ;;  %v731_v63 = vld [vmem:[%s5537_s16 + $0xa8] sm:$0xff]  ;;  %v5647_v5 = vpack.c.bf16 %v715_v61, %v714_v60  ;;  %v712_v12 = vld [vmem:[%s5537_s16 + $0x10] sm:$0xff] }
  0x20   : > { %v746_v0 = vld [vmem:[%s5537_s16 + $0x120] sm:$0xff]  ;;  %v747_v1 = vld [vmem:[%s5537_s16 + $0x128] sm:$0xff]  ;;  %v5649_v6 = vpack.c.bf16 %v731_v63, %v730_v62  ;;  %v713_v13 = vld [vmem:[%s5537_s16 + $0x18] sm:$0xff] }
  0x21   : > { %v762_v2 = vld [vmem:[%s5537_s16 + $0x1a0] sm:$0xff]  ;;  %v763_v4 = vld [vmem:[%s5537_s16 + $0x1a8] sm:$0xff]  ;;  %v5651_v9 = vpack.c.bf16 %v747_v1, %v746_v0  ;;  %v728_v14 = vld [vmem:[%s5537_s16 + $0x90] sm:$0xff]  ;;  %v775_v24 = vpack.c.bf16 %v713_v13, %v712_v12 }
  0x22   : > { %v5653_v10 = vpack.c.bf16 %v763_v4, %v762_v2  ;;  %v729_v15 = vld [vmem:[%s5537_s16 + $0x98] sm:$0xff]  ;;  %v744_v16 = vld [vmem:[%s5537_s16 + $0x110] sm:$0xff]  ;;  %v710_v28 = vld [vmem:[%s5537_s16] sm:$0xff] }
  0x23   : > { %v745_v17 = vld [vmem:[%s5537_s16 + $0x118] sm:$0xff]  ;;  %v760_v18 = vld [vmem:[%s5537_s16 + $0x190] sm:$0xff]  ;;  %v5667_v25 = vpack.c.bf16 %v729_v15, %v728_v14  ;;  %v711_v29 = vld [vmem:[%s5537_s16 + $0x8] sm:$0xff] }
  0x24   : > { %1160 = vmatpush.bf16.xpose.msra.mxu0 %v5587_v32  ;;  %v761_v19 = vld [vmem:[%s5537_s16 + $0x198] sm:$0xff]  ;;  %v5669_v26 = vpack.c.bf16 %v745_v17, %v744_v16  ;;  %v726_v30 = vld [vmem:[%s5537_s16 + $0x80] sm:$0xff]  ;;  %v727_v31 = vld [vmem:[%s5537_s16 + $0x88] sm:$0xff]  ;;  %v774_v43 = vpack.c.bf16 %v711_v29, %v710_v28 }
  0x25   : > { %1329 = vmatpush.bf16.xpose.msra.mxu1 %v5589_v33  ;;  %v5671_v27 = vpack.c.bf16 %v761_v19, %v760_v18  ;;  %v742_v36 = vld [vmem:[%s5537_s16 + $0x100] sm:$0xff]  ;;  %v743_v37 = vld [vmem:[%s5537_s16 + $0x108] sm:$0xff]  ;;  %v852_v40 = vld [vmem:[%s5680_s19 + $0x170] sm:$0xff]  ;;  %v5697_v51 = vpack.c.bf16 %v727_v31, %v726_v30 }
  0x26   : > { %1498 = vmatpush.bf16.xpose.msra.mxu2 %v5591_v34  ;;  %v758_v38 = vld [vmem:[%s5537_s16 + $0x180] sm:$0xff]  ;;  %v759_v39 = vld [vmem:[%s5537_s16 + $0x188] sm:$0xff]  ;;  %v853_v41 = vld [vmem:[%s5680_s19 + $0x178] sm:$0xff]  ;;  %v5699_v52 = vpack.c.bf16 %v743_v37, %v742_v36 }
  0x27   : > { %1667 = vmatpush.bf16.xpose.msra.mxu3 %v5593_v35  ;;  %v868_v42 = vld [vmem:[%s5680_s19 + $0x1f0] sm:$0xff]  ;;  %v869_v48 = vld [vmem:[%s5680_s19 + $0x1f8] sm:$0xff]  ;;  %v5703_v55 = vpack.c.bf16 %v759_v39, %v758_v38  ;;  %v5705_v60 = vpack.c.bf16 %v853_v41, %v852_v40  ;;  %v850_v0 = vld [vmem:[%s5680_s19 + $0x160] sm:$0xff] }
  0x28   : > { %v820_v49 = vld [vmem:[%s5680_s19 + $0x70] sm:$0xff]  ;;  %v821_v50 = vld [vmem:[%s5680_s19 + $0x78] sm:$0xff]  ;;  %v5707_v61 = vpack.c.bf16 %v869_v48, %v868_v42  ;;  %v851_v1 = vld [vmem:[%s5680_s19 + $0x168] sm:$0xff] }
  0x29   : > { %v836_v53 = vld [vmem:[%s5680_s19 + $0xf0] sm:$0xff]  ;;  %v837_v54 = vld [vmem:[%s5680_s19 + $0xf8] sm:$0xff]  ;;  %6990 = vst [vmem:[#allocation4_spill] sm:$0xff] %v5705_v60  ;;  %v5709_v62 = vpack.c.bf16 %v821_v50, %v820_v49  ;;  %v866_v2 = vld [vmem:[%s5680_s19 + $0x1e0] sm:$0xff]  ;;  %v5727_v4 = vpack.c.bf16 %v851_v1, %v850_v0 }
  0x2a   : > { %6991 = vst [vmem:[#allocation5_spill] sm:$0xff] %v5707_v61  ;;  %v5711_v63 = vpack.c.bf16 %v837_v54, %v836_v53  ;;  %v867_v12 = vld [vmem:[%s5680_s19 + $0x1e8] sm:$0xff]  ;;  %v818_v13 = vld [vmem:[%s5680_s19 + $0x60] sm:$0xff]  ;;  %v865_v28 = vld [vmem:[%s5680_s19 + $0x1d8] sm:$0xff] }
  0x2b   : > { %6993 = vst [vmem:[#allocation7_spill] sm:$0xff] %v5727_v4  ;;  %v819_v14 = vld [vmem:[%s5680_s19 + $0x68] sm:$0xff]  ;;  %v5732_v15 = vpack.c.bf16 %v867_v12, %v866_v2  ;;  %v834_v17 = vld [vmem:[%s5680_s19 + $0xe0] sm:$0xff]  ;;  %v817_v30 = vld [vmem:[%s5680_s19 + $0x58] sm:$0xff] }
  0x2c   : > { %1161 = vmatpush.bf16.xpose.msra.mxu0 %v5607_v44  ;;  %6992 = vst [vmem:[#allocation6_spill] sm:$0xff] %v5711_v63  ;;  %v5734_v16 = vpack.c.bf16 %v819_v14, %v818_v13  ;;  %v835_v18 = vld [vmem:[%s5680_s19 + $0xe8] sm:$0xff]  ;;  %v832_v31 = vld [vmem:[%s5680_s19 + $0xd0] sm:$0xff]  ;;  %v833_v37 = vld [vmem:[%s5680_s19 + $0xd8] sm:$0xff] }
  0x2d   : > { %1330 = vmatpush.bf16.xpose.msra.mxu1 %v5609_v45  ;;  %6994 = vst [vmem:[#allocation8_spill] sm:$0xff] %v5732_v15  ;;  %v5739_v19 = vpack.c.bf16 %v835_v18, %v834_v17  ;;  %v5776_v38 = vpack.c.bf16 %v833_v37, %v832_v31  ;;  %v847_v14 = vld [vmem:[%s5680_s19 + $0x148] sm:$0xff]  ;;  %v862_v17 = vld [vmem:[%s5680_s19 + $0x1c0] sm:$0xff] }
  0x2e   : > { %1499 = vmatpush.bf16.xpose.msra.mxu2 %v5611_v46  ;;  %v815_v31 = vld [vmem:[%s5680_s19 + $0x48] sm:$0xff] }
  0x2f   : > { %1668 = vmatpush.bf16.xpose.msra.mxu3 %v5613_v47  ;;  %6995 = vst [vmem:[#allocation9_spill] sm:$0xff] %v5739_v19 }
  0x30   : > { %6998 = vst [vmem:[#allocation12_spill] sm:$0xff] %v5776_v38 }
  0x34   : > { %1162 = vmatpush.bf16.xpose.msra.mxu0 %v5627_v56 }
  0x35   : > { %1331 = vmatpush.bf16.xpose.msra.mxu1 %v5629_v57 }
  0x36   : > { %1500 = vmatpush.bf16.xpose.msra.mxu2 %v5631_v58 }
  0x37   : > { %1669 = vmatpush.bf16.xpose.msra.mxu3 %v5633_v59 }
  0x3c   : > { %1163 = vmatpush.bf16.xpose.msra.mxu0 %v5647_v5 }
  0x3d   : > { %1332 = vmatpush.bf16.xpose.msra.mxu1 %v5649_v6 }
  0x3e   : > { %1501 = vmatpush.bf16.xpose.msra.mxu2 %v5651_v9 }
  0x3f   : > { %1670 = vmatpush.bf16.xpose.msra.mxu3 %v5653_v10 }
  0x44   : > { %1164 = vmatpush.bf16.xpose.msra.mxu0 %v775_v24 }
  0x45   : > { %1333 = vmatpush.bf16.xpose.msra.mxu1 %v5667_v25 }
  0x46   : > { %1502 = vmatpush.bf16.xpose.msra.mxu2 %v5669_v26 }
  0x47   : > { %1671 = vmatpush.bf16.xpose.msra.mxu3 %v5671_v27 }
  0x4c   : > { %1165 = vmatpush.bf16.xpose.msra.mxu0 %v774_v43 }
  0x4d   : > { %1334 = vmatpush.bf16.xpose.msra.mxu1 %v5697_v51 }
  0x4e   : > { %1503 = vmatpush.bf16.xpose.msra.mxu2 %v5699_v52 }
  0x4f   : > { %1672 = vmatpush.bf16.xpose.msra.mxu3 %v5703_v55 }
  0x53   : > { %1166 = vmatmul.bf16.vlgmr.msra.gmra.mxu0 %v774_v43 }
  0x54   : > { %2602 = vmatpush.bf16.xpose.msrb.mxu0 %v5709_v62  ;;  %1335 = vmatmul.bf16.vlgmr.msra.gmra.mxu1 %v774_v43 }
  0x55   : > { %2771 = vmatpush.bf16.xpose.msrb.mxu1 %v5711_v63  ;;  %1504 = vmatmul.bf16.vlgmr.msra.gmra.mxu2 %v774_v43 }
  0x56   : > { %2940 = vmatpush.bf16.xpose.msrb.mxu2 %v5705_v60  ;;  %1673 = vmatmul.bf16.vlgmr.msra.gmra.mxu3 %v774_v43 }
  0x57   : > { %3109 = vmatpush.bf16.xpose.msrb.mxu3 %v5707_v61 }
  0x5c   : > { %2603 = vmatpush.bf16.xpose.msrb.mxu0 %v5734_v16 }
  0x5d   : > { %2772 = vmatpush.bf16.xpose.msrb.mxu1 %v5739_v19 }
  0x5e   : > { %2941 = vmatpush.bf16.xpose.msrb.mxu2 %v5727_v4 }
  0x5f   : > { %3110 = vmatpush.bf16.xpose.msrb.mxu3 %v5732_v15 }
  0x63   : > { %1171 = vmatmul.bf16.gmra.mxu0 %v775_v24 }
  0x64   : > { %1340 = vmatmul.bf16.gmra.mxu1 %v775_v24 }
  0x65   : > { %1509 = vmatmul.bf16.gmra.mxu2 %v775_v24  ;;  %2773 = vmatpush.bf16.xpose.msrb.mxu1 %v5776_v38 }
  0x66   : > { %1678 = vmatmul.bf16.gmra.mxu3 %v775_v24 }
  0x73   : > { %1176 = vmatmul.bf16.gmra.mxu0 %v5647_v5 }
  0x74   : > { %1345 = vmatmul.bf16.gmra.mxu1 %v5647_v5 }
  0x75   : > { %1514 = vmatmul.bf16.gmra.mxu2 %v5647_v5 }
  0x76   : > { %1683 = vmatmul.bf16.gmra.mxu3 %v5647_v5  ;;  %v864_v5 = vld [vmem:[%s5680_s19 + $0x1d0] sm:$0xff] }
  0x77   : > { %v5766_v29 = vpack.c.bf16 %v865_v28, %v864_v5 }
  0x79   : > { %6997 = vst [vmem:[#allocation11_spill] sm:$0xff] %v5766_v29  ;;  %3111 = vmatpush.bf16.xpose.msrb.mxu3 %v5766_v29 }
  0x83   : > { %1181 = vmatmul.bf16.gmra.mxu0 %v5627_v56 }
  0x84   : > { %1350 = vmatmul.bf16.gmra.mxu1 %v5627_v56 }
  0x85   : > { %1519 = vmatmul.bf16.gmra.mxu2 %v5627_v56 }
  0x86   : > { %1688 = vmatmul.bf16.gmra.mxu3 %v5627_v56  ;;  %v849_v56 = vld [vmem:[%s5680_s19 + $0x158] sm:$0xff] }
  0x93   : > { %1186 = vmatmul.bf16.gmra.mxu0 %v5607_v44 }
  0x94   : > { %1355 = vmatmul.bf16.gmra.mxu1 %v5607_v44 }
  0x95   : > { %1524 = vmatmul.bf16.gmra.mxu2 %v5607_v44 }
  0x96   : > { %1693 = vmatmul.bf16.gmra.mxu3 %v5607_v44  ;;  %v848_v44 = vld [vmem:[%s5680_s19 + $0x150] sm:$0xff] }
  0x97   : > { %v5763_v24 = vpack.c.bf16 %v849_v56, %v848_v44  ;;  %v863_v44 = vld [vmem:[%s5680_s19 + $0x1c8] sm:$0xff] }
  0x98   : > { %v5840_v5 = vpack.c.bf16 %v863_v44, %v862_v17 }
  0x99   : > { %6996 = vst [vmem:[#allocation10_spill] sm:$0xff] %v5763_v24  ;;  %2942 = vmatpush.bf16.xpose.msrb.mxu2 %v5763_v24 }
  0x9a   : > { %7000 = vst [vmem:[#allocation14_spill] sm:$0xff] %v5840_v5  ;;  %3112 = vmatpush.bf16.xpose.msrb.mxu3 %v5840_v5 }
  0xa3   : > { %1191 = vmatmul.bf16.gmra.mxu0 %v5587_v32 }
  0xa4   : > { %1360 = vmatmul.bf16.gmra.mxu1 %v5587_v32 }
  0xa5   : > { %1529 = vmatmul.bf16.gmra.mxu2 %v5587_v32 }
  0xa6   : > { %1698 = vmatmul.bf16.gmra.mxu3 %v5587_v32  ;;  %v816_v32 = vld [vmem:[%s5680_s19 + $0x50] sm:$0xff] }
  0xa7   : > { %v5773_v36 = vpack.c.bf16 %v817_v30, %v816_v32  ;;  %v814_v30 = vld [vmem:[%s5680_s19 + $0x40] sm:$0xff] }
  0xa9   : > { %2604 = vmatpush.bf16.xpose.msrb.mxu0 %v5773_v36 }
  0xb3   : > { %1196 = vmatmul.bf16.gmra.mxu0 %v5567_v20 }
  0xb4   : > { %1365 = vmatmul.bf16.gmra.mxu1 %v5567_v20 }
  0xb5   : > { %1534 = vmatmul.bf16.gmra.mxu2 %v5567_v20 }
  0xb6   : > { %1703 = vmatmul.bf16.gmra.mxu3 %v5567_v20 }
  0xc3   : > { %1201 = vmatmul.bf16.gmra.mxu0 %v5542_v3 }
  0xc4   : > { %1370 = vmatmul.bf16.gmra.mxu1 %v5542_v3 }
  0xc5   : > { %1539 = vmatmul.bf16.gmra.mxu2 %v5542_v3 }
  0xc6   : > { %1708 = vmatmul.bf16.gmra.mxu3 %v5542_v3 }
  0xd0   : > { %v5784_v20 = vpop.f32.mrf.mxu0 }
  0xd1   : > { %v5786_v39 = vpop.f32.mrf.mxu1 }
  0xd3   : > { %1206 = vmatmul.bf16.gmra.mxu0 %v5697_v51 }
  0xd4   : > { %1375 = vmatmul.bf16.gmra.mxu1 %v5697_v51 }
  0xd5   : > { %1544 = vmatmul.bf16.gmra.mxu2 %v5697_v51 }
  0xd6   : > { %1713 = vmatmul.bf16.gmra.mxu3 %v5697_v51 }
  0xd8   : > { %v5792_v40 = vpop.f32.mrf.mxu2  ;;  %v5796_v42 = vpop.f32.mrf.mxu0 }
  0xd9   : > { %v5794_v41 = vpop.f32.mrf.mxu3  ;;  %v5798_v43 = vpop.f32.mrf.mxu1 }
  0xe0   : > { %v5800_v3 = vpop.f32.mrf.mxu2  ;;  %v5804_v49 = vpop.f32.mrf.mxu0 }
  0xe1   : > { %v5802_v48 = vpop.f32.mrf.mxu3  ;;  %v5806_v50 = vpop.f32.mrf.mxu1 }
  0xe3   : > { %1211 = vmatmul.bf16.gmra.mxu0 %v5667_v25 }
  0xe4   : > { %1380 = vmatmul.bf16.gmra.mxu1 %v5667_v25 }
  0xe5   : > { %1549 = vmatmul.bf16.gmra.mxu2 %v5667_v25 }
  0xe6   : > { %1718 = vmatmul.bf16.gmra.mxu3 %v5667_v25  ;;  %v846_v25 = vld [vmem:[%s5680_s19 + $0x140] sm:$0xff] }
  0xe7   : > { %v5835_v18 = vpack.c.bf16 %v847_v14, %v846_v25  ;;  %v5853_v25 = vpack.c.bf16 %v815_v31, %v814_v30  ;;  %v831_v14 = vld [vmem:[%s5680_s19 + $0xc8] sm:$0xff] }
  0xe8   : > { %v5812_v51 = vpop.f32.mrf.mxu2  ;;  %v5816_v54 = vpop.f32.mrf.mxu0 }
  0xe9   : > { %v5814_v53 = vpop.f32.mrf.mxu3  ;;  %v5818_v0 = vpop.f32.mrf.mxu1  ;;  %6999 = vst [vmem:[#allocation13_spill] sm:$0xff] %v5835_v18  ;;  %2943 = vmatpush.bf16.xpose.msrb.mxu2 %v5835_v18  ;;  %2605 = vmatpush.bf16.xpose.msrb.mxu0 %v5853_v25 }
  0xf0   : > { %v5820_v1 = vpop.f32.mrf.mxu2  ;;  %v5824_v12 = vpop.f32.mrf.mxu0 }
  0xf1   : > { %v5822_v2 = vpop.f32.mrf.mxu3  ;;  %v5826_v13 = vpop.f32.mrf.mxu1 }
  0xf3   : > { %1216 = vmatmul.bf16.gmra.mxu0 %v5649_v6 }
  0xf4   : > { %1385 = vmatmul.bf16.gmra.mxu1 %v5649_v6 }
  0xf5   : > { %1554 = vmatmul.bf16.gmra.mxu2 %v5649_v6 }
  0xf6   : > { %1723 = vmatmul.bf16.gmra.mxu3 %v5649_v6  ;;  %v830_v6 = vld [vmem:[%s5680_s19 + $0xc0] sm:$0xff] }
  0xf7   : > { %v5856_v61 = vpack.c.bf16 %v831_v14, %v830_v6 }
  0xf8   : > { %v5838_v56 = vpop.f32.mrf.mxu2  ;;  %v5844_v32 = vpop.f32.mrf.mxu0 }
  0xf9   : > { %v5842_v28 = vpop.f32.mrf.mxu3  ;;  %v5850_v37 = vpop.f32.mrf.mxu1  ;;  %7001 = vst [vmem:[#allocation15_spill] sm:$0xff] %v5856_v61  ;;  %2774 = vmatpush.bf16.xpose.msrb.mxu1 %v5856_v61 }
 0x100   : > { %v5860_v17 = vpop.f32.mrf.mxu2  ;;  %v5864_v15 = vpop.f32.mrf.mxu0 }
 0x101   : > { %v5862_v44 = vpop.f32.mrf.mxu3  ;;  %v5866_v29 = vpop.f32.mrf.mxu1 }
 0x103   : > { %1221 = vmatmul.bf16.gmra.mxu0 %v5629_v57 }
 0x104   : > { %1390 = vmatmul.bf16.gmra.mxu1 %v5629_v57 }
 0x105   : > { %1559 = vmatmul.bf16.gmra.mxu2 %v5629_v57 }
 0x106   : > { %1728 = vmatmul.bf16.gmra.mxu3 %v5629_v57 }
 0x108   : > { %v5872_v30 = vpop.f32.mrf.mxu2  ;;  %v5876_v6 = vpop.f32.mrf.mxu0 }
 0x109   : > { %v5874_v31 = vpop.f32.mrf.mxu3  ;;  %v5878_v14 = vpop.f32.mrf.mxu1 }
 0x10a   : > { %7002 = vst [vmem:[#allocation16_spill] sm:$0xff] %v5878_v14 }
 0x110   : > { %v5880_v5 = vpop.f32.mrf.mxu2  ;;  %v5884_v4 = vpop.f32.mrf.mxu0 }
 0x111   : > { %7003 = vst [vmem:[#allocation17_spill] sm:$0xff] %v5880_v5  ;;  %v5882_v60 = vpop.f32.mrf.mxu3  ;;  %v5886_v24 = vpop.f32.mrf.mxu1 }
 0x112   : > { %7004 = vst [vmem:[#allocation18_spill] sm:$0xff] %v5882_v60  ;;  %v813_v60 = vld [vmem:[%s5680_s19 + $0x38] sm:$0xff] }
 0x113   : > { %7005 = vst [vmem:[#allocation19_spill] sm:$0xff] %v5884_v4  ;;  %1226 = vmatmul.bf16.gmra.mxu0 %v5609_v45 }
 0x114   : > { %7006 = vst [vmem:[#allocation20_spill] sm:$0xff] %v5886_v24  ;;  %1395 = vmatmul.bf16.gmra.mxu1 %v5609_v45 }
 0x115   : > { %1564 = vmatmul.bf16.gmra.mxu2 %v5609_v45 }
 0x116   : > { %1733 = vmatmul.bf16.gmra.mxu3 %v5609_v45 }
 0x118   : > { %v5892_v57 = vpop.f32.mrf.mxu2  ;;  %v5896_v63 = vpop.f32.mrf.mxu0 }
 0x119   : > { %7007 = vst [vmem:[#allocation21_spill] sm:$0xff] %v5892_v57  ;;  %v5894_v18 = vpop.f32.mrf.mxu3  ;;  %v5898_v19 = vpop.f32.mrf.mxu1  ;;  %v812_v57 = vld [vmem:[%s5680_s19 + $0x30] sm:$0xff] }
 0x11a   : > { %7008 = vst [vmem:[#allocation22_spill] sm:$0xff] %v5894_v18 }
 0x11b   : > { %7009 = vst [vmem:[#allocation23_spill] sm:$0xff] %v5896_v63 }
 0x11c   : > { %7010 = vst [vmem:[#allocation24_spill] sm:$0xff] %v5898_v19 }
 0x120   : > { %v5900_v38 = vpop.f32.mrf.mxu2  ;;  %v5904_v24 = vpop.f32.mrf.mxu0 }
 0x121   : > { %7011 = vst [vmem:[#allocation25_spill] sm:$0xff] %v5900_v38  ;;  %v5902_v61 = vpop.f32.mrf.mxu3  ;;  %v5906_v4 = vpop.f32.mrf.mxu1 }
 0x122   : > { %7012 = vst [vmem:[#allocation26_spill] sm:$0xff] %v5902_v61 }
 0x123   : > { %7013 = vst [vmem:[#allocation27_spill] sm:$0xff] %v5904_v24  ;;  %1231 = vmatmul.bf16.gmra.mxu0 %v5589_v33 }
 0x124   : > { %7014 = vst [vmem:[#allocation28_spill] sm:$0xff] %v5906_v4  ;;  %1400 = vmatmul.bf16.gmra.mxu1 %v5589_v33 }
 0x125   : > { %1569 = vmatmul.bf16.gmra.mxu2 %v5589_v33 }
 0x126   : > { %1738 = vmatmul.bf16.gmra.mxu3 %v5589_v33  ;;  %v844_v33 = vld [vmem:[%s5680_s19 + $0x130] sm:$0xff] }
 0x128   : > { %v5912_v45 = vpop.f32.mrf.mxu2  ;;  %v5916_v61 = vpop.f32.mrf.mxu0 }
 0x129   : > { %7015 = vst [vmem:[#allocation29_spill] sm:$0xff] %v5912_v45  ;;  %v5914_v38 = vpop.f32.mrf.mxu3  ;;  %v5918_v24 = vpop.f32.mrf.mxu1 }
 0x12a   : > { %7016 = vst [vmem:[#allocation30_spill] sm:$0xff] %v5914_v38 }
 0x12b   : > { %7017 = vst [vmem:[#allocation31_spill] sm:$0xff] %v5916_v61 }
 0x12c   : > { %7018 = vst [vmem:[#allocation32_spill] sm:$0xff] %v5918_v24  ;;  %v860_v24 = vld [vmem:[%s5680_s19 + $0x1b0] sm:$0xff] }
 0x130   : > { %v5920_v4 = vpop.f32.mrf.mxu2  ;;  %v5924_v63 = vpop.f32.mrf.mxu0 }
 0x131   : > { %7019 = vst [vmem:[#allocation33_spill] sm:$0xff] %v5920_v4  ;;  %v5922_v19 = vpop.f32.mrf.mxu3  ;;  %v5926_v18 = vpop.f32.mrf.mxu1  ;;  %v845_v4 = vld [vmem:[%s5680_s19 + $0x138] sm:$0xff] }
 0x132   : > { %7020 = vst [vmem:[#allocation34_spill] sm:$0xff] %v5922_v19  ;;  %v5935_v19 = vpack.c.bf16 %v845_v4, %v844_v33  ;;  %v5953_v4 = vpack.c.bf16 %v813_v60, %v812_v57  ;;  %v829_v33 = vld [vmem:[%s5680_s19 + $0xb8] sm:$0xff] }
 0x133   : > { %7021 = vst [vmem:[#allocation35_spill] sm:$0xff] %v5924_v63  ;;  %1236 = vmatmul.bf16.gmra.mxu0 %v5569_v21  ;;  %v861_v63 = vld [vmem:[%s5680_s19 + $0x1b8] sm:$0xff] }
 0x134   : > { %7022 = vst [vmem:[#allocation36_spill] sm:$0xff] %v5926_v18  ;;  %1405 = vmatmul.bf16.gmra.mxu1 %v5569_v21  ;;  %v5940_v18 = vpack.c.bf16 %v861_v63, %v860_v24  ;;  %2944 = vmatpush.bf16.xpose.msrb.mxu2 %v5935_v19 }
 0x135   : > { %1574 = vmatmul.bf16.gmra.mxu2 %v5569_v21  ;;  %7023 = vst [vmem:[#allocation37_spill] sm:$0xff] %v5935_v19  ;;  %2606 = vmatpush.bf16.xpose.msrb.mxu0 %v5953_v4 }
 0x136   : > { %1743 = vmatmul.bf16.gmra.mxu3 %v5569_v21  ;;  %7024 = vst [vmem:[#allocation38_spill] sm:$0xff] %v5940_v18  ;;  %v828_v21 = vld [vmem:[%s5680_s19 + $0xb0] sm:$0xff] }
 0x137   : > { %3113 = vmatpush.bf16.xpose.msrb.mxu3 %v5940_v18  ;;  %v5956_v14 = vpack.c.bf16 %v829_v33, %v828_v21 }
 0x138   : > { %v5938_v61 = vpop.f32.mrf.mxu2  ;;  %v5944_v45 = vpop.f32.mrf.mxu0 }
 0x139   : > { %v5942_v38 = vpop.f32.mrf.mxu3  ;;  %7025 = vst [vmem:[#allocation39_spill] sm:$0xff] %v5944_v45  ;;  %v5950_v5 = vpop.f32.mrf.mxu1  ;;  %2775 = vmatpush.bf16.xpose.msrb.mxu1 %v5956_v14 }
 0x13a   : > { %7026 = vst [vmem:[#allocation40_spill] sm:$0xff] %v5950_v5 }
 0x140   : > { %v5960_v63 = vpop.f32.mrf.mxu2  ;;  %v5964_v19 = vpop.f32.mrf.mxu0 }
 0x141   : > { %7027 = vst [vmem:[#allocation41_spill] sm:$0xff] %v5960_v63  ;;  %v5962_v24 = vpop.f32.mrf.mxu3  ;;  %v5966_v45 = vpop.f32.mrf.mxu1 }
 0x142   : > { %7028 = vst [vmem:[#allocation42_spill] sm:$0xff] %v5962_v24 }
 0x143   : > { %7029 = vst [vmem:[#allocation43_spill] sm:$0xff] %v5964_v19  ;;  %1241 = vmatmul.bf16.gmra.mxu0 %v5547_v7 }
 0x144   : > { %7030 = vst [vmem:[#allocation44_spill] sm:$0xff] %v5966_v45  ;;  %1410 = vmatmul.bf16.gmra.mxu1 %v5547_v7 }
 0x145   : > { %1579 = vmatmul.bf16.gmra.mxu2 %v5547_v7 }
 0x146   : > { %1748 = vmatmul.bf16.gmra.mxu3 %v5547_v7 }
 0x148   : > { %v5972_v60 = vpop.f32.mrf.mxu2  ;;  %v5976_v21 = vpop.f32.mrf.mxu0 }
 0x149   : > { %7031 = vst [vmem:[#allocation45_spill] sm:$0xff] %v5972_v60  ;;  %v5974_v57 = vpop.f32.mrf.mxu3  ;;  %v5978_v33 = vpop.f32.mrf.mxu1  ;;  %v811_v60 = vld [vmem:[%s5680_s19 + $0x28] sm:$0xff] }
 0x14a   : > { %7032 = vst [vmem:[#allocation46_spill] sm:$0xff] %v5974_v57 }
 0x14b   : > { %7033 = vst [vmem:[#allocation47_spill] sm:$0xff] %v5976_v21 }
 0x14c   : > { %7034 = vst [vmem:[#allocation48_spill] sm:$0xff] %v5978_v33 }
 0x150   : > { %v5980_v18 = vpop.f32.mrf.mxu2  ;;  %v5984_v45 = vpop.f32.mrf.mxu0 }
 0x151   : > { %7035 = vst [vmem:[#allocation49_spill] sm:$0xff] %v5980_v18  ;;  %v5982_v19 = vpop.f32.mrf.mxu3  ;;  %v5986_v24 = vpop.f32.mrf.mxu1 }
 0x152   : > { %7036 = vst [vmem:[#allocation50_spill] sm:$0xff] %v5982_v19 }
 0x153   : > { %7037 = vst [vmem:[#allocation51_spill] sm:$0xff] %v5984_v45  ;;  %1246 = vmatmul.bf16.gmra.mxu0 %v5699_v52 }
 0x154   : > { %7038 = vst [vmem:[#allocation52_spill] sm:$0xff] %v5986_v24  ;;  %1415 = vmatmul.bf16.gmra.mxu1 %v5699_v52 }
 0x155   : > { %1584 = vmatmul.bf16.gmra.mxu2 %v5699_v52 }
 0x156   : > { %1753 = vmatmul.bf16.gmra.mxu3 %v5699_v52 }
 0x158   : > { %v5992_v7 = vpop.f32.mrf.mxu2  ;;  %v5996_v33 = vpop.f32.mrf.mxu0 }
 0x159   : > { %7039 = vst [vmem:[#allocation53_spill] sm:$0xff] %v5992_v7  ;;  %v5994_v21 = vpop.f32.mrf.mxu3  ;;  %v5998_v18 = vpop.f32.mrf.mxu1  ;;  %v810_v7 = vld [vmem:[%s5680_s19 + $0x20] sm:$0xff] }
 0x15a   : > { %7040 = vst [vmem:[#allocation54_spill] sm:$0xff] %v5994_v21 }
 0x15b   : > { %7041 = vst [vmem:[#allocation55_spill] sm:$0xff] %v5996_v33 }
 0x15c   : > { %7042 = vst [vmem:[#allocation56_spill] sm:$0xff] %v5998_v18 }
 0x160   : > { %v6000_v19 = vpop.f32.mrf.mxu2  ;;  %v6004_v24 = vpop.f32.mrf.mxu0 }
 0x161   : > { %7043 = vst [vmem:[#allocation57_spill] sm:$0xff] %v6000_v19  ;;  %v6002_v45 = vpop.f32.mrf.mxu3  ;;  %v6006_v57 = vpop.f32.mrf.mxu1 }
 0x162   : > { %7044 = vst [vmem:[#allocation58_spill] sm:$0xff] %v6002_v45 }
 0x163   : > { %7045 = vst [vmem:[#allocation59_spill] sm:$0xff] %v6004_v24  ;;  %1251 = vmatmul.bf16.gmra.mxu0 %v5669_v26 }
 0x164   : > { %7046 = vst [vmem:[#allocation60_spill] sm:$0xff] %v6006_v57  ;;  %1420 = vmatmul.bf16.gmra.mxu1 %v5669_v26 }
 0x165   : > { %1589 = vmatmul.bf16.gmra.mxu2 %v5669_v26 }
 0x166   : > { %1758 = vmatmul.bf16.gmra.mxu3 %v5669_v26  ;;  %v842_v26 = vld [vmem:[%s5680_s19 + $0x120] sm:$0xff] }
 0x168   : > { %v6012_v52 = vpop.f32.mrf.mxu2  ;;  %v6016_v45 = vpop.f32.mrf.mxu0 }
 0x169   : > { %7047 = vst [vmem:[#allocation61_spill] sm:$0xff] %v6012_v52  ;;  %v6014_v19 = vpop.f32.mrf.mxu3  ;;  %v6018_v24 = vpop.f32.mrf.mxu1 }
 0x16a   : > { %7048 = vst [vmem:[#allocation62_spill] sm:$0xff] %v6014_v19 }
 0x16b   : > { %7049 = vst [vmem:[#allocation63_spill] sm:$0xff] %v6016_v45 }
 0x16c   : > { %7050 = vst [vmem:[#allocation64_spill] sm:$0xff] %v6018_v24  ;;  %v858_v24 = vld [vmem:[%s5680_s19 + $0x1a0] sm:$0xff] }
 0x170   : > { %v6020_v57 = vpop.f32.mrf.mxu2  ;;  %v6024_v33 = vpop.f32.mrf.mxu0 }
 0x171   : > { %7051 = vst [vmem:[#allocation65_spill] sm:$0xff] %v6020_v57  ;;  %v6022_v18 = vpop.f32.mrf.mxu3  ;;  %v6026_v21 = vpop.f32.mrf.mxu1  ;;  %v843_v57 = vld [vmem:[%s5680_s19 + $0x128] sm:$0xff] }
 0x172   : > { %7052 = vst [vmem:[#allocation66_spill] sm:$0xff] %v6022_v18  ;;  %v6035_v18 = vpack.c.bf16 %v843_v57, %v842_v26  ;;  %v6053_v57 = vpack.c.bf16 %v811_v60, %v810_v7  ;;  %v827_v26 = vld [vmem:[%s5680_s19 + $0xa8] sm:$0xff] }
 0x173   : > { %7053 = vst [vmem:[#allocation67_spill] sm:$0xff] %v6024_v33  ;;  %1256 = vmatmul.bf16.gmra.mxu0 %v5651_v9  ;;  %v859_v33 = vld [vmem:[%s5680_s19 + $0x1a8] sm:$0xff] }
 0x174   : > { %7054 = vst [vmem:[#allocation68_spill] sm:$0xff] %v6026_v21  ;;  %1425 = vmatmul.bf16.gmra.mxu1 %v5651_v9  ;;  %v6040_v21 = vpack.c.bf16 %v859_v33, %v858_v24  ;;  %2945 = vmatpush.bf16.xpose.msrb.mxu2 %v6035_v18 }
 0x175   : > { %1594 = vmatmul.bf16.gmra.mxu2 %v5651_v9  ;;  %2607 = vmatpush.bf16.xpose.msrb.mxu0 %v6053_v57 }
 0x176   : > { %1763 = vmatmul.bf16.gmra.mxu3 %v5651_v9  ;;  %7055 = vst [vmem:[#allocation69_spill] sm:$0xff] %v6040_v21  ;;  %v826_v9 = vld [vmem:[%s5680_s19 + $0xa0] sm:$0xff] }
 0x177   : > { %3114 = vmatpush.bf16.xpose.msrb.mxu3 %v6040_v21  ;;  %v6056_v5 = vpack.c.bf16 %v827_v26, %v826_v9 }
 0x178   : > { %v6038_v45 = vpop.f32.mrf.mxu2  ;;  %v6044_v52 = vpop.f32.mrf.mxu0 }
 0x179   : > { %v6042_v19 = vpop.f32.mrf.mxu3  ;;  %7057 = vst [vmem:[#allocation71_spill] sm:$0xff] %v6044_v52  ;;  %v6050_v63 = vpop.f32.mrf.mxu1  ;;  %2776 = vmatpush.bf16.xpose.msrb.mxu1 %v6056_v5 }
 0x17a   : > { %7056 = vst [vmem:[#allocation70_spill] sm:$0xff] %v6042_v19 }
 0x17b   : > { %7058 = vst [vmem:[#allocation72_spill] sm:$0xff] %v6050_v63 }
 0x180   : > { %v6060_v24 = vpop.f32.mrf.mxu2  ;;  %v6064_v52 = vpop.f32.mrf.mxu0 }
 0x181   : > { %7059 = vst [vmem:[#allocation73_spill] sm:$0xff] %v6060_v24  ;;  %v6062_v33 = vpop.f32.mrf.mxu3  ;;  %v6066_v19 = vpop.f32.mrf.mxu1 }
 0x182   : > { %7060 = vst [vmem:[#allocation74_spill] sm:$0xff] %v6062_v33 }
 0x183   : > { %7061 = vst [vmem:[#allocation75_spill] sm:$0xff] %v6064_v52  ;;  %1261 = vmatmul.bf16.gmra.mxu0 %v5631_v58 }
 0x184   : > { %7062 = vst [vmem:[#allocation76_spill] sm:$0xff] %v6066_v19  ;;  %1430 = vmatmul.bf16.gmra.mxu1 %v5631_v58 }
 0x185   : > { %1599 = vmatmul.bf16.gmra.mxu2 %v5631_v58 }
 0x186   : > { %1768 = vmatmul.bf16.gmra.mxu3 %v5631_v58 }
 0x188   : > { %v6072_v60 = vpop.f32.mrf.mxu2  ;;  %v6076_v9 = vpop.f32.mrf.mxu0 }
 0x189   : > { %7063 = vst [vmem:[#allocation77_spill] sm:$0xff] %v6072_v60  ;;  %v6074_v7 = vpop.f32.mrf.mxu3  ;;  %v6078_v26 = vpop.f32.mrf.mxu1  ;;  %v809_v60 = vld [vmem:[%s5680_s19 + $0x18] sm:$0xff] }
 0x18a   : > { %7064 = vst [vmem:[#allocation78_spill] sm:$0xff] %v6074_v7 }
 0x18b   : > { %7065 = vst [vmem:[#allocation79_spill] sm:$0xff] %v6076_v9 }
 0x18c   : > { %7066 = vst [vmem:[#allocation80_spill] sm:$0xff] %v6078_v26 }
 0x190   : > { %v6080_v21 = vpop.f32.mrf.mxu2  ;;  %v6084_v19 = vpop.f32.mrf.mxu0 }
 0x191   : > { %7067 = vst [vmem:[#allocation81_spill] sm:$0xff] %v6080_v21  ;;  %v6082_v52 = vpop.f32.mrf.mxu3  ;;  %v6086_v33 = vpop.f32.mrf.mxu1 }
 0x192   : > { %7068 = vst [vmem:[#allocation82_spill] sm:$0xff] %v6082_v52 }
 0x193   : > { %7069 = vst [vmem:[#allocation83_spill] sm:$0xff] %v6084_v19  ;;  %1266 = vmatmul.bf16.gmra.mxu0 %v5611_v46 }
 0x194   : > { %7070 = vst [vmem:[#allocation84_spill] sm:$0xff] %v6086_v33  ;;  %1435 = vmatmul.bf16.gmra.mxu1 %v5611_v46 }
 0x195   : > { %1604 = vmatmul.bf16.gmra.mxu2 %v5611_v46 }
 0x196   : > { %1773 = vmatmul.bf16.gmra.mxu3 %v5611_v46 }
 0x198   : > { %v6092_v58 = vpop.f32.mrf.mxu2  ;;  %v6096_v26 = vpop.f32.mrf.mxu0 }
 0x199   : > { %7071 = vst [vmem:[#allocation85_spill] sm:$0xff] %v6092_v58  ;;  %v6094_v9 = vpop.f32.mrf.mxu3  ;;  %v6098_v21 = vpop.f32.mrf.mxu1  ;;  %v808_v58 = vld [vmem:[%s5680_s19 + $0x10] sm:$0xff] }
 0x19a   : > { %7072 = vst [vmem:[#allocation86_spill] sm:$0xff] %v6094_v9 }
 0x19b   : > { %7073 = vst [vmem:[#allocation87_spill] sm:$0xff] %v6096_v26 }
 0x19c   : > { %7074 = vst [vmem:[#allocation88_spill] sm:$0xff] %v6098_v21 }
 0x1a0   : > { %v6100_v52 = vpop.f32.mrf.mxu2  ;;  %v6104_v33 = vpop.f32.mrf.mxu0 }
 0x1a1   : > { %7075 = vst [vmem:[#allocation89_spill] sm:$0xff] %v6100_v52  ;;  %v6102_v19 = vpop.f32.mrf.mxu3  ;;  %v6106_v7 = vpop.f32.mrf.mxu1 }
 0x1a2   : > { %7076 = vst [vmem:[#allocation90_spill] sm:$0xff] %v6102_v19 }
 0x1a3   : > { %7077 = vst [vmem:[#allocation91_spill] sm:$0xff] %v6104_v33  ;;  %1271 = vmatmul.bf16.gmra.mxu0 %v5591_v34 }
 0x1a4   : > { %7078 = vst [vmem:[#allocation92_spill] sm:$0xff] %v6106_v7  ;;  %1440 = vmatmul.bf16.gmra.mxu1 %v5591_v34 }
 0x1a5   : > { %1609 = vmatmul.bf16.gmra.mxu2 %v5591_v34 }
 0x1a6   : > { %1778 = vmatmul.bf16.gmra.mxu3 %v5591_v34  ;;  %v840_v34 = vld [vmem:[%s5680_s19 + $0x110] sm:$0xff] }
 0x1a8   : > { %v6112_v46 = vpop.f32.mrf.mxu2  ;;  %v6116_v19 = vpop.f32.mrf.mxu0 }
 0x1a9   : > { %7079 = vst [vmem:[#allocation93_spill] sm:$0xff] %v6112_v46  ;;  %v6114_v52 = vpop.f32.mrf.mxu3  ;;  %v6118_v33 = vpop.f32.mrf.mxu1 }
 0x1aa   : > { %7080 = vst [vmem:[#allocation94_spill] sm:$0xff] %v6114_v52 }
 0x1ab   : > { %7081 = vst [vmem:[#allocation95_spill] sm:$0xff] %v6116_v19 }
 0x1ac   : > { %7082 = vst [vmem:[#allocation96_spill] sm:$0xff] %v6118_v33  ;;  %v856_v33 = vld [vmem:[%s5680_s19 + $0x190] sm:$0xff] }
 0x1b0   : > { %v6120_v7 = vpop.f32.mrf.mxu2  ;;  %v6124_v26 = vpop.f32.mrf.mxu0 }
 0x1b1   : > { %7083 = vst [vmem:[#allocation97_spill] sm:$0xff] %v6120_v7  ;;  %v6122_v21 = vpop.f32.mrf.mxu3  ;;  %v6126_v9 = vpop.f32.mrf.mxu1  ;;  %v841_v7 = vld [vmem:[%s5680_s19 + $0x118] sm:$0xff] }
 0x1b2   : > { %7084 = vst [vmem:[#allocation98_spill] sm:$0xff] %v6122_v21  ;;  %v6135_v21 = vpack.c.bf16 %v841_v7, %v840_v34  ;;  %v6153_v7 = vpack.c.bf16 %v809_v60, %v808_v58  ;;  %v825_v34 = vld [vmem:[%s5680_s19 + $0x98] sm:$0xff] }
 0x1b3   : > { %7085 = vst [vmem:[#allocation99_spill] sm:$0xff] %v6124_v26  ;;  %1276 = vmatmul.bf16.gmra.mxu0 %v5571_v22  ;;  %v857_v26 = vld [vmem:[%s5680_s19 + $0x198] sm:$0xff] }
 0x1b4   : > { %7086 = vst [vmem:[#allocation100_spill] sm:$0xff] %v6126_v9  ;;  %1445 = vmatmul.bf16.gmra.mxu1 %v5571_v22  ;;  %v6140_v9 = vpack.c.bf16 %v857_v26, %v856_v33  ;;  %2946 = vmatpush.bf16.xpose.msrb.mxu2 %v6135_v21 }
 0x1b5   : > { %1614 = vmatmul.bf16.gmra.mxu2 %v5571_v22  ;;  %2608 = vmatpush.bf16.xpose.msrb.mxu0 %v6153_v7 }
 0x1b6   : > { %1783 = vmatmul.bf16.gmra.mxu3 %v5571_v22  ;;  %7087 = vst [vmem:[#allocation101_spill] sm:$0xff] %v6140_v9  ;;  %v824_v22 = vld [vmem:[%s5680_s19 + $0x90] sm:$0xff] }
 0x1b7   : > { %3115 = vmatpush.bf16.xpose.msrb.mxu3 %v6140_v9  ;;  %v6156_v63 = vpack.c.bf16 %v825_v34, %v824_v22 }
 0x1b8   : > { %v6138_v19 = vpop.f32.mrf.mxu2  ;;  %v6144_v46 = vpop.f32.mrf.mxu0 }
 0x1b9   : > { %v6142_v52 = vpop.f32.mrf.mxu3  ;;  %7089 = vst [vmem:[#allocation103_spill] sm:$0xff] %v6144_v46  ;;  %v6150_v24 = vpop.f32.mrf.mxu1  ;;  %2777 = vmatpush.bf16.xpose.msrb.mxu1 %v6156_v63 }
 0x1ba   : > { %7088 = vst [vmem:[#allocation102_spill] sm:$0xff] %v6142_v52 }
 0x1bb   : > { %7090 = vst [vmem:[#allocation104_spill] sm:$0xff] %v6150_v24 }
 0x1c0   : > { %v6160_v33 = vpop.f32.mrf.mxu2  ;;  %v6164_v46 = vpop.f32.mrf.mxu0 }
 0x1c1   : > { %7091 = vst [vmem:[#allocation105_spill] sm:$0xff] %v6160_v33  ;;  %v6162_v26 = vpop.f32.mrf.mxu3  ;;  %v6166_v52 = vpop.f32.mrf.mxu1 }
 0x1c2   : > { %7092 = vst [vmem:[#allocation106_spill] sm:$0xff] %v6162_v26 }
 0x1c3   : > { %7093 = vst [vmem:[#allocation107_spill] sm:$0xff] %v6164_v46  ;;  %1281 = vmatmul.bf16.gmra.mxu0 %v5549_v8 }
 0x1c4   : > { %7094 = vst [vmem:[#allocation108_spill] sm:$0xff] %v6166_v52  ;;  %1450 = vmatmul.bf16.gmra.mxu1 %v5549_v8 }
 0x1c5   : > { %1619 = vmatmul.bf16.gmra.mxu2 %v5549_v8 }
 0x1c6   : > { %1788 = vmatmul.bf16.gmra.mxu3 %v5549_v8 }
 0x1c8   : > { %v6172_v60 = vpop.f32.mrf.mxu2  ;;  %v6176_v22 = vpop.f32.mrf.mxu0 }
 0x1c9   : > { %7095 = vst [vmem:[#allocation109_spill] sm:$0xff] %v6172_v60  ;;  %v6174_v58 = vpop.f32.mrf.mxu3  ;;  %v6178_v34 = vpop.f32.mrf.mxu1  ;;  %v807_v60 = vld [vmem:[%s5680_s19 + $0x8] sm:$0xff] }
 0x1ca   : > { %7096 = vst [vmem:[#allocation110_spill] sm:$0xff] %v6174_v58 }
 0x1cb   : > { %7097 = vst [vmem:[#allocation111_spill] sm:$0xff] %v6176_v22 }
 0x1cc   : > { %7098 = vst [vmem:[#allocation112_spill] sm:$0xff] %v6178_v34 }
 0x1d0   : > { %v6180_v9 = vpop.f32.mrf.mxu2  ;;  %v6184_v52 = vpop.f32.mrf.mxu0 }
 0x1d1   : > { %7099 = vst [vmem:[#allocation113_spill] sm:$0xff] %v6180_v9  ;;  %v6182_v46 = vpop.f32.mrf.mxu3  ;;  %v6186_v26 = vpop.f32.mrf.mxu1 }
 0x1d2   : > { %7100 = vst [vmem:[#allocation114_spill] sm:$0xff] %v6182_v46 }
 0x1d3   : > { %7101 = vst [vmem:[#allocation115_spill] sm:$0xff] %v6184_v52  ;;  %1286 = vmatmul.bf16.gmra.mxu0 %v5703_v55 }
 0x1d4   : > { %7102 = vst [vmem:[#allocation116_spill] sm:$0xff] %v6186_v26  ;;  %1455 = vmatmul.bf16.gmra.mxu1 %v5703_v55 }
 0x1d5   : > { %1624 = vmatmul.bf16.gmra.mxu2 %v5703_v55 }
 0x1d6   : > { %1793 = vmatmul.bf16.gmra.mxu3 %v5703_v55 }
 0x1d8   : > { %v6192_v8 = vpop.f32.mrf.mxu2  ;;  %v6196_v34 = vpop.f32.mrf.mxu0 }
 0x1d9   : > { %7103 = vst [vmem:[#allocation117_spill] sm:$0xff] %v6192_v8  ;;  %v6194_v22 = vpop.f32.mrf.mxu3  ;;  %v6198_v9 = vpop.f32.mrf.mxu1  ;;  %v806_v8 = vld [vmem:[%s5680_s19] sm:$0xff] }
 0x1da   : > { %7104 = vst [vmem:[#allocation118_spill] sm:$0xff] %v6194_v22 }
 0x1db   : > { %7105 = vst [vmem:[#allocation119_spill] sm:$0xff] %v6196_v34 }
 0x1dc   : > { %7106 = vst [vmem:[#allocation120_spill] sm:$0xff] %v6198_v9 }
 0x1e0   : > { %v6200_v46 = vpop.f32.mrf.mxu2  ;;  %v6204_v26 = vpop.f32.mrf.mxu0 }
 0x1e1   : > { %7107 = vst [vmem:[#allocation121_spill] sm:$0xff] %v6200_v46  ;;  %v6202_v52 = vpop.f32.mrf.mxu3  ;;  %v6206_v58 = vpop.f32.mrf.mxu1 }
 0x1e2   : > { %7108 = vst [vmem:[#allocation122_spill] sm:$0xff] %v6202_v52 }
 0x1e3   : > { %7109 = vst [vmem:[#allocation123_spill] sm:$0xff] %v6204_v26  ;;  %1291 = vmatmul.bf16.gmra.mxu0 %v5671_v27 }
 0x1e4   : > { %7110 = vst [vmem:[#allocation124_spill] sm:$0xff] %v6206_v58  ;;  %1460 = vmatmul.bf16.gmra.mxu1 %v5671_v27 }
 0x1e5   : > { %1629 = vmatmul.bf16.gmra.mxu2 %v5671_v27 }
 0x1e6   : > { %1798 = vmatmul.bf16.gmra.mxu3 %v5671_v27  ;;  %v838_v27 = vld [vmem:[%s5680_s19 + $0x100] sm:$0xff] }
 0x1e8   : > { %v6212_v55 = vpop.f32.mrf.mxu2  ;;  %v6216_v52 = vpop.f32.mrf.mxu0 }
 0x1e9   : > { %7111 = vst [vmem:[#allocation125_spill] sm:$0xff] %v6212_v55  ;;  %v6214_v46 = vpop.f32.mrf.mxu3  ;;  %v6218_v26 = vpop.f32.mrf.mxu1 }
 0x1ea   : > { %7112 = vst [vmem:[#allocation126_spill] sm:$0xff] %v6214_v46 }
 0x1eb   : > { %7113 = vst [vmem:[#allocation127_spill] sm:$0xff] %v6216_v52 }
 0x1ec   : > { %7114 = vst [vmem:[#allocation128_spill] sm:$0xff] %v6218_v26  ;;  %v854_v26 = vld [vmem:[%s5680_s19 + $0x180] sm:$0xff] }
 0x1f0   : > { %v6220_v58 = vpop.f32.mrf.mxu2  ;;  %v6224_v34 = vpop.f32.mrf.mxu0 }
 0x1f1   : > { %7115 = vst [vmem:[#allocation129_spill] sm:$0xff] %v6220_v58  ;;  %v6222_v9 = vpop.f32.mrf.mxu3  ;;  %v6226_v22 = vpop.f32.mrf.mxu1  ;;  %v839_v58 = vld [vmem:[%s5680_s19 + $0x108] sm:$0xff] }
 0x1f2   : > { %7116 = vst [vmem:[#allocation130_spill] sm:$0xff] %v6222_v9  ;;  %v6235_v9 = vpack.c.bf16 %v839_v58, %v838_v27  ;;  %v6253_v58 = vpack.c.bf16 %v807_v60, %v806_v8  ;;  %v823_v27 = vld [vmem:[%s5680_s19 + $0x88] sm:$0xff] }
 0x1f3   : > { %7117 = vst [vmem:[#allocation131_spill] sm:$0xff] %v6224_v34  ;;  %1296 = vmatmul.bf16.gmra.mxu0 %v5653_v10  ;;  %v855_v34 = vld [vmem:[%s5680_s19 + $0x188] sm:$0xff] }
 0x1f4   : > { %7118 = vst [vmem:[#allocation132_spill] sm:$0xff] %v6226_v22  ;;  %1465 = vmatmul.bf16.gmra.mxu1 %v5653_v10  ;;  %v6240_v22 = vpack.c.bf16 %v855_v34, %v854_v26  ;;  %2947 = vmatpush.bf16.xpose.msrb.mxu2 %v6235_v9 }
 0x1f5   : > { %1634 = vmatmul.bf16.gmra.mxu2 %v5653_v10  ;;  %2609 = vmatpush.bf16.xpose.msrb.mxu0 %v6253_v58 }
 0x1f6   : > { %1803 = vmatmul.bf16.gmra.mxu3 %v5653_v10  ;;  %v822_v10 = vld [vmem:[%s5680_s19 + $0x80] sm:$0xff] }
 0x1f7   : > { %3116 = vmatpush.bf16.xpose.msrb.mxu3 %v6240_v22  ;;  %v6256_v24 = vpack.c.bf16 %v823_v27, %v822_v10 }
 0x1f8   : > { %v6238_v52 = vpop.f32.mrf.mxu2  ;;  %v6244_v55 = vpop.f32.mrf.mxu0 }
 0x1f9   : > { %v6242_v46 = vpop.f32.mrf.mxu3  ;;  %7120 = vst [vmem:[#allocation134_spill] sm:$0xff] %v6244_v55  ;;  %v6250_v33 = vpop.f32.mrf.mxu1  ;;  %2778 = vmatpush.bf16.xpose.msrb.mxu1 %v6256_v24 }
 0x1fa   : > { %7119 = vst [vmem:[#allocation133_spill] sm:$0xff] %v6242_v46 }
 0x200   : > { %v6260_v26 = vpop.f32.mrf.mxu2  ;;  %v6264_v55 = vpop.f32.mrf.mxu0 }
 0x201   : > { %7121 = vst [vmem:[#allocation135_spill] sm:$0xff] %v6260_v26  ;;  %v6262_v34 = vpop.f32.mrf.mxu3  ;;  %v6266_v46 = vpop.f32.mrf.mxu1 }
 0x202   : > { %7122 = vst [vmem:[#allocation136_spill] sm:$0xff] %v6262_v34 }
 0x203   : > { %7123 = vst [vmem:[#allocation137_spill] sm:$0xff] %v6264_v55  ;;  %1301 = vmatmul.bf16.gmra.mxu0 %v5633_v59 }
 0x204   : > { %7124 = vst [vmem:[#allocation138_spill] sm:$0xff] %v6266_v46  ;;  %1470 = vmatmul.bf16.gmra.mxu1 %v5633_v59 }
 0x205   : > { %1639 = vmatmul.bf16.gmra.mxu2 %v5633_v59 }
 0x206   : > { %1808 = vmatmul.bf16.gmra.mxu3 %v5633_v59 }
 0x208   : > { %v6272_v60 = vpop.f32.mrf.mxu2  ;;  %v6276_v10 = vpop.f32.mrf.mxu0 }
 0x209   : > { %v6274_v8 = vpop.f32.mrf.mxu3  ;;  %7126 = vst [vmem:[#allocation140_spill] sm:$0xff] %v6276_v10  ;;  %v6278_v27 = vpop.f32.mrf.mxu1 }
 0x20a   : > { %7125 = vst [vmem:[#allocation139_spill] sm:$0xff] %v6274_v8 }
 0x20b   : > { %7127 = vst [vmem:[#allocation141_spill] sm:$0xff] %v6278_v27 }
 0x210   : > { %v6280_v34 = vpop.f32.mrf.mxu2  ;;  %v6284_v46 = vpop.f32.mrf.mxu0 }
 0x211   : > { %7128 = vst [vmem:[#allocation142_spill] sm:$0xff] %v6280_v34  ;;  %v6282_v55 = vpop.f32.mrf.mxu3  ;;  %v6286_v26 = vpop.f32.mrf.mxu1 }
 0x212   : > { %7129 = vst [vmem:[#allocation143_spill] sm:$0xff] %v6282_v55 }
 0x213   : > { %7130 = vst [vmem:[#allocation144_spill] sm:$0xff] %v6284_v46  ;;  %1306 = vmatmul.bf16.gmra.mxu0 %v5613_v47 }
 0x214   : > { %7131 = vst [vmem:[#allocation145_spill] sm:$0xff] %v6286_v26  ;;  %1475 = vmatmul.bf16.gmra.mxu1 %v5613_v47 }
 0x215   : > { %1644 = vmatmul.bf16.gmra.mxu2 %v5613_v47 }
 0x216   : > { %1813 = vmatmul.bf16.gmra.mxu3 %v5613_v47 }
 0x218   : > { %v6292_v59 = vpop.f32.mrf.mxu2  ;;  %v6296_v27 = vpop.f32.mrf.mxu0 }
 0x219   : > { %v6294_v10 = vpop.f32.mrf.mxu3  ;;  %7133 = vst [vmem:[#allocation147_spill] sm:$0xff] %v6296_v27  ;;  %v6298_v34 = vpop.f32.mrf.mxu1 }
 0x21a   : > { %7132 = vst [vmem:[#allocation146_spill] sm:$0xff] %v6294_v10 }
 0x21b   : > { %7134 = vst [vmem:[#allocation148_spill] sm:$0xff] %v6298_v34 }
 0x220   : > { %v6300_v55 = vpop.f32.mrf.mxu2  ;;  %v6304_v26 = vpop.f32.mrf.mxu0 }
 0x221   : > { %7135 = vst [vmem:[#allocation149_spill] sm:$0xff] %v6300_v55  ;;  %v6302_v46 = vpop.f32.mrf.mxu3  ;;  %v6306_v8 = vpop.f32.mrf.mxu1 }
 0x222   : > { %7136 = vst [vmem:[#allocation150_spill] sm:$0xff] %v6302_v46 }
 0x223   : > { %7137 = vst [vmem:[#allocation151_spill] sm:$0xff] %v6304_v26  ;;  %1311 = vmatmul.bf16.gmra.mxu0 %v5593_v35 }
 0x224   : > { %7138 = vst [vmem:[#allocation152_spill] sm:$0xff] %v6306_v8  ;;  %1480 = vmatmul.bf16.gmra.mxu1 %v5593_v35 }
 0x225   : > { %1649 = vmatmul.bf16.gmra.mxu2 %v5593_v35 }
 0x226   : > { %1818 = vmatmul.bf16.gmra.mxu3 %v5593_v35 }
 0x228   : > { %v6312_v47 = vpop.f32.mrf.mxu2  ;;  %v6316_v34 = vpop.f32.mrf.mxu0 }
 0x229   : > { %7139 = vst [vmem:[#allocation153_spill] sm:$0xff] %v6312_v47  ;;  %v6314_v27 = vpop.f32.mrf.mxu3  ;;  %v6318_v55 = vpop.f32.mrf.mxu1 }
 0x22a   : > { %7140 = vst [vmem:[#allocation154_spill] sm:$0xff] %v6314_v27 }
 0x22b   : > { %7141 = vst [vmem:[#allocation155_spill] sm:$0xff] %v6316_v34 }
 0x22c   : > { %7142 = vst [vmem:[#allocation156_spill] sm:$0xff] %v6318_v55 }
 0x230   : > { %v6320_v46 = vpop.f32.mrf.mxu2  ;;  %v6324_v8 = vpop.f32.mrf.mxu0 }
 0x231   : > { %7143 = vst [vmem:[#allocation157_spill] sm:$0xff] %v6320_v46  ;;  %v6322_v26 = vpop.f32.mrf.mxu3  ;;  %v6326_v10 = vpop.f32.mrf.mxu1 }
 0x232   : > { %7144 = vst [vmem:[#allocation158_spill] sm:$0xff] %v6322_v26 }
 0x233   : > { %7145 = vst [vmem:[#allocation159_spill] sm:$0xff] %v6324_v8  ;;  %1316 = vmatmul.bf16.gmra.mxu0 %v5573_v23 }
 0x234   : > { %7146 = vst [vmem:[#allocation160_spill] sm:$0xff] %v6326_v10  ;;  %1485 = vmatmul.bf16.gmra.mxu1 %v5573_v23 }
 0x235   : > { %1654 = vmatmul.bf16.gmra.mxu2 %v5573_v23 }
 0x236   : > { %1823 = vmatmul.bf16.gmra.mxu3 %v5573_v23 }
 0x238   : > { %v6332_v35 = vpop.f32.mrf.mxu2  ;;  %v6336_v55 = vpop.f32.mrf.mxu0 }
 0x239   : > { %7147 = vst [vmem:[#allocation161_spill] sm:$0xff] %v6332_v35  ;;  %v6334_v34 = vpop.f32.mrf.mxu3  ;;  %v6338_v46 = vpop.f32.mrf.mxu1 }
 0x23a   : > { %7148 = vst [vmem:[#allocation162_spill] sm:$0xff] %v6334_v34 }
 0x23b   : > { %7149 = vst [vmem:[#allocation163_spill] sm:$0xff] %v6336_v55 }
 0x23c   : > { %7150 = vst [vmem:[#allocation164_spill] sm:$0xff] %v6338_v46 }
 0x240   : > { %v6340_v26 = vpop.f32.mrf.mxu2  ;;  %v6344_v10 = vpop.f32.mrf.mxu0 }
 0x241   : > { %7151 = vst [vmem:[#allocation165_spill] sm:$0xff] %v6340_v26  ;;  %v6342_v8 = vpop.f32.mrf.mxu3  ;;  %v6346_v27 = vpop.f32.mrf.mxu1 }
 0x242   : > { %7152 = vst [vmem:[#allocation166_spill] sm:$0xff] %v6342_v8 }
 0x243   : > { %7153 = vst [vmem:[#allocation167_spill] sm:$0xff] %v6344_v10  ;;  %1321 = vmatmul.bf16.gmra.mxu0 %v5554_v11 }
 0x244   : > { %7154 = vst [vmem:[#allocation168_spill] sm:$0xff] %v6346_v27  ;;  %1490 = vmatmul.bf16.gmra.mxu1 %v5554_v11 }
 0x245   : > { %1659 = vmatmul.bf16.gmra.mxu2 %v5554_v11 }
 0x246   : > { %1828 = vmatmul.bf16.gmra.mxu3 %v5554_v11 }
 0x248   : > { %v6352_v23 = vpop.f32.mrf.mxu2  ;;  %v6356_v46 = vpop.f32.mrf.mxu0 }
 0x249   : > { %7155 = vst [vmem:[#allocation169_spill] sm:$0xff] %v6352_v23  ;;  %v6354_v55 = vpop.f32.mrf.mxu3  ;;  %v6358_v26 = vpop.f32.mrf.mxu1 }
 0x24a   : > { %7156 = vst [vmem:[#allocation170_spill] sm:$0xff] %v6354_v55 }
 0x24b   : > { %7157 = vst [vmem:[#allocation171_spill] sm:$0xff] %v6356_v46 }
 0x24c   : > { %7158 = vst [vmem:[#allocation172_spill] sm:$0xff] %v6358_v26 }
 0x250   : > { %v6360_v8 = vpop.f32.mrf.mxu2  ;;  %v6364_v27 = vpop.f32.mrf.mxu0 }
 0x251   : > { %7159 = vst [vmem:[#allocation173_spill] sm:$0xff] %v6360_v8  ;;  %v6362_v10 = vpop.f32.mrf.mxu3  ;;  %v6366_v34 = vpop.f32.mrf.mxu1 }
 0x252   : > { %7160 = vst [vmem:[#allocation174_spill] sm:$0xff] %v6362_v10 }
 0x253   : > { %7161 = vst [vmem:[#allocation175_spill] sm:$0xff] %v6364_v27  ;;  %2610 = vmatmul.bf16.vlgmr.msrb.gmra.mxu0 %v6253_v58 }
 0x254   : > { %7162 = vst [vmem:[#allocation176_spill] sm:$0xff] %v6366_v34  ;;  %2779 = vmatmul.bf16.vlgmr.msrb.gmra.mxu1 %v6253_v58 }
 0x255   : > { %2948 = vmatmul.bf16.vlgmr.msrb.gmra.mxu2 %v6253_v58 }
 0x256   : > { %3117 = vmatmul.bf16.vlgmr.msrb.gmra.mxu3 %v6253_v58 }
 0x258   : > { %v6372_v11 = vpop.f32.mrf.mxu2  ;;  %v6376_v26 = vpop.f32.mrf.mxu0 }
 0x259   : > { %7163 = vst [vmem:[#allocation177_spill] sm:$0xff] %v6372_v11  ;;  %v6374_v46 = vpop.f32.mrf.mxu3  ;;  %v6378_v8 = vpop.f32.mrf.mxu1 }
 0x25a   : > { %7164 = vst [vmem:[#allocation178_spill] sm:$0xff] %v6374_v46 }
 0x25b   : > { %7165 = vst [vmem:[#allocation179_spill] sm:$0xff] %v6376_v26 }
 0x25c   : > { %7166 = vst [vmem:[#allocation180_spill] sm:$0xff] %v6378_v8 }
 0x260   : > { %v6380_v10 = vpop.f32.mrf.mxu2  ;;  %v6384_v34 = vpop.f32.mrf.mxu0 }
 0x261   : > { %7167 = vst [vmem:[#allocation181_spill] sm:$0xff] %v6380_v10  ;;  %v6382_v27 = vpop.f32.mrf.mxu3  ;;  %v6386_v55 = vpop.f32.mrf.mxu1 }
 0x262   : > { %7168 = vst [vmem:[#allocation182_spill] sm:$0xff] %v6382_v27 }
 0x263   : > { %7169 = vst [vmem:[#allocation183_spill] sm:$0xff] %v6384_v34  ;;  %2615 = vmatmul.bf16.gmra.mxu0 %v6153_v7 }
 0x264   : > { %7170 = vst [vmem:[#allocation184_spill] sm:$0xff] %v6386_v55  ;;  %2784 = vmatmul.bf16.gmra.mxu1 %v6153_v7 }
 0x265   : > { %2953 = vmatmul.bf16.gmra.mxu2 %v6153_v7 }
 0x266   : > { %3122 = vmatmul.bf16.gmra.mxu3 %v6153_v7 }
 0x268   : > { %v6392_v58 = vpop.f32.mrf.mxu2  ;;  %v6396_v8 = vpop.f32.mrf.mxu0 }
 0x269   : > { %7171 = vst [vmem:[#allocation185_spill] sm:$0xff] %v6392_v58  ;;  %v6394_v26 = vpop.f32.mrf.mxu3  ;;  %v6398_v10 = vpop.f32.mrf.mxu1 }
 0x26a   : > { %7172 = vst [vmem:[#allocation186_spill] sm:$0xff] %v6394_v26 }
 0x26b   : > { %7173 = vst [vmem:[#allocation187_spill] sm:$0xff] %v6396_v8 }
 0x26c   : > { %7174 = vst [vmem:[#allocation188_spill] sm:$0xff] %v6398_v10 }
 0x270   : > { %v6400_v27 = vpop.f32.mrf.mxu2  ;;  %v6404_v55 = vpop.f32.mrf.mxu0 }
 0x271   : > { %7175 = vst [vmem:[#allocation189_spill] sm:$0xff] %v6400_v27  ;;  %v6402_v34 = vpop.f32.mrf.mxu3  ;;  %v6406_v46 = vpop.f32.mrf.mxu1 }
 0x272   : > { %7176 = vst [vmem:[#allocation190_spill] sm:$0xff] %v6402_v34 }
 0x273   : > { %7177 = vst [vmem:[#allocation191_spill] sm:$0xff] %v6404_v55  ;;  %2620 = vmatmul.bf16.gmra.mxu0 %v6053_v57 }
 0x274   : > { %7178 = vst [vmem:[#allocation192_spill] sm:$0xff] %v6406_v46  ;;  %2789 = vmatmul.bf16.gmra.mxu1 %v6053_v57 }
 0x275   : > { %2958 = vmatmul.bf16.gmra.mxu2 %v6053_v57 }
 0x276   : > { %3127 = vmatmul.bf16.gmra.mxu3 %v6053_v57 }
 0x278   : > { %v6412_v7 = vpop.f32.mrf.mxu2  ;;  %v6416_v10 = vpop.f32.mrf.mxu0 }
 0x279   : > { %7179 = vst [vmem:[#allocation193_spill] sm:$0xff] %v6412_v7  ;;  %v6414_v8 = vpop.f32.mrf.mxu3  ;;  %v6418_v27 = vpop.f32.mrf.mxu1 }
 0x27a   : > { %7180 = vst [vmem:[#allocation194_spill] sm:$0xff] %v6414_v8 }
 0x27b   : > { %7181 = vst [vmem:[#allocation195_spill] sm:$0xff] %v6416_v10 }
 0x27c   : > { %7182 = vst [vmem:[#allocation196_spill] sm:$0xff] %v6418_v27 }
 0x280   : > { %v6420_v34 = vpop.f32.mrf.mxu2  ;;  %v6424_v46 = vpop.f32.mrf.mxu0 }
 0x281   : > { %7183 = vst [vmem:[#allocation197_spill] sm:$0xff] %v6420_v34  ;;  %v6422_v55 = vpop.f32.mrf.mxu3  ;;  %v6426_v26 = vpop.f32.mrf.mxu1 }
 0x282   : > { %7184 = vst [vmem:[#allocation198_spill] sm:$0xff] %v6422_v55 }
 0x283   : > { %7185 = vst [vmem:[#allocation199_spill] sm:$0xff] %v6424_v46  ;;  %2625 = vmatmul.bf16.gmra.mxu0 %v5953_v4 }
 0x284   : > { %7186 = vst [vmem:[#allocation200_spill] sm:$0xff] %v6426_v26  ;;  %2794 = vmatmul.bf16.gmra.mxu1 %v5953_v4 }
 0x285   : > { %2963 = vmatmul.bf16.gmra.mxu2 %v5953_v4 }
 0x286   : > { %3132 = vmatmul.bf16.gmra.mxu3 %v5953_v4 }
 0x288   : > { %v6432_v57 = vpop.f32.mrf.mxu2  ;;  %v6436_v27 = vpop.f32.mrf.mxu0 }
 0x289   : > { %7187 = vst [vmem:[#allocation201_spill] sm:$0xff] %v6432_v57  ;;  %v6434_v10 = vpop.f32.mrf.mxu3  ;;  %v6438_v34 = vpop.f32.mrf.mxu1 }
 0x28a   : > { %7188 = vst [vmem:[#allocation202_spill] sm:$0xff] %v6434_v10 }
 0x28b   : > { %7189 = vst [vmem:[#allocation203_spill] sm:$0xff] %v6436_v27 }
 0x28c   : > { %7190 = vst [vmem:[#allocation204_spill] sm:$0xff] %v6438_v34 }
 0x290   : > { %v6440_v55 = vpop.f32.mrf.mxu2  ;;  %v6444_v26 = vpop.f32.mrf.mxu0 }
 0x291   : > { %7191 = vst [vmem:[#allocation205_spill] sm:$0xff] %v6440_v55  ;;  %v6442_v46 = vpop.f32.mrf.mxu3  ;;  %v6446_v8 = vpop.f32.mrf.mxu1 }
 0x292   : > { %7192 = vst [vmem:[#allocation206_spill] sm:$0xff] %v6442_v46 }
 0x293   : > { %7193 = vst [vmem:[#allocation207_spill] sm:$0xff] %v6444_v26  ;;  %2630 = vmatmul.bf16.gmra.mxu0 %v5853_v25 }
 0x294   : > { %7194 = vst [vmem:[#allocation208_spill] sm:$0xff] %v6446_v8  ;;  %2799 = vmatmul.bf16.gmra.mxu1 %v5853_v25 }
 0x295   : > { %2968 = vmatmul.bf16.gmra.mxu2 %v5853_v25 }
 0x296   : > { %3137 = vmatmul.bf16.gmra.mxu3 %v5853_v25 }
 0x298   : > { %v6452_v4 = vpop.f32.mrf.mxu2  ;;  %v6456_v34 = vpop.f32.mrf.mxu0 }
 0x299   : > { %7195 = vst [vmem:[#allocation209_spill] sm:$0xff] %v6452_v4  ;;  %v6454_v27 = vpop.f32.mrf.mxu3  ;;  %v6458_v55 = vpop.f32.mrf.mxu1 }
 0x29a   : > { %7196 = vst [vmem:[#allocation210_spill] sm:$0xff] %v6454_v27 }
 0x29b   : > { %7197 = vst [vmem:[#allocation211_spill] sm:$0xff] %v6456_v34 }
 0x29c   : > { %7198 = vst [vmem:[#allocation212_spill] sm:$0xff] %v6458_v55 }
 0x2a0   : > { %v6460_v46 = vpop.f32.mrf.mxu2  ;;  %v6464_v8 = vpop.f32.mrf.mxu0 }
 0x2a1   : > { %7199 = vst [vmem:[#allocation213_spill] sm:$0xff] %v6460_v46  ;;  %v6462_v26 = vpop.f32.mrf.mxu3  ;;  %v6466_v10 = vpop.f32.mrf.mxu1 }
 0x2a2   : > { %7200 = vst [vmem:[#allocation214_spill] sm:$0xff] %v6462_v26 }
 0x2a3   : > { %7201 = vst [vmem:[#allocation215_spill] sm:$0xff] %v6464_v8  ;;  %2635 = vmatmul.bf16.gmra.mxu0 %v5773_v36 }
 0x2a4   : > { %7202 = vst [vmem:[#allocation216_spill] sm:$0xff] %v6466_v10  ;;  %2804 = vmatmul.bf16.gmra.mxu1 %v5773_v36 }
 0x2a5   : > { %2973 = vmatmul.bf16.gmra.mxu2 %v5773_v36 }
 0x2a6   : > { %3142 = vmatmul.bf16.gmra.mxu3 %v5773_v36 }
 0x2a8   : > { %v6472_v25 = vpop.f32.mrf.mxu2  ;;  %v6476_v55 = vpop.f32.mrf.mxu0 }
 0x2a9   : > { %7203 = vst [vmem:[#allocation217_spill] sm:$0xff] %v6472_v25  ;;  %v6474_v34 = vpop.f32.mrf.mxu3  ;;  %v6478_v46 = vpop.f32.mrf.mxu1 }
 0x2aa   : > { %7204 = vst [vmem:[#allocation218_spill] sm:$0xff] %v6474_v34 }
 0x2ab   : > { %7205 = vst [vmem:[#allocation219_spill] sm:$0xff] %v6476_v55 }
 0x2ac   : > { %7206 = vst [vmem:[#allocation220_spill] sm:$0xff] %v6478_v46 }
 0x2b0   : > { %v6480_v26 = vpop.f32.mrf.mxu2  ;;  %v6484_v10 = vpop.f32.mrf.mxu0 }
 0x2b1   : > { %7207 = vst [vmem:[#allocation221_spill] sm:$0xff] %v6480_v26  ;;  %v6482_v8 = vpop.f32.mrf.mxu3  ;;  %v6486_v27 = vpop.f32.mrf.mxu1 }
 0x2b2   : > { %7208 = vst [vmem:[#allocation222_spill] sm:$0xff] %v6482_v8 }
 0x2b3   : > { %7209 = vst [vmem:[#allocation223_spill] sm:$0xff] %v6484_v10  ;;  %2640 = vmatmul.bf16.gmra.mxu0 %v5734_v16 }
 0x2b4   : > { %7210 = vst [vmem:[#allocation224_spill] sm:$0xff] %v6486_v27  ;;  %2809 = vmatmul.bf16.gmra.mxu1 %v5734_v16 }
 0x2b5   : > { %2978 = vmatmul.bf16.gmra.mxu2 %v5734_v16 }
 0x2b6   : > { %3147 = vmatmul.bf16.gmra.mxu3 %v5734_v16 }
 0x2b8   : > { %v6492_v36 = vpop.f32.mrf.mxu2  ;;  %v6496_v46 = vpop.f32.mrf.mxu0 }
 0x2b9   : > { %7211 = vst [vmem:[#allocation225_spill] sm:$0xff] %v6492_v36  ;;  %v6494_v55 = vpop.f32.mrf.mxu3  ;;  %v6498_v26 = vpop.f32.mrf.mxu1 }
 0x2ba   : > { %7212 = vst [vmem:[#allocation226_spill] sm:$0xff] %v6494_v55 }
 0x2bb   : > { %7213 = vst [vmem:[#allocation227_spill] sm:$0xff] %v6496_v46 }
 0x2bc   : > { %7214 = vst [vmem:[#allocation228_spill] sm:$0xff] %v6498_v26 }
 0x2c0   : > { %v6500_v8 = vpop.f32.mrf.mxu2  ;;  %v6504_v27 = vpop.f32.mrf.mxu0 }
 0x2c1   : > { %7215 = vst [vmem:[#allocation229_spill] sm:$0xff] %v6500_v8  ;;  %v6502_v10 = vpop.f32.mrf.mxu3  ;;  %v6506_v34 = vpop.f32.mrf.mxu1 }
 0x2c2   : > { %7216 = vst [vmem:[#allocation230_spill] sm:$0xff] %v6502_v10 }
 0x2c3   : > { %7217 = vst [vmem:[#allocation231_spill] sm:$0xff] %v6504_v27  ;;  %2645 = vmatmul.bf16.gmra.mxu0 %v5709_v62 }
 0x2c4   : > { %7218 = vst [vmem:[#allocation232_spill] sm:$0xff] %v6506_v34  ;;  %2814 = vmatmul.bf16.gmra.mxu1 %v5709_v62 }
 0x2c5   : > { %2983 = vmatmul.bf16.gmra.mxu2 %v5709_v62 }
 0x2c6   : > { %3152 = vmatmul.bf16.gmra.mxu3 %v5709_v62 }
 0x2c8   : > { %v6512_v16 = vpop.f32.mrf.mxu2  ;;  %v6516_v36 = vpop.f32.mrf.mxu0 }
 0x2c9   : > { %7219 = vst [vmem:[#allocation233_spill] sm:$0xff] %v6512_v16  ;;  %v6514_v55 = vpop.f32.mrf.mxu3  ;;  %v6518_v8 = vpop.f32.mrf.mxu1 }
 0x2ca   : > { %7220 = vst [vmem:[#allocation234_spill] sm:$0xff] %v6514_v55 }
 0x2cb   : > { %7221 = vst [vmem:[#allocation235_spill] sm:$0xff] %v6516_v36 }
 0x2cc   : > { %7222 = vst [vmem:[#allocation236_spill] sm:$0xff] %v6518_v8 }
 0x2d0   : > { %v6520_v10 = vpop.f32.mrf.mxu2  ;;  %v2611_v34 = vpop.f32.mrf.mxu0 }
 0x2d1   : > { %7223 = vst [vmem:[#allocation237_spill] sm:$0xff] %v6520_v10  ;;  %v6522_v27 = vpop.f32.mrf.mxu3  ;;  %v2780_v26 = vpop.f32.mrf.mxu1  ;;  %v4305_v62 = vsub.f32 %v5784_v20, %v2611_v34 }
 0x2d2   : > { %7224 = vst [vmem:[#allocation238_spill] sm:$0xff] %v6522_v27  ;;  %v4306_v36 = vsub.f32 %v5786_v39, %v2780_v26 }
 0x2d3   : > { %2650 = vmatmul.bf16.gmra.mxu0 %v6256_v24  ;;  %v4561_v10 = vmul.f32 0.00048828125, %v4305_v62 }
 0x2d4   : > { %2819 = vmatmul.bf16.gmra.mxu1 %v6256_v24  ;;  %v4562_v25 = vmul.f32 0.00048828125, %v4306_v36 }
 0x2d5   : > { %2988 = vmatmul.bf16.gmra.mxu2 %v6256_v24  ;;  %v4817_v11 = vand.u32 2147483647, %v4561_v10 }
 0x2d6   : > { %3157 = vmatmul.bf16.gmra.mxu3 %v6256_v24  ;;  %v4818_v34 = vand.u32 2147483647, %v4562_v25 }
 0x2d8   : > { %v2949_v55 = vpop.f32.mrf.mxu2  ;;  %v2613_v16 = vpop.f32.mrf.mxu0 }
 0x2d9   : > { %v3118_v8 = vpop.f32.mrf.mxu3  ;;  %v4309_v27 = vsub.f32 %v5796_v42, %v2613_v16  ;;  %v2782_v46 = vpop.f32.mrf.mxu1  ;;  %v4307_v7 = vsub.f32 %v5792_v40, %v2949_v55 }
 0x2da   : > { %v4310_v4 = vsub.f32 %v5798_v43, %v2782_v46  ;;  %v4308_v20 = vsub.f32 %v5794_v41, %v3118_v8 }
 0x2db   : > { %v4565_v57 = vmul.f32 0.00048828125, %v4309_v27  ;;  %v4563_v35 = vmul.f32 0.00048828125, %v4307_v7 }
 0x2dc   : > { %v4566_v58 = vmul.f32 0.00048828125, %v4310_v4  ;;  %v4564_v47 = vmul.f32 0.00048828125, %v4308_v20 }
 0x2dd   : > { %v4821_v24 = vand.u32 2147483647, %v4565_v57  ;;  %v4819_v27 = vand.u32 2147483647, %v4563_v35 }
 0x2de   : > { %v4822_v39 = vand.u32 2147483647, %v4566_v58 }
 0x2df   : > { %v5073_v26 = vadd.f32 %v4821_v24, %v4817_v11 }
 0x2e0   : > { %v2951_v23 = vpop.f32.mrf.mxu2  ;;  %v5142_v62 = vadd.f32 %v4822_v39, %v4818_v34  ;;  %v2616_v36 = vpop.f32.mrf.mxu0 }
 0x2e1   : > { %v4311_v42 = vsub.f32 %v5800_v3, %v2951_v23  ;;  %v3120_v16 = vpop.f32.mrf.mxu3  ;;  %v4313_v40 = vsub.f32 %v5804_v49, %v2616_v36  ;;  %v2785_v46 = vpop.f32.mrf.mxu1  ;;  %v4820_v3 = vand.u32 2147483647, %v4564_v47 }
 0x2e2   : > { %v4312_v43 = vsub.f32 %v5802_v48, %v3120_v16  ;;  %v4314_v41 = vsub.f32 %v5806_v50, %v2785_v46 }
 0x2e3   : > { %v4567_v55 = vmul.f32 0.00048828125, %v4311_v42  ;;  %v4569_v10 = vmul.f32 0.00048828125, %v4313_v40  ;;  %2655 = vmatmul.bf16.gmra.mxu0 %v6156_v63 }
 0x2e4   : > { %v4568_v8 = vmul.f32 0.00048828125, %v4312_v43  ;;  %v4570_v58 = vmul.f32 0.00048828125, %v4314_v41  ;;  %2824 = vmatmul.bf16.gmra.mxu1 %v6156_v63 }
 0x2e5   : > { %v4823_v11 = vand.u32 2147483647, %v4567_v55  ;;  %2993 = vmatmul.bf16.gmra.mxu2 %v6156_v63  ;;  %v4825_v48 = vand.u32 2147483647, %v4569_v10 }
 0x2e6   : > { %v4824_v23 = vand.u32 2147483647, %v4568_v8  ;;  %3162 = vmatmul.bf16.gmra.mxu3 %v6156_v63  ;;  %v4826_v7 = vand.u32 2147483647, %v4570_v58 }
 0x2e7   : > { %v5211_v49 = vadd.f32 %v4823_v11, %v4819_v27  ;;  %v5074_v50 = vadd.f32 %v5073_v26, %v4825_v48 }
 0x2e8   : > { %v5280_v57 = vadd.f32 %v4824_v23, %v4820_v3  ;;  %v2954_v4 = vpop.f32.mrf.mxu2  ;;  %v5143_v25 = vadd.f32 %v5142_v62, %v4826_v7  ;;  %v2618_v24 = vpop.f32.mrf.mxu0 }
 0x2e9   : > { %v4315_v20 = vsub.f32 %v5812_v51, %v2954_v4  ;;  %v3123_v35 = vpop.f32.mrf.mxu3  ;;  %v4317_v39 = vsub.f32 %v5816_v54, %v2618_v24  ;;  %v2787_v42 = vpop.f32.mrf.mxu1 }
 0x2ea   : > { %v4316_v34 = vsub.f32 %v5814_v53, %v3123_v35  ;;  %v4318_v16 = vsub.f32 %v5818_v0, %v2787_v42 }
 0x2eb   : > { %v4571_v47 = vmul.f32 0.00048828125, %v4315_v20  ;;  %v4573_v63 = vmul.f32 0.00048828125, %v4317_v39 }
 0x2ec   : > { %v4572_v36 = vmul.f32 0.00048828125, %v4316_v34  ;;  %v4574_v40 = vmul.f32 0.00048828125, %v4318_v16 }
 0x2ed   : > { %v4827_v43 = vand.u32 2147483647, %v4571_v47  ;;  %v4829_v26 = vand.u32 2147483647, %v4573_v63 }
 0x2ee   : > { %v4828_v46 = vand.u32 2147483647, %v4572_v36  ;;  %v4830_v62 = vand.u32 2147483647, %v4574_v40 }
 0x2ef   : > { %v5212_v55 = vadd.f32 %v5211_v49, %v4827_v43  ;;  %v5075_v51 = vadd.f32 %v5074_v50, %v4829_v26 }
 0x2f0   : > { %v5281_v41 = vadd.f32 %v5280_v57, %v4828_v46  ;;  %v2956_v8 = vpop.f32.mrf.mxu2  ;;  %v5144_v10 = vadd.f32 %v5143_v25, %v4830_v62  ;;  %v2621_v54 = vpop.f32.mrf.mxu0 }
 0x2f1   : > { %v4319_v53 = vsub.f32 %v5820_v1, %v2956_v8  ;;  %v3125_v27 = vpop.f32.mrf.mxu3  ;;  %v4321_v0 = vsub.f32 %v5824_v12, %v2621_v54  ;;  %v2790_v58 = vpop.f32.mrf.mxu1 }
 0x2f2   : > { %v4320_v11 = vsub.f32 %v5822_v2, %v3125_v27  ;;  %v4322_v23 = vsub.f32 %v5826_v13, %v2790_v58 }
 0x2f3   : > { %v4575_v3 = vmul.f32 0.00048828125, %v4319_v53  ;;  %v4577_v7 = vmul.f32 0.00048828125, %v4321_v0  ;;  %2660 = vmatmul.bf16.gmra.mxu0 %v6056_v5 }
 0x2f4   : > { %v4576_v48 = vmul.f32 0.00048828125, %v4320_v11  ;;  %v4578_v57 = vmul.f32 0.00048828125, %v4322_v23  ;;  %2829 = vmatmul.bf16.gmra.mxu1 %v6056_v5 }
 0x2f5   : > { %v4831_v49 = vand.u32 2147483647, %v4575_v3  ;;  %2998 = vmatmul.bf16.gmra.mxu2 %v6056_v5  ;;  %v4833_v50 = vand.u32 2147483647, %v4577_v7 }
 0x2f6   : > { %v4832_v1 = vand.u32 2147483647, %v4576_v48  ;;  %3167 = vmatmul.bf16.gmra.mxu3 %v6056_v5  ;;  %v4834_v12 = vand.u32 2147483647, %v4578_v57 }
 0x2f7   : > { %v5213_v2 = vadd.f32 %v5212_v55, %v4831_v49  ;;  %v5076_v25 = vadd.f32 %v5075_v51, %v4833_v50 }
 0x2f8   : > { %v5282_v4 = vadd.f32 %v5281_v41, %v4832_v1  ;;  %v2959_v20 = vpop.f32.mrf.mxu2  ;;  %v5145_v13 = vadd.f32 %v5144_v10, %v4834_v12  ;;  %v2623_v34 = vpop.f32.mrf.mxu0 }
 0x2f9   : > { %v4323_v35 = vsub.f32 %v5838_v56, %v2959_v20  ;;  %v3128_v24 = vpop.f32.mrf.mxu3  ;;  %v4325_v42 = vsub.f32 %v5844_v32, %v2623_v34  ;;  %v2792_v47 = vpop.f32.mrf.mxu1 }
 0x2fa   : > { %v4324_v39 = vsub.f32 %v5842_v28, %v3128_v24  ;;  %v4326_v36 = vsub.f32 %v5850_v37, %v2792_v47 }
 0x2fb   : > { %v4579_v16 = vmul.f32 0.00048828125, %v4323_v35  ;;  %v4581_v5 = vmul.f32 0.00048828125, %v4325_v42 }
 0x2fc   : > { %v4580_v63 = vmul.f32 0.00048828125, %v4324_v39  ;;  %v4582_v40 = vmul.f32 0.00048828125, %v4326_v36 }
 0x2fd   : > { %v4835_v43 = vand.u32 2147483647, %v4579_v16  ;;  %v4837_v26 = vand.u32 2147483647, %v4581_v5 }
 0x2fe   : > { %v4836_v46 = vand.u32 2147483647, %v4580_v63  ;;  %v4838_v62 = vand.u32 2147483647, %v4582_v40  ;;  %v7226_v40 = vld [vmem:[#allocation17_spill] sm:$0xff] }
 0x2ff   : > { %v5214_v55 = vadd.f32 %v5213_v2, %v4835_v43  ;;  %v5077_v56 = vadd.f32 %v5076_v25, %v4837_v26  ;;  %v7227_v26 = vld [vmem:[#allocation18_spill] sm:$0xff] }
 0x300   : > { %v5283_v41 = vadd.f32 %v5282_v4, %v4836_v46  ;;  %v2961_v51 = vpop.f32.mrf.mxu2  ;;  %v5146_v8 = vadd.f32 %v5145_v13, %v4838_v62  ;;  %v2626_v32 = vpop.f32.mrf.mxu0  ;;  %v7225_v13 = vld [vmem:[#allocation16_spill] sm:$0xff]  ;;  %v7228_v62 = vld [vmem:[#allocation19_spill] sm:$0xff] }
 0x301   : > { %v4327_v28 = vsub.f32 %v5860_v17, %v2961_v51  ;;  %v3130_v10 = vpop.f32.mrf.mxu3  ;;  %v4329_v37 = vsub.f32 %v5864_v15, %v2626_v32  ;;  %v2795_v27 = vpop.f32.mrf.mxu1 }
 0x302   : > { %v4328_v53 = vsub.f32 %v5862_v44, %v3130_v10  ;;  %v4330_v11 = vsub.f32 %v5866_v29, %v2795_v27 }
 0x303   : > { %v4583_v54 = vmul.f32 0.00048828125, %v4327_v28  ;;  %v4585_v58 = vmul.f32 0.00048828125, %v4329_v37  ;;  %2665 = vmatmul.bf16.gmra.mxu0 %v5956_v14 }
 0x304   : > { %v4584_v0 = vmul.f32 0.00048828125, %v4328_v53  ;;  %v4586_v23 = vmul.f32 0.00048828125, %v4330_v11  ;;  %2834 = vmatmul.bf16.gmra.mxu1 %v5956_v14  ;;  %v7230_v53 = vld [vmem:[#allocation15_spill] sm:$0xff] }
 0x305   : > { %v4839_v3 = vand.u32 2147483647, %v4583_v54  ;;  %3003 = vmatmul.bf16.gmra.mxu2 %v5956_v14  ;;  %v4841_v48 = vand.u32 2147483647, %v4585_v58 }
 0x306   : > { %v4840_v17 = vand.u32 2147483647, %v4584_v0  ;;  %3172 = vmatmul.bf16.gmra.mxu3 %v5956_v14  ;;  %v4842_v15 = vand.u32 2147483647, %v4586_v23 }
 0x307   : > { %v5215_v44 = vadd.f32 %v5214_v55, %v4839_v3  ;;  %v5078_v49 = vadd.f32 %v5077_v56, %v4841_v48 }
 0x308   : > { %v5284_v7 = vadd.f32 %v5283_v41, %v4840_v17  ;;  %v2964_v57 = vpop.f32.mrf.mxu2  ;;  %v5147_v29 = vadd.f32 %v5146_v8, %v4842_v15  ;;  %v2628_v2 = vpop.f32.mrf.mxu0  ;;  %v7229_v8 = vld [vmem:[#allocation20_spill] sm:$0xff] }
 0x309   : > { %v4331_v1 = vsub.f32 %v5872_v30, %v2964_v57  ;;  %v3133_v50 = vpop.f32.mrf.mxu3  ;;  %v4333_v4 = vsub.f32 %v5876_v6, %v2628_v2  ;;  %v2797_v25 = vpop.f32.mrf.mxu1  ;;  %v7232_v57 = vld [vmem:[#allocation22_spill] sm:$0xff] }
 0x30a   : > { %v4332_v12 = vsub.f32 %v5874_v31, %v3133_v50  ;;  %v4334_v35 = vsub.f32 %v7225_v13, %v2797_v25 }
 0x30b   : > { %v4587_v20 = vmul.f32 0.00048828125, %v4331_v1  ;;  %v4589_v14 = vmul.f32 0.00048828125, %v4333_v4  ;;  %v7233_v1 = vld [vmem:[#allocation23_spill] sm:$0xff]  ;;  %v7234_v4 = vld [vmem:[#allocation24_spill] sm:$0xff] }
 0x30c   : > { %v4588_v24 = vmul.f32 0.00048828125, %v4332_v12  ;;  %v4590_v39 = vmul.f32 0.00048828125, %v4334_v35 }
 0x30d   : > { %v4843_v34 = vand.u32 2147483647, %v4587_v20  ;;  %v4845_v47 = vand.u32 2147483647, %v4589_v14 }
 0x30e   : > { %v4844_v42 = vand.u32 2147483647, %v4588_v24  ;;  %v4846_v36 = vand.u32 2147483647, %v4590_v39 }
 0x30f   : > { %v5216_v16 = vadd.f32 %v5215_v44, %v4843_v34  ;;  %v5079_v30 = vadd.f32 %v5078_v49, %v4845_v47  ;;  %v7231_v44 = vld [vmem:[#allocation21_spill] sm:$0xff] }
 0x310   : > { %v5285_v63 = vadd.f32 %v5284_v7, %v4844_v42  ;;  %v2966_v5 = vpop.f32.mrf.mxu2  ;;  %v5148_v43 = vadd.f32 %v5147_v29, %v4846_v36  ;;  %v2631_v6 = vpop.f32.mrf.mxu0 }
 0x311   : > { %v4335_v31 = vsub.f32 %v7226_v40, %v2966_v5  ;;  %v3135_v46 = vpop.f32.mrf.mxu3  ;;  %v4337_v41 = vsub.f32 %v7228_v62, %v2631_v6  ;;  %v2800_v56 = vpop.f32.mrf.mxu1  ;;  %v7237_v6 = vld [vmem:[#allocation27_spill] sm:$0xff] }
 0x312   : > { %v4336_v55 = vsub.f32 %v7227_v26, %v3135_v46  ;;  %v4338_v28 = vsub.f32 %v7229_v8, %v2800_v56 }
 0x313   : > { %v4591_v51 = vmul.f32 0.00048828125, %v4335_v31  ;;  %v4593_v32 = vmul.f32 0.00048828125, %v4337_v41  ;;  %2670 = vmatmul.bf16.gmra.mxu0 %v7230_v53  ;;  %v7236_v31 = vld [vmem:[#allocation26_spill] sm:$0xff]  ;;  %v7238_v41 = vld [vmem:[#allocation28_spill] sm:$0xff] }
 0x314   : > { %v4592_v10 = vmul.f32 0.00048828125, %v4336_v55  ;;  %v4594_v27 = vmul.f32 0.00048828125, %v4338_v28  ;;  %2839 = vmatmul.bf16.gmra.mxu1 %v7230_v53  ;;  %v7239_v28 = vld [vmem:[#allocation12_spill] sm:$0xff] }
 0x315   : > { %v4847_v37 = vand.u32 2147483647, %v4591_v51  ;;  %3008 = vmatmul.bf16.gmra.mxu2 %v7230_v53  ;;  %v4849_v11 = vand.u32 2147483647, %v4593_v32 }
 0x316   : > { %v4848_v54 = vand.u32 2147483647, %v4592_v10  ;;  %3177 = vmatmul.bf16.gmra.mxu3 %v7230_v53  ;;  %v4850_v58 = vand.u32 2147483647, %v4594_v27 }
 0x317   : > { %v5217_v0 = vadd.f32 %v5216_v16, %v4847_v37  ;;  %v5080_v23 = vadd.f32 %v5079_v30, %v4849_v11  ;;  %v7235_v30 = vld [vmem:[#allocation25_spill] sm:$0xff] }
 0x318   : > { %v5286_v3 = vadd.f32 %v5285_v63, %v4848_v54  ;;  %v2969_v17 = vpop.f32.mrf.mxu2  ;;  %v5149_v48 = vadd.f32 %v5148_v43, %v4850_v58  ;;  %v2633_v49 = vpop.f32.mrf.mxu0 }
 0x319   : > { %v4339_v15 = vsub.f32 %v7231_v44, %v2969_v17  ;;  %v3138_v7 = vpop.f32.mrf.mxu3  ;;  %v4341_v50 = vsub.f32 %v7233_v1, %v2633_v49  ;;  %v2802_v2 = vpop.f32.mrf.mxu1  ;;  %v7242_v49 = vld [vmem:[#allocation31_spill] sm:$0xff] }
 0x31a   : > { %v4340_v29 = vsub.f32 %v7232_v57, %v3138_v7  ;;  %v4342_v25 = vsub.f32 %v7234_v4, %v2802_v2 }
 0x31b   : > { %v4595_v12 = vmul.f32 0.00048828125, %v4339_v15  ;;  %v4597_v13 = vmul.f32 0.00048828125, %v4341_v50  ;;  %v7241_v15 = vld [vmem:[#allocation30_spill] sm:$0xff]  ;;  %v7243_v50 = vld [vmem:[#allocation32_spill] sm:$0xff] }
 0x31c   : > { %v4596_v20 = vmul.f32 0.00048828125, %v4340_v29  ;;  %v4598_v24 = vmul.f32 0.00048828125, %v4342_v25 }
 0x31d   : > { %v4851_v35 = vand.u32 2147483647, %v4595_v12  ;;  %v4853_v34 = vand.u32 2147483647, %v4597_v13 }
 0x31e   : > { %v4852_v14 = vand.u32 2147483647, %v4596_v20  ;;  %v4854_v42 = vand.u32 2147483647, %v4598_v24 }
 0x31f   : > { %v5218_v39 = vadd.f32 %v5217_v0, %v4851_v35  ;;  %v5081_v16 = vadd.f32 %v5080_v23, %v4853_v34  ;;  %v7240_v23 = vld [vmem:[#allocation29_spill] sm:$0xff] }
 0x320   : > { %v5287_v47 = vadd.f32 %v5286_v3, %v4852_v14  ;;  %v2971_v36 = vpop.f32.mrf.mxu2  ;;  %v5150_v63 = vadd.f32 %v5149_v48, %v4854_v42  ;;  %v2636_v40 = vpop.f32.mrf.mxu0 }
 0x321   : > { %v4343_v5 = vsub.f32 %v7235_v30, %v2971_v36  ;;  %v3140_v43 = vpop.f32.mrf.mxu3  ;;  %v4345_v26 = vsub.f32 %v7237_v6, %v2636_v40  ;;  %v2805_v55 = vpop.f32.mrf.mxu1  ;;  %v7246_v40 = vld [vmem:[#allocation35_spill] sm:$0xff] }
 0x322   : > { %v4344_v46 = vsub.f32 %v7236_v31, %v3140_v43  ;;  %v4346_v56 = vsub.f32 %v7238_v41, %v2805_v55 }
 0x323   : > { %v4599_v62 = vmul.f32 0.00048828125, %v4343_v5  ;;  %v4601_v8 = vmul.f32 0.00048828125, %v4345_v26  ;;  %2675 = vmatmul.bf16.gmra.mxu0 %v7239_v28  ;;  %v7245_v5 = vld [vmem:[#allocation34_spill] sm:$0xff]  ;;  %v7247_v26 = vld [vmem:[#allocation36_spill] sm:$0xff] }
 0x324   : > { %v4600_v51 = vmul.f32 0.00048828125, %v4344_v46  ;;  %v4602_v32 = vmul.f32 0.00048828125, %v4346_v56  ;;  %2844 = vmatmul.bf16.gmra.mxu1 %v7239_v28  ;;  %v7248_v56 = vld [vmem:[#allocation9_spill] sm:$0xff] }
 0x325   : > { %v4855_v10 = vand.u32 2147483647, %v4599_v62  ;;  %3013 = vmatmul.bf16.gmra.mxu2 %v7239_v28  ;;  %v4857_v37 = vand.u32 2147483647, %v4601_v8 }
 0x326   : > { %v4856_v53 = vand.u32 2147483647, %v4600_v51  ;;  %3182 = vmatmul.bf16.gmra.mxu3 %v7239_v28  ;;  %v4858_v54 = vand.u32 2147483647, %v4602_v32 }
 0x327   : > { %v5219_v27 = vadd.f32 %v5218_v39, %v4855_v10  ;;  %v5082_v0 = vadd.f32 %v5081_v16, %v4857_v37  ;;  %v7244_v16 = vld [vmem:[#allocation33_spill] sm:$0xff] }
 0x328   : > { %v5288_v11 = vadd.f32 %v5287_v47, %v4856_v53  ;;  %v2974_v58 = vpop.f32.mrf.mxu2  ;;  %v5151_v3 = vadd.f32 %v5150_v63, %v4858_v54  ;;  %v2638_v44 = vpop.f32.mrf.mxu0 }
 0x329   : > { %v4347_v17 = vsub.f32 %v7240_v23, %v2974_v58  ;;  %v3143_v48 = vpop.f32.mrf.mxu3  ;;  %v4349_v57 = vsub.f32 %v7242_v49, %v2638_v44  ;;  %v2807_v29 = vpop.f32.mrf.mxu1 }
 0x32a   : > { %v4348_v7 = vsub.f32 %v7241_v15, %v3143_v48  ;;  %v4350_v2 = vsub.f32 %v7243_v50, %v2807_v29 }
 0x32b   : > { %v4603_v1 = vmul.f32 0.00048828125, %v4347_v17  ;;  %v4605_v4 = vmul.f32 0.00048828125, %v4349_v57  ;;  %v7249_v17 = vld [vmem:[#allocation39_spill] sm:$0xff] }
 0x32c   : > { %v4604_v12 = vmul.f32 0.00048828125, %v4348_v7  ;;  %v4606_v20 = vmul.f32 0.00048828125, %v4350_v2  ;;  %v7250_v7 = vld [vmem:[#allocation40_spill] sm:$0xff] }
 0x32d   : > { %v4859_v25 = vand.u32 2147483647, %v4603_v1  ;;  %v4861_v35 = vand.u32 2147483647, %v4605_v4 }
 0x32e   : > { %v4860_v13 = vand.u32 2147483647, %v4604_v12  ;;  %v4862_v14 = vand.u32 2147483647, %v4606_v20 }
 0x32f   : > { %v5220_v24 = vadd.f32 %v5219_v27, %v4859_v25  ;;  %v5083_v39 = vadd.f32 %v5082_v0, %v4861_v35 }
 0x330   : > { %v5289_v34 = vadd.f32 %v5288_v11, %v4860_v13  ;;  %v2976_v42 = vpop.f32.mrf.mxu2  ;;  %v5152_v47 = vadd.f32 %v5151_v3, %v4862_v14  ;;  %v2641_v30 = vpop.f32.mrf.mxu0 }
 0x331   : > { %v4351_v36 = vsub.f32 %v7244_v16, %v2976_v42  ;;  %v3145_v63 = vpop.f32.mrf.mxu3  ;;  %v4353_v31 = vsub.f32 %v7246_v40, %v2641_v30  ;;  %v2810_v46 = vpop.f32.mrf.mxu1  ;;  %v7254_v30 = vld [vmem:[#allocation44_spill] sm:$0xff] }
 0x332   : > { %v4352_v43 = vsub.f32 %v7245_v5, %v3145_v63  ;;  %v4354_v55 = vsub.f32 %v7247_v26, %v2810_v46 }
 0x333   : > { %v4607_v6 = vmul.f32 0.00048828125, %v4351_v36  ;;  %v4609_v41 = vmul.f32 0.00048828125, %v4353_v31  ;;  %2680 = vmatmul.bf16.gmra.mxu0 %v7248_v56  ;;  %v7255_v31 = vld [vmem:[#allocation6_spill] sm:$0xff] }
 0x334   : > { %v4608_v62 = vmul.f32 0.00048828125, %v4352_v43  ;;  %v4610_v8 = vmul.f32 0.00048828125, %v4354_v55  ;;  %2849 = vmatmul.bf16.gmra.mxu1 %v7248_v56 }
 0x335   : > { %v4863_v51 = vand.u32 2147483647, %v4607_v6  ;;  %3018 = vmatmul.bf16.gmra.mxu2 %v7248_v56  ;;  %v4865_v10 = vand.u32 2147483647, %v4609_v41 }
 0x336   : > { %v4864_v28 = vand.u32 2147483647, %v4608_v62  ;;  %3187 = vmatmul.bf16.gmra.mxu3 %v7248_v56  ;;  %v4866_v53 = vand.u32 2147483647, %v4610_v8 }
 0x337   : > { %v5221_v32 = vadd.f32 %v5220_v24, %v4863_v51  ;;  %v5084_v27 = vadd.f32 %v5083_v39, %v4865_v10  ;;  %v7251_v24 = vld [vmem:[#allocation41_spill] sm:$0xff]  ;;  %v7252_v39 = vld [vmem:[#allocation42_spill] sm:$0xff] }
 0x338   : > { %v5290_v37 = vadd.f32 %v5289_v34, %v4864_v28  ;;  %v2979_v54 = vpop.f32.mrf.mxu2  ;;  %v5153_v11 = vadd.f32 %v5152_v47, %v4866_v53  ;;  %v2643_v3 = vpop.f32.mrf.mxu0  ;;  %v7253_v47 = vld [vmem:[#allocation43_spill] sm:$0xff]  ;;  %v7256_v10 = vld [vmem:[#allocation45_spill] sm:$0xff] }
 0x339   : > { %v4355_v0 = vsub.f32 %v5938_v61, %v2979_v54  ;;  %v3148_v58 = vpop.f32.mrf.mxu3  ;;  %v4357_v48 = vsub.f32 %v7249_v17, %v2643_v3  ;;  %v2812_v44 = vpop.f32.mrf.mxu1 }
 0x33a   : > { %v4356_v23 = vsub.f32 %v5942_v38, %v3148_v58  ;;  %v4358_v49 = vsub.f32 %v7250_v7, %v2812_v44 }
 0x33b   : > { %v4611_v15 = vmul.f32 0.00048828125, %v4355_v0  ;;  %v4613_v29 = vmul.f32 0.00048828125, %v4357_v48 }
 0x33c   : > { %v4612_v57 = vmul.f32 0.00048828125, %v4356_v23  ;;  %v4614_v50 = vmul.f32 0.00048828125, %v4358_v49  ;;  %v7259_v23 = vld [vmem:[#allocation48_spill] sm:$0xff] }
 0x33d   : > { %v4867_v1 = vand.u32 2147483647, %v4611_v15  ;;  %v4869_v12 = vand.u32 2147483647, %v4613_v29 }
 0x33e   : > { %v4868_v2 = vand.u32 2147483647, %v4612_v57  ;;  %v4870_v25 = vand.u32 2147483647, %v4614_v50 }
 0x33f   : > { %v5222_v4 = vadd.f32 %v5221_v32, %v4867_v1  ;;  %v5085_v61 = vadd.f32 %v5084_v27, %v4869_v12  ;;  %v7257_v27 = vld [vmem:[#allocation46_spill] sm:$0xff] }
 0x340   : > { %v5291_v20 = vadd.f32 %v5290_v37, %v4868_v2  ;;  %v2981_v13 = vpop.f32.mrf.mxu2  ;;  %v5154_v35 = vadd.f32 %v5153_v11, %v4870_v25  ;;  %v2646_v34 = vpop.f32.mrf.mxu0  ;;  %v7258_v11 = vld [vmem:[#allocation47_spill] sm:$0xff]  ;;  %v7260_v25 = vld [vmem:[#allocation49_spill] sm:$0xff] }
 0x341   : > { %v4359_v38 = vsub.f32 %v7251_v24, %v2981_v13  ;;  %v3150_v14 = vpop.f32.mrf.mxu3  ;;  %v4361_v16 = vsub.f32 %v7253_v47, %v2646_v34  ;;  %v2815_v36 = vpop.f32.mrf.mxu1 }
 0x342   : > { %v4360_v42 = vsub.f32 %v7252_v39, %v3150_v14  ;;  %v4362_v5 = vsub.f32 %v7254_v30, %v2815_v36 }
 0x343   : > { %v4615_v63 = vmul.f32 0.00048828125, %v4359_v38  ;;  %v4617_v40 = vmul.f32 0.00048828125, %v4361_v16  ;;  %2685 = vmatmul.bf16.gmra.mxu0 %v7255_v31  ;;  %v7262_v38 = vld [vmem:[#allocation51_spill] sm:$0xff] }
 0x344   : > { %v4616_v43 = vmul.f32 0.00048828125, %v4360_v42  ;;  %v4618_v6 = vmul.f32 0.00048828125, %v4362_v5  ;;  %2854 = vmatmul.bf16.gmra.mxu1 %v7255_v31  ;;  %v7263_v42 = vld [vmem:[#allocation52_spill] sm:$0xff] }
 0x345   : > { %v4871_v46 = vand.u32 2147483647, %v4615_v63  ;;  %3023 = vmatmul.bf16.gmra.mxu2 %v7255_v31  ;;  %v4873_v55 = vand.u32 2147483647, %v4617_v40 }
 0x346   : > { %v4872_v26 = vand.u32 2147483647, %v4616_v43  ;;  %3192 = vmatmul.bf16.gmra.mxu3 %v7255_v31  ;;  %v4874_v41 = vand.u32 2147483647, %v4618_v6 }
 0x347   : > { %v5223_v62 = vadd.f32 %v5222_v4, %v4871_v46  ;;  %v5086_v51 = vadd.f32 %v5085_v61, %v4873_v55 }
 0x348   : > { %v5292_v56 = vadd.f32 %v5291_v20, %v4872_v26  ;;  %v2984_v8 = vpop.f32.mrf.mxu2  ;;  %v5155_v28 = vadd.f32 %v5154_v35, %v4874_v41  ;;  %v2648_v37 = vpop.f32.mrf.mxu0  ;;  %v7261_v35 = vld [vmem:[#allocation50_spill] sm:$0xff] }
 0x349   : > { %v4363_v32 = vsub.f32 %v7256_v10, %v2984_v8  ;;  %v3153_v53 = vpop.f32.mrf.mxu3  ;;  %v4365_v0 = vsub.f32 %v7258_v11, %v2648_v37  ;;  %v2817_v58 = vpop.f32.mrf.mxu1  ;;  %v7265_v8 = vld [vmem:[#allocation54_spill] sm:$0xff]  ;;  %v7266_v10 = vld [vmem:[#allocation55_spill] sm:$0xff] }
 0x34a   : > { %v4364_v54 = vsub.f32 %v7257_v27, %v3153_v53  ;;  %v4366_v17 = vsub.f32 %v7259_v23, %v2817_v58  ;;  %v7267_v27 = vld [vmem:[#allocation56_spill] sm:$0xff] }
 0x34b   : > { %v4619_v3 = vmul.f32 0.00048828125, %v4363_v32  ;;  %v4621_v44 = vmul.f32 0.00048828125, %v4365_v0 }
 0x34c   : > { %v4620_v48 = vmul.f32 0.00048828125, %v4364_v54  ;;  %v4622_v7 = vmul.f32 0.00048828125, %v4366_v17 }
 0x34d   : > { %v4875_v15 = vand.u32 2147483647, %v4619_v3  ;;  %v4877_v57 = vand.u32 2147483647, %v4621_v44 }
 0x34e   : > { %v4876_v49 = vand.u32 2147483647, %v4620_v48  ;;  %v4878_v1 = vand.u32 2147483647, %v4622_v7 }
 0x34f   : > { %v5224_v29 = vadd.f32 %v5223_v62, %v4875_v15  ;;  %v5087_v2 = vadd.f32 %v5086_v51, %v4877_v57  ;;  %v7264_v62 = vld [vmem:[#allocation53_spill] sm:$0xff] }
 0x350   : > { %v5293_v50 = vadd.f32 %v5292_v56, %v4876_v49  ;;  %v2986_v12 = vpop.f32.mrf.mxu2  ;;  %v5156_v4 = vadd.f32 %v5155_v28, %v4878_v1  ;;  %v2651_v13 = vpop.f32.mrf.mxu0  ;;  %v7268_v57 = vld [vmem:[#allocation57_spill] sm:$0xff] }
 0x351   : > { %v4367_v20 = vsub.f32 %v7260_v25, %v2986_v12  ;;  %v3155_v61 = vpop.f32.mrf.mxu3  ;;  %v4369_v14 = vsub.f32 %v7262_v38, %v2651_v13  ;;  %v2820_v34 = vpop.f32.mrf.mxu1  ;;  %v7271_v13 = vld [vmem:[#allocation60_spill] sm:$0xff] }
 0x352   : > { %v4368_v24 = vsub.f32 %v7261_v35, %v3155_v61  ;;  %v4370_v47 = vsub.f32 %v7263_v42, %v2820_v34 }
 0x353   : > { %v4623_v39 = vmul.f32 0.00048828125, %v4367_v20  ;;  %v4625_v36 = vmul.f32 0.00048828125, %v4369_v14  ;;  %2690 = vmatmul.bf16.gmra.mxu0 %v6235_v9 }
 0x354   : > { %v4624_v16 = vmul.f32 0.00048828125, %v4368_v24  ;;  %v4626_v30 = vmul.f32 0.00048828125, %v4370_v47  ;;  %2859 = vmatmul.bf16.gmra.mxu1 %v6235_v9 }
 0x355   : > { %v4879_v63 = vand.u32 2147483647, %v4623_v39  ;;  %3028 = vmatmul.bf16.gmra.mxu2 %v6235_v9  ;;  %v4881_v43 = vand.u32 2147483647, %v4625_v36 }
 0x356   : > { %v4880_v5 = vand.u32 2147483647, %v4624_v16  ;;  %3197 = vmatmul.bf16.gmra.mxu3 %v6235_v9  ;;  %v4882_v31 = vand.u32 2147483647, %v4626_v30 }
 0x357   : > { %v5225_v40 = vadd.f32 %v5224_v29, %v4879_v63  ;;  %v5088_v6 = vadd.f32 %v5087_v2, %v4881_v43  ;;  %v7269_v2 = vld [vmem:[#allocation58_spill] sm:$0xff]  ;;  %v7272_v43 = vld [vmem:[#allocation61_spill] sm:$0xff] }
 0x358   : > { %v5294_v46 = vadd.f32 %v5293_v50, %v4880_v5  ;;  %v2989_v26 = vpop.f32.mrf.mxu2  ;;  %v5157_v55 = vadd.f32 %v5156_v4, %v4882_v31  ;;  %v2653_v51 = vpop.f32.mrf.mxu0  ;;  %v7270_v4 = vld [vmem:[#allocation59_spill] sm:$0xff] }
 0x359   : > { %v4371_v41 = vsub.f32 %v7264_v62, %v2989_v26  ;;  %v3158_v56 = vpop.f32.mrf.mxu3  ;;  %v4373_v32 = vsub.f32 %v7266_v10, %v2653_v51  ;;  %v2822_v53 = vpop.f32.mrf.mxu1  ;;  %v7275_v51 = vld [vmem:[#allocation64_spill] sm:$0xff] }
 0x35a   : > { %v4372_v28 = vsub.f32 %v7265_v8, %v3158_v56  ;;  %v4374_v54 = vsub.f32 %v7267_v27, %v2822_v53 }
 0x35b   : > { %v4627_v37 = vmul.f32 0.00048828125, %v4371_v41  ;;  %v4629_v9 = vmul.f32 0.00048828125, %v4373_v32 }
 0x35c   : > { %v4628_v11 = vmul.f32 0.00048828125, %v4372_v28  ;;  %v4630_v58 = vmul.f32 0.00048828125, %v4374_v54 }
 0x35d   : > { %v4883_v0 = vand.u32 2147483647, %v4627_v37  ;;  %v4885_v23 = vand.u32 2147483647, %v4629_v9 }
 0x35e   : > { %v4884_v3 = vand.u32 2147483647, %v4628_v11  ;;  %v4886_v48 = vand.u32 2147483647, %v4630_v58 }
 0x35f   : > { %v5226_v17 = vadd.f32 %v5225_v40, %v4883_v0  ;;  %v5089_v15 = vadd.f32 %v5088_v6, %v4885_v23  ;;  %v7273_v6 = vld [vmem:[#allocation62_spill] sm:$0xff] }
 0x360   : > { %v5295_v44 = vadd.f32 %v5294_v46, %v4884_v3  ;;  %v2991_v7 = vpop.f32.mrf.mxu2  ;;  %v5158_v49 = vadd.f32 %v5157_v55, %v4886_v48  ;;  %v2656_v50 = vpop.f32.mrf.mxu0  ;;  %v7274_v55 = vld [vmem:[#allocation63_spill] sm:$0xff]  ;;  %v7276_v3 = vld [vmem:[#allocation65_spill] sm:$0xff] }
 0x361   : > { %v4375_v29 = vsub.f32 %v7268_v57, %v2991_v7  ;;  %v3160_v1 = vpop.f32.mrf.mxu3  ;;  %v4377_v25 = vsub.f32 %v7270_v4, %v2656_v50  ;;  %v2825_v20 = vpop.f32.mrf.mxu1  ;;  %v7278_v7 = vld [vmem:[#allocation67_spill] sm:$0xff] }
 0x362   : > { %v4376_v12 = vsub.f32 %v7269_v2, %v3160_v1  ;;  %v4378_v35 = vsub.f32 %v7271_v13, %v2825_v20  ;;  %v7279_v1 = vld [vmem:[#allocation68_spill] sm:$0xff] }
 0x363   : > { %v4631_v61 = vmul.f32 0.00048828125, %v4375_v29  ;;  %v4633_v38 = vmul.f32 0.00048828125, %v4377_v25  ;;  %2695 = vmatmul.bf16.gmra.mxu0 %v6135_v21 }
 0x364   : > { %v4632_v24 = vmul.f32 0.00048828125, %v4376_v12  ;;  %v4634_v34 = vmul.f32 0.00048828125, %v4378_v35  ;;  %2864 = vmatmul.bf16.gmra.mxu1 %v6135_v21 }
 0x365   : > { %v4887_v14 = vand.u32 2147483647, %v4631_v61  ;;  %3033 = vmatmul.bf16.gmra.mxu2 %v6135_v21  ;;  %v4889_v42 = vand.u32 2147483647, %v4633_v38 }
 0x366   : > { %v4888_v39 = vand.u32 2147483647, %v4632_v24  ;;  %3202 = vmatmul.bf16.gmra.mxu3 %v6135_v21  ;;  %v4890_v16 = vand.u32 2147483647, %v4634_v34 }
 0x367   : > { %v5227_v47 = vadd.f32 %v5226_v17, %v4887_v14  ;;  %v5090_v63 = vadd.f32 %v5089_v15, %v4889_v42 }
 0x368   : > { %v5296_v36 = vadd.f32 %v5295_v44, %v4888_v39  ;;  %v2994_v30 = vpop.f32.mrf.mxu2  ;;  %v5159_v5 = vadd.f32 %v5158_v49, %v4890_v16  ;;  %v2658_v46 = vpop.f32.mrf.mxu0  ;;  %v7277_v44 = vld [vmem:[#allocation66_spill] sm:$0xff] }
 0x369   : > { %v4379_v40 = vsub.f32 %v7272_v43, %v2994_v30  ;;  %v3163_v31 = vpop.f32.mrf.mxu3  ;;  %v4381_v62 = vsub.f32 %v7274_v55, %v2658_v46  ;;  %v2827_v41 = vpop.f32.mrf.mxu1  ;;  %v7280_v16 = vld [vmem:[#allocation70_spill] sm:$0xff] }
 0x36a   : > { %v4380_v26 = vsub.f32 %v7273_v6, %v3163_v31  ;;  %v4382_v8 = vsub.f32 %v7275_v51, %v2827_v41 }
 0x36b   : > { %v4635_v56 = vmul.f32 0.00048828125, %v4379_v40  ;;  %v4637_v21 = vmul.f32 0.00048828125, %v4381_v62  ;;  %v7282_v40 = vld [vmem:[#allocation72_spill] sm:$0xff] }
 0x36c   : > { %v4636_v28 = vmul.f32 0.00048828125, %v4380_v26  ;;  %v4638_v32 = vmul.f32 0.00048828125, %v4382_v8 }
 0x36d   : > { %v4891_v10 = vand.u32 2147483647, %v4635_v56  ;;  %v4893_v37 = vand.u32 2147483647, %v4637_v21  ;;  %v7283_v21 = vld [vmem:[#allocation73_spill] sm:$0xff] }
 0x36e   : > { %v4892_v53 = vand.u32 2147483647, %v4636_v28  ;;  %v4894_v54 = vand.u32 2147483647, %v4638_v32 }
 0x36f   : > { %v5228_v27 = vadd.f32 %v5227_v47, %v4891_v10  ;;  %v5091_v9 = vadd.f32 %v5090_v63, %v4893_v37  ;;  %v7281_v63 = vld [vmem:[#allocation71_spill] sm:$0xff]  ;;  %v7284_v37 = vld [vmem:[#allocation74_spill] sm:$0xff] }
 0x370   : > { %v5297_v11 = vadd.f32 %v5296_v36, %v4892_v53  ;;  %v2996_v0 = vpop.f32.mrf.mxu2  ;;  %v5160_v58 = vadd.f32 %v5159_v5, %v4894_v54  ;;  %v2661_v48 = vpop.f32.mrf.mxu0  ;;  %v7285_v54 = vld [vmem:[#allocation75_spill] sm:$0xff] }
 0x371   : > { %v4383_v23 = vsub.f32 %v7276_v3, %v2996_v0  ;;  %v3165_v17 = vpop.f32.mrf.mxu3  ;;  %v4385_v49 = vsub.f32 %v7278_v7, %v2661_v48  ;;  %v2830_v57 = vpop.f32.mrf.mxu1  ;;  %v7287_v48 = vld [vmem:[#allocation37_spill] sm:$0xff] }
 0x372   : > { %v4384_v15 = vsub.f32 %v7277_v44, %v3165_v17  ;;  %v4386_v50 = vsub.f32 %v7279_v1, %v2830_v57 }
 0x373   : > { %v4639_v29 = vmul.f32 0.00048828125, %v4383_v23  ;;  %v4641_v12 = vmul.f32 0.00048828125, %v4385_v49  ;;  %2700 = vmatmul.bf16.gmra.mxu0 %v6035_v18 }
 0x374   : > { %v4640_v2 = vmul.f32 0.00048828125, %v4384_v15  ;;  %v4642_v25 = vmul.f32 0.00048828125, %v4386_v50  ;;  %2869 = vmatmul.bf16.gmra.mxu1 %v6035_v18 }
 0x375   : > { %v4895_v4 = vand.u32 2147483647, %v4639_v29  ;;  %3038 = vmatmul.bf16.gmra.mxu2 %v6035_v18  ;;  %v4897_v61 = vand.u32 2147483647, %v4641_v12 }
 0x376   : > { %v4896_v20 = vand.u32 2147483647, %v4640_v2  ;;  %3207 = vmatmul.bf16.gmra.mxu3 %v6035_v18  ;;  %v4898_v35 = vand.u32 2147483647, %v4642_v25 }
 0x377   : > { %v5229_v13 = vadd.f32 %v5228_v27, %v4895_v4  ;;  %v5092_v38 = vadd.f32 %v5091_v9, %v4897_v61  ;;  %v7288_v4 = vld [vmem:[#allocation77_spill] sm:$0xff] }
 0x378   : > { %v5298_v24 = vadd.f32 %v5297_v11, %v4896_v20  ;;  %v2999_v14 = vpop.f32.mrf.mxu2  ;;  %v5161_v34 = vadd.f32 %v5160_v58, %v4898_v35  ;;  %v2663_v47 = vpop.f32.mrf.mxu0  ;;  %v7286_v58 = vld [vmem:[#allocation76_spill] sm:$0xff] }
 0x379   : > { %v4387_v39 = vsub.f32 %v6038_v45, %v2999_v14  ;;  %v3168_v42 = vpop.f32.mrf.mxu3  ;;  %v4389_v30 = vsub.f32 %v7281_v63, %v2663_v47  ;;  %v2832_v5 = vpop.f32.mrf.mxu1 }
 0x37a   : > { %v4388_v36 = vsub.f32 %v7280_v16, %v3168_v42  ;;  %v4390_v31 = vsub.f32 %v7282_v40, %v2832_v5 }
 0x37b   : > { %v4643_v43 = vmul.f32 0.00048828125, %v4387_v39  ;;  %v4645_v18 = vmul.f32 0.00048828125, %v4389_v30  ;;  %v7291_v39 = vld [vmem:[#allocation80_spill] sm:$0xff] }
 0x37c   : > { %v4644_v46 = vmul.f32 0.00048828125, %v4388_v36  ;;  %v4646_v26 = vmul.f32 0.00048828125, %v4390_v31 }
 0x37d   : > { %v4899_v6 = vand.u32 2147483647, %v4643_v43  ;;  %v4901_v62 = vand.u32 2147483647, %v4645_v18 }
 0x37e   : > { %v4900_v55 = vand.u32 2147483647, %v4644_v46  ;;  %v4902_v56 = vand.u32 2147483647, %v4646_v26  ;;  %v7292_v26 = vld [vmem:[#allocation81_spill] sm:$0xff] }
 0x37f   : > { %v5230_v41 = vadd.f32 %v5229_v13, %v4899_v6  ;;  %v5093_v45 = vadd.f32 %v5092_v38, %v4901_v62  ;;  %v7289_v13 = vld [vmem:[#allocation78_spill] sm:$0xff] }
 0x380   : > { %v5299_v51 = vadd.f32 %v5298_v24, %v4900_v55  ;;  %v3001_v8 = vpop.f32.mrf.mxu2  ;;  %v5162_v28 = vadd.f32 %v5161_v34, %v4902_v56  ;;  %v2666_v53 = vpop.f32.mrf.mxu0  ;;  %v7290_v24 = vld [vmem:[#allocation79_spill] sm:$0xff]  ;;  %v7293_v56 = vld [vmem:[#allocation82_spill] sm:$0xff] }
 0x381   : > { %v4391_v10 = vsub.f32 %v7283_v21, %v3001_v8  ;;  %v3170_v32 = vpop.f32.mrf.mxu3  ;;  %v4393_v11 = vsub.f32 %v7285_v54, %v2666_v53  ;;  %v2835_v9 = vpop.f32.mrf.mxu1 }
 0x382   : > { %v4392_v27 = vsub.f32 %v7284_v37, %v3170_v32  ;;  %v4394_v3 = vsub.f32 %v7286_v58, %v2835_v9 }
 0x383   : > { %v4647_v0 = vmul.f32 0.00048828125, %v4391_v10  ;;  %v4649_v17 = vmul.f32 0.00048828125, %v4393_v11  ;;  %2705 = vmatmul.bf16.gmra.mxu0 %v7287_v48  ;;  %v7295_v10 = vld [vmem:[#allocation84_spill] sm:$0xff] }
 0x384   : > { %v4648_v23 = vmul.f32 0.00048828125, %v4392_v27  ;;  %v4650_v15 = vmul.f32 0.00048828125, %v4394_v3  ;;  %2874 = vmatmul.bf16.gmra.mxu1 %v7287_v48  ;;  %v7296_v27 = vld [vmem:[#allocation13_spill] sm:$0xff] }
 0x385   : > { %v4903_v44 = vand.u32 2147483647, %v4647_v0  ;;  %3043 = vmatmul.bf16.gmra.mxu2 %v7287_v48  ;;  %v4905_v49 = vand.u32 2147483647, %v4649_v17 }
 0x386   : > { %v4904_v7 = vand.u32 2147483647, %v4648_v23  ;;  %3212 = vmatmul.bf16.gmra.mxu3 %v7287_v48  ;;  %v4906_v29 = vand.u32 2147483647, %v4650_v15  ;;  %v7297_v15 = vld [vmem:[#allocation85_spill] sm:$0xff] }
 0x387   : > { %v5231_v57 = vadd.f32 %v5230_v41, %v4903_v44  ;;  %v5094_v50 = vadd.f32 %v5093_v45, %v4905_v49  ;;  %v7294_v45 = vld [vmem:[#allocation83_spill] sm:$0xff] }
 0x388   : > { %v5300_v1 = vadd.f32 %v5299_v51, %v4904_v7  ;;  %v3004_v2 = vpop.f32.mrf.mxu2  ;;  %v5163_v12 = vadd.f32 %v5162_v28, %v4906_v29  ;;  %v2668_v61 = vpop.f32.mrf.mxu0  ;;  %v7298_v29 = vld [vmem:[#allocation86_spill] sm:$0xff] }
 0x389   : > { %v4395_v25 = vsub.f32 %v7288_v4, %v3004_v2  ;;  %v3173_v20 = vpop.f32.mrf.mxu3  ;;  %v4397_v38 = vsub.f32 %v7290_v24, %v2668_v61  ;;  %v2837_v14 = vpop.f32.mrf.mxu1 }
 0x38a   : > { %v4396_v35 = vsub.f32 %v7289_v13, %v3173_v20  ;;  %v4398_v42 = vsub.f32 %v7291_v39, %v2837_v14 }
 0x38b   : > { %v4651_v34 = vmul.f32 0.00048828125, %v4395_v25  ;;  %v4653_v16 = vmul.f32 0.00048828125, %v4397_v38  ;;  %v7300_v25 = vld [vmem:[#allocation88_spill] sm:$0xff] }
 0x38c   : > { %v4652_v47 = vmul.f32 0.00048828125, %v4396_v35  ;;  %v4654_v63 = vmul.f32 0.00048828125, %v4398_v42 }
 0x38d   : > { %v4907_v36 = vand.u32 2147483647, %v4651_v34  ;;  %v4909_v5 = vand.u32 2147483647, %v4653_v16 }
 0x38e   : > { %v4908_v30 = vand.u32 2147483647, %v4652_v47  ;;  %v4910_v40 = vand.u32 2147483647, %v4654_v63  ;;  %v7301_v63 = vld [vmem:[#allocation89_spill] sm:$0xff] }
 0x38f   : > { %v5232_v43 = vadd.f32 %v5231_v57, %v4907_v36  ;;  %v5095_v46 = vadd.f32 %v5094_v50, %v4909_v5  ;;  %v7299_v50 = vld [vmem:[#allocation87_spill] sm:$0xff] }
 0x390   : > { %v5301_v31 = vadd.f32 %v5300_v1, %v4908_v30  ;;  %v3006_v18 = vpop.f32.mrf.mxu2  ;;  %v5164_v6 = vadd.f32 %v5163_v12, %v4910_v40  ;;  %v2671_v41 = vpop.f32.mrf.mxu0  ;;  %v7302_v40 = vld [vmem:[#allocation90_spill] sm:$0xff] }
 0x391   : > { %v4399_v55 = vsub.f32 %v7292_v26, %v3006_v18  ;;  %v3175_v62 = vpop.f32.mrf.mxu3  ;;  %v4401_v8 = vsub.f32 %v7294_v45, %v2671_v41  ;;  %v2840_v28 = vpop.f32.mrf.mxu1 }
 0x392   : > { %v4400_v51 = vsub.f32 %v7293_v56, %v3175_v62  ;;  %v4402_v32 = vsub.f32 %v7295_v10, %v2840_v28 }
 0x393   : > { %v4655_v21 = vmul.f32 0.00048828125, %v4399_v55  ;;  %v4657_v37 = vmul.f32 0.00048828125, %v4401_v8  ;;  %2710 = vmatmul.bf16.gmra.mxu0 %v7296_v27  ;;  %v7304_v55 = vld [vmem:[#allocation92_spill] sm:$0xff] }
 0x394   : > { %v4656_v53 = vmul.f32 0.00048828125, %v4400_v51  ;;  %v4658_v11 = vmul.f32 0.00048828125, %v4402_v32  ;;  %2879 = vmatmul.bf16.gmra.mxu1 %v7296_v27  ;;  %v7305_v51 = vld [vmem:[#allocation10_spill] sm:$0xff] }
 0x395   : > { %v4911_v54 = vand.u32 2147483647, %v4655_v21  ;;  %3048 = vmatmul.bf16.gmra.mxu2 %v7296_v27  ;;  %v4913_v0 = vand.u32 2147483647, %v4657_v37 }
 0x396   : > { %v4912_v9 = vand.u32 2147483647, %v4656_v53  ;;  %3217 = vmatmul.bf16.gmra.mxu3 %v7296_v27  ;;  %v4914_v3 = vand.u32 2147483647, %v4658_v11  ;;  %v7306_v11 = vld [vmem:[#allocation93_spill] sm:$0xff] }
 0x397   : > { %v5233_v58 = vadd.f32 %v5232_v43, %v4911_v54  ;;  %v5096_v17 = vadd.f32 %v5095_v46, %v4913_v0  ;;  %v7303_v46 = vld [vmem:[#allocation91_spill] sm:$0xff] }
 0x398   : > { %v5302_v23 = vadd.f32 %v5301_v31, %v4912_v9  ;;  %v3009_v48 = vpop.f32.mrf.mxu2  ;;  %v5165_v44 = vadd.f32 %v5164_v6, %v4914_v3  ;;  %v2673_v57 = vpop.f32.mrf.mxu0  ;;  %v7307_v3 = vld [vmem:[#allocation94_spill] sm:$0xff] }
 0x399   : > { %v4403_v7 = vsub.f32 %v7297_v15, %v3009_v48  ;;  %v3178_v49 = vpop.f32.mrf.mxu3  ;;  %v4405_v2 = vsub.f32 %v7299_v50, %v2673_v57  ;;  %v2842_v12 = vpop.f32.mrf.mxu1 }
 0x39a   : > { %v4404_v1 = vsub.f32 %v7298_v29, %v3178_v49  ;;  %v4406_v20 = vsub.f32 %v7300_v25, %v2842_v12 }
 0x39b   : > { %v4659_v4 = vmul.f32 0.00048828125, %v4403_v7  ;;  %v4661_v13 = vmul.f32 0.00048828125, %v4405_v2  ;;  %v7309_v7 = vld [vmem:[#allocation96_spill] sm:$0xff] }
 0x39c   : > { %v4660_v61 = vmul.f32 0.00048828125, %v4404_v1  ;;  %v4662_v24 = vmul.f32 0.00048828125, %v4406_v20 }
 0x39d   : > { %v4915_v35 = vand.u32 2147483647, %v4659_v4  ;;  %v4917_v14 = vand.u32 2147483647, %v4661_v13 }
 0x39e   : > { %v4916_v38 = vand.u32 2147483647, %v4660_v61  ;;  %v4918_v39 = vand.u32 2147483647, %v4662_v24  ;;  %v7310_v24 = vld [vmem:[#allocation97_spill] sm:$0xff] }
 0x39f   : > { %v5234_v34 = vadd.f32 %v5233_v58, %v4915_v35  ;;  %v5097_v47 = vadd.f32 %v5096_v17, %v4917_v14  ;;  %v7308_v17 = vld [vmem:[#allocation95_spill] sm:$0xff] }
 0x3a0   : > { %v5303_v42 = vadd.f32 %v5302_v23, %v4916_v38  ;;  %v3011_v16 = vpop.f32.mrf.mxu2  ;;  %v5166_v36 = vadd.f32 %v5165_v44, %v4918_v39  ;;  %v2676_v43 = vpop.f32.mrf.mxu0  ;;  %v7311_v39 = vld [vmem:[#allocation98_spill] sm:$0xff] }
 0x3a1   : > { %v4407_v30 = vsub.f32 %v7301_v63, %v3011_v16  ;;  %v3180_v5 = vpop.f32.mrf.mxu3  ;;  %v4409_v18 = vsub.f32 %v7303_v46, %v2676_v43  ;;  %v2845_v6 = vpop.f32.mrf.mxu1 }
 0x3a2   : > { %v4408_v31 = vsub.f32 %v7302_v40, %v3180_v5  ;;  %v4410_v62 = vsub.f32 %v7304_v55, %v2845_v6 }
 0x3a3   : > { %v4663_v26 = vmul.f32 0.00048828125, %v4407_v30  ;;  %v4665_v56 = vmul.f32 0.00048828125, %v4409_v18  ;;  %2715 = vmatmul.bf16.gmra.mxu0 %v7305_v51  ;;  %v7313_v30 = vld [vmem:[#allocation100_spill] sm:$0xff] }
 0x3a4   : > { %v4664_v41 = vmul.f32 0.00048828125, %v4408_v31  ;;  %v4666_v8 = vmul.f32 0.00048828125, %v4410_v62  ;;  %2884 = vmatmul.bf16.gmra.mxu1 %v7305_v51  ;;  %v7314_v31 = vld [vmem:[#allocation7_spill] sm:$0xff] }
 0x3a5   : > { %v4919_v45 = vand.u32 2147483647, %v4663_v26  ;;  %3053 = vmatmul.bf16.gmra.mxu2 %v7305_v51  ;;  %v4921_v21 = vand.u32 2147483647, %v4665_v56 }
 0x3a6   : > { %v4920_v28 = vand.u32 2147483647, %v4664_v41  ;;  %3222 = vmatmul.bf16.gmra.mxu3 %v7305_v51  ;;  %v4922_v32 = vand.u32 2147483647, %v4666_v8 }
 0x3a7   : > { %v5235_v10 = vadd.f32 %v5234_v34, %v4919_v45  ;;  %v5098_v37 = vadd.f32 %v5097_v47, %v4921_v21  ;;  %v7312_v47 = vld [vmem:[#allocation99_spill] sm:$0xff] }
 0x3a8   : > { %v5304_v53 = vadd.f32 %v5303_v42, %v4920_v28  ;;  %v3014_v27 = vpop.f32.mrf.mxu2  ;;  %v5167_v54 = vadd.f32 %v5166_v36, %v4922_v32  ;;  %v2678_v58 = vpop.f32.mrf.mxu0 }
 0x3a9   : > { %v4411_v9 = vsub.f32 %v7306_v11, %v3014_v27  ;;  %v3183_v0 = vpop.f32.mrf.mxu3  ;;  %v4413_v48 = vsub.f32 %v7308_v17, %v2678_v58  ;;  %v2847_v44 = vpop.f32.mrf.mxu1  ;;  %v7317_v11 = vld [vmem:[#allocation104_spill] sm:$0xff] }
 0x3aa   : > { %v4412_v23 = vsub.f32 %v7307_v3, %v3183_v0  ;;  %v4414_v49 = vsub.f32 %v7309_v7, %v2847_v44 }
 0x3ab   : > { %v4667_v15 = vmul.f32 0.00048828125, %v4411_v9  ;;  %v4669_v29 = vmul.f32 0.00048828125, %v4413_v48 }
 0x3ac   : > { %v4668_v57 = vmul.f32 0.00048828125, %v4412_v23  ;;  %v4670_v50 = vmul.f32 0.00048828125, %v4414_v49 }
 0x3ad   : > { %v4923_v1 = vand.u32 2147483647, %v4667_v15  ;;  %v4925_v12 = vand.u32 2147483647, %v4669_v29  ;;  %v7318_v29 = vld [vmem:[#allocation105_spill] sm:$0xff] }
 0x3ae   : > { %v4924_v2 = vand.u32 2147483647, %v4668_v57  ;;  %v4926_v25 = vand.u32 2147483647, %v4670_v50 }
 0x3af   : > { %v5236_v4 = vadd.f32 %v5235_v10, %v4923_v1  ;;  %v5099_v61 = vadd.f32 %v5098_v37, %v4925_v12  ;;  %v7315_v10 = vld [vmem:[#allocation102_spill] sm:$0xff] }
 0x3b0   : > { %v5305_v20 = vadd.f32 %v5304_v53, %v4924_v2  ;;  %v3016_v13 = vpop.f32.mrf.mxu2  ;;  %v5168_v35 = vadd.f32 %v5167_v54, %v4926_v25  ;;  %v2681_v34 = vpop.f32.mrf.mxu0  ;;  %v7316_v53 = vld [vmem:[#allocation103_spill] sm:$0xff]  ;;  %v7319_v12 = vld [vmem:[#allocation106_spill] sm:$0xff] }
 0x3b1   : > { %v4415_v38 = vsub.f32 %v7310_v24, %v3016_v13  ;;  %v3185_v14 = vpop.f32.mrf.mxu3  ;;  %v4417_v16 = vsub.f32 %v7312_v47, %v2681_v34  ;;  %v2850_v36 = vpop.f32.mrf.mxu1  ;;  %v7320_v25 = vld [vmem:[#allocation107_spill] sm:$0xff]  ;;  %v7322_v34 = vld [vmem:[#allocation4_spill] sm:$0xff] }
 0x3b2   : > { %v4416_v42 = vsub.f32 %v7311_v39, %v3185_v14  ;;  %v4418_v5 = vsub.f32 %v7313_v30, %v2850_v36 }
 0x3b3   : > { %v4671_v63 = vmul.f32 0.00048828125, %v4415_v38  ;;  %v4673_v40 = vmul.f32 0.00048828125, %v4417_v16  ;;  %2720 = vmatmul.bf16.gmra.mxu0 %v7314_v31 }
 0x3b4   : > { %v4672_v43 = vmul.f32 0.00048828125, %v4416_v42  ;;  %v4674_v18 = vmul.f32 0.00048828125, %v4418_v5  ;;  %2889 = vmatmul.bf16.gmra.mxu1 %v7314_v31 }
 0x3b5   : > { %v4927_v46 = vand.u32 2147483647, %v4671_v63  ;;  %3058 = vmatmul.bf16.gmra.mxu2 %v7314_v31  ;;  %v4929_v26 = vand.u32 2147483647, %v4673_v40 }
 0x3b6   : > { %v4928_v6 = vand.u32 2147483647, %v4672_v43  ;;  %3227 = vmatmul.bf16.gmra.mxu3 %v7314_v31  ;;  %v4930_v62 = vand.u32 2147483647, %v4674_v18  ;;  %v7323_v31 = vld [vmem:[#allocation109_spill] sm:$0xff] }
 0x3b7   : > { %v5237_v55 = vadd.f32 %v5236_v4, %v4927_v46  ;;  %v5100_v56 = vadd.f32 %v5099_v61, %v4929_v26  ;;  %v7324_v26 = vld [vmem:[#allocation110_spill] sm:$0xff] }
 0x3b8   : > { %v5306_v41 = vadd.f32 %v5305_v20, %v4928_v6  ;;  %v3019_v51 = vpop.f32.mrf.mxu2  ;;  %v5169_v45 = vadd.f32 %v5168_v35, %v4930_v62  ;;  %v2683_v21 = vpop.f32.mrf.mxu0  ;;  %v7321_v35 = vld [vmem:[#allocation108_spill] sm:$0xff]  ;;  %v7325_v62 = vld [vmem:[#allocation111_spill] sm:$0xff] }
 0x3b9   : > { %v4419_v8 = vsub.f32 %v6138_v19, %v3019_v51  ;;  %v3188_v28 = vpop.f32.mrf.mxu3  ;;  %v4421_v37 = vsub.f32 %v7316_v53, %v2683_v21  ;;  %v2852_v27 = vpop.f32.mrf.mxu1 }
 0x3ba   : > { %v4420_v32 = vsub.f32 %v7315_v10, %v3188_v28  ;;  %v4422_v9 = vsub.f32 %v7317_v11, %v2852_v27 }
 0x3bb   : > { %v4675_v54 = vmul.f32 0.00048828125, %v4419_v8  ;;  %v4677_v58 = vmul.f32 0.00048828125, %v4421_v37 }
 0x3bc   : > { %v4676_v0 = vmul.f32 0.00048828125, %v4420_v32  ;;  %v4678_v23 = vmul.f32 0.00048828125, %v4422_v9 }
 0x3bd   : > { %v4931_v3 = vand.u32 2147483647, %v4675_v54  ;;  %v4933_v48 = vand.u32 2147483647, %v4677_v58 }
 0x3be   : > { %v4932_v17 = vand.u32 2147483647, %v4676_v0  ;;  %v4934_v15 = vand.u32 2147483647, %v4678_v23 }
 0x3bf   : > { %v5238_v44 = vadd.f32 %v5237_v55, %v4931_v3  ;;  %v5101_v19 = vadd.f32 %v5100_v56, %v4933_v48  ;;  %v7327_v3 = vld [vmem:[#allocation113_spill] sm:$0xff] }
 0x3c0   : > { %v5307_v7 = vadd.f32 %v5306_v41, %v4932_v17  ;;  %v3021_v49 = vpop.f32.mrf.mxu2  ;;  %v5170_v57 = vadd.f32 %v5169_v45, %v4934_v15  ;;  %v2686_v2 = vpop.f32.mrf.mxu0  ;;  %v7326_v45 = vld [vmem:[#allocation112_spill] sm:$0xff] }
 0x3c1   : > { %v4423_v1 = vsub.f32 %v7318_v29, %v3021_v49  ;;  %v3190_v50 = vpop.f32.mrf.mxu3  ;;  %v4425_v20 = vsub.f32 %v7320_v25, %v2686_v2  ;;  %v2855_v61 = vpop.f32.mrf.mxu1  ;;  %v7330_v29 = vld [vmem:[#allocation116_spill] sm:$0xff] }
 0x3c2   : > { %v4424_v4 = vsub.f32 %v7319_v12, %v3190_v50  ;;  %v4426_v24 = vsub.f32 %v7321_v35, %v2855_v61 }
 0x3c3   : > { %v4679_v13 = vmul.f32 0.00048828125, %v4423_v1  ;;  %v4681_v14 = vmul.f32 0.00048828125, %v4425_v20  ;;  %2725 = vmatmul.bf16.gmra.mxu0 %v7322_v34 }
 0x3c4   : > { %v4680_v38 = vmul.f32 0.00048828125, %v4424_v4  ;;  %v4682_v42 = vmul.f32 0.00048828125, %v4426_v24  ;;  %2894 = vmatmul.bf16.gmra.mxu1 %v7322_v34 }
 0x3c5   : > { %v4935_v39 = vand.u32 2147483647, %v4679_v13  ;;  %3063 = vmatmul.bf16.gmra.mxu2 %v7322_v34  ;;  %v4937_v16 = vand.u32 2147483647, %v4681_v14 }
 0x3c6   : > { %v4936_v47 = vand.u32 2147483647, %v4680_v38  ;;  %3232 = vmatmul.bf16.gmra.mxu3 %v7322_v34  ;;  %v4938_v63 = vand.u32 2147483647, %v4682_v42  ;;  %v7331_v34 = vld [vmem:[#allocation117_spill] sm:$0xff] }
 0x3c7   : > { %v5239_v36 = vadd.f32 %v5238_v44, %v4935_v39  ;;  %v5102_v5 = vadd.f32 %v5101_v19, %v4937_v16  ;;  %v7328_v44 = vld [vmem:[#allocation114_spill] sm:$0xff] }
 0x3c8   : > { %v5308_v30 = vadd.f32 %v5307_v7, %v4936_v47  ;;  %v3024_v43 = vpop.f32.mrf.mxu2  ;;  %v5171_v40 = vadd.f32 %v5170_v57, %v4938_v63  ;;  %v2688_v6 = vpop.f32.mrf.mxu0  ;;  %v7329_v7 = vld [vmem:[#allocation115_spill] sm:$0xff]  ;;  %v7332_v16 = vld [vmem:[#allocation118_spill] sm:$0xff] }
 0x3c9   : > { %v4427_v46 = vsub.f32 %v7323_v31, %v3024_v43  ;;  %v3193_v18 = vpop.f32.mrf.mxu3  ;;  %v4429_v41 = vsub.f32 %v7325_v62, %v2688_v6  ;;  %v2857_v56 = vpop.f32.mrf.mxu1  ;;  %v7333_v63 = vld [vmem:[#allocation119_spill] sm:$0xff] }
 0x3ca   : > { %v4428_v55 = vsub.f32 %v7324_v26, %v3193_v18  ;;  %v4430_v8 = vsub.f32 %v7326_v45, %v2857_v56 }
 0x3cb   : > { %v4683_v51 = vmul.f32 0.00048828125, %v4427_v46  ;;  %v4685_v21 = vmul.f32 0.00048828125, %v4429_v41 }
 0x3cc   : > { %v4684_v28 = vmul.f32 0.00048828125, %v4428_v55  ;;  %v4686_v32 = vmul.f32 0.00048828125, %v4430_v8 }
 0x3cd   : > { %v4939_v10 = vand.u32 2147483647, %v4683_v51  ;;  %v4941_v37 = vand.u32 2147483647, %v4685_v21 }
 0x3ce   : > { %v4940_v53 = vand.u32 2147483647, %v4684_v28  ;;  %v4942_v54 = vand.u32 2147483647, %v4686_v32  ;;  %v7335_v28 = vld [vmem:[#allocation121_spill] sm:$0xff] }
 0x3cf   : > { %v5240_v27 = vadd.f32 %v5239_v36, %v4939_v10  ;;  %v5103_v9 = vadd.f32 %v5102_v5, %v4941_v37 }
 0x3d0   : > { %v5309_v11 = vadd.f32 %v5308_v30, %v4940_v53  ;;  %v3026_v0 = vpop.f32.mrf.mxu2  ;;  %v5172_v58 = vadd.f32 %v5171_v40, %v4942_v54  ;;  %v2691_v48 = vpop.f32.mrf.mxu0  ;;  %v7334_v40 = vld [vmem:[#allocation120_spill] sm:$0xff]  ;;  %v7336_v53 = vld [vmem:[#allocation122_spill] sm:$0xff] }
 0x3d1   : > { %v4431_v23 = vsub.f32 %v7327_v3, %v3026_v0  ;;  %v3195_v17 = vpop.f32.mrf.mxu3  ;;  %v4433_v19 = vsub.f32 %v7329_v7, %v2691_v48  ;;  %v2860_v49 = vpop.f32.mrf.mxu1  ;;  %v7338_v0 = vld [vmem:[#allocation124_spill] sm:$0xff] }
 0x3d2   : > { %v4432_v15 = vsub.f32 %v7328_v44, %v3195_v17  ;;  %v4434_v1 = vsub.f32 %v7330_v29, %v2860_v49  ;;  %v7339_v17 = vld [vmem:[#allocation101_spill] sm:$0xff] }
 0x3d3   : > { %v4687_v57 = vmul.f32 0.00048828125, %v4431_v23  ;;  %v4689_v2 = vmul.f32 0.00048828125, %v4433_v19  ;;  %2730 = vmatmul.bf16.gmra.mxu0 %v6240_v22 }
 0x3d4   : > { %v4688_v50 = vmul.f32 0.00048828125, %v4432_v15  ;;  %v4690_v4 = vmul.f32 0.00048828125, %v4434_v1  ;;  %2899 = vmatmul.bf16.gmra.mxu1 %v6240_v22 }
 0x3d5   : > { %v4943_v12 = vand.u32 2147483647, %v4687_v57  ;;  %3068 = vmatmul.bf16.gmra.mxu2 %v6240_v22  ;;  %v4945_v20 = vand.u32 2147483647, %v4689_v2  ;;  %v7340_v2 = vld [vmem:[#allocation125_spill] sm:$0xff] }
 0x3d6   : > { %v4944_v25 = vand.u32 2147483647, %v4688_v50  ;;  %3237 = vmatmul.bf16.gmra.mxu3 %v6240_v22  ;;  %v4946_v13 = vand.u32 2147483647, %v4690_v4 }
 0x3d7   : > { %v5241_v61 = vadd.f32 %v5240_v27, %v4943_v12  ;;  %v5104_v24 = vadd.f32 %v5103_v9, %v4945_v20  ;;  %v7337_v27 = vld [vmem:[#allocation123_spill] sm:$0xff]  ;;  %v7341_v20 = vld [vmem:[#allocation126_spill] sm:$0xff] }
 0x3d8   : > { %v5310_v35 = vadd.f32 %v5309_v11, %v4944_v25  ;;  %v3029_v38 = vpop.f32.mrf.mxu2  ;;  %v5173_v14 = vadd.f32 %v5172_v58, %v4946_v13  ;;  %v2693_v47 = vpop.f32.mrf.mxu0  ;;  %v7342_v13 = vld [vmem:[#allocation127_spill] sm:$0xff] }
 0x3d9   : > { %v4435_v39 = vsub.f32 %v7331_v34, %v3029_v38  ;;  %v3198_v42 = vpop.f32.mrf.mxu3  ;;  %v4437_v30 = vsub.f32 %v7333_v63, %v2693_v47  ;;  %v2862_v5 = vpop.f32.mrf.mxu1 }
 0x3da   : > { %v4436_v36 = vsub.f32 %v7332_v16, %v3198_v42  ;;  %v4438_v31 = vsub.f32 %v7334_v40, %v2862_v5 }
 0x3db   : > { %v4691_v43 = vmul.f32 0.00048828125, %v4435_v39  ;;  %v4693_v22 = vmul.f32 0.00048828125, %v4437_v30 }
 0x3dc   : > { %v4692_v46 = vmul.f32 0.00048828125, %v4436_v36  ;;  %v4694_v6 = vmul.f32 0.00048828125, %v4438_v31 }
 0x3dd   : > { %v4947_v18 = vand.u32 2147483647, %v4691_v43  ;;  %v4949_v55 = vand.u32 2147483647, %v4693_v22  ;;  %v7344_v22 = vld [vmem:[#allocation129_spill] sm:$0xff] }
 0x3de   : > { %v4948_v26 = vand.u32 2147483647, %v4692_v46  ;;  %v4950_v41 = vand.u32 2147483647, %v4694_v6 }
 0x3df   : > { %v5242_v62 = vadd.f32 %v5241_v61, %v4947_v18  ;;  %v5105_v51 = vadd.f32 %v5104_v24, %v4949_v55  ;;  %v7345_v55 = vld [vmem:[#allocation130_spill] sm:$0xff] }
 0x3e0   : > { %v5311_v56 = vadd.f32 %v5310_v35, %v4948_v26  ;;  %v3031_v45 = vpop.f32.mrf.mxu2  ;;  %v5174_v8 = vadd.f32 %v5173_v14, %v4950_v41  ;;  %v2696_v32 = vpop.f32.mrf.mxu0  ;;  %v7343_v14 = vld [vmem:[#allocation128_spill] sm:$0xff]  ;;  %v7346_v41 = vld [vmem:[#allocation131_spill] sm:$0xff] }
 0x3e1   : > { %v4439_v21 = vsub.f32 %v7335_v28, %v3031_v45  ;;  %v3200_v10 = vpop.f32.mrf.mxu3  ;;  %v4441_v54 = vsub.f32 %v7337_v27, %v2696_v32  ;;  %v2865_v11 = vpop.f32.mrf.mxu1  ;;  %v7348_v32 = vld [vmem:[#allocation69_spill] sm:$0xff] }
 0x3e2   : > { %v4440_v37 = vsub.f32 %v7336_v53, %v3200_v10  ;;  %v4442_v58 = vsub.f32 %v7338_v0, %v2865_v11 }
 0x3e3   : > { %v4695_v9 = vmul.f32 0.00048828125, %v4439_v21  ;;  %v4697_v23 = vmul.f32 0.00048828125, %v4441_v54  ;;  %2735 = vmatmul.bf16.gmra.mxu0 %v7339_v17 }
 0x3e4   : > { %v4696_v3 = vmul.f32 0.00048828125, %v4440_v37  ;;  %v4698_v44 = vmul.f32 0.00048828125, %v4442_v58  ;;  %2904 = vmatmul.bf16.gmra.mxu1 %v7339_v17 }
 0x3e5   : > { %v4951_v48 = vand.u32 2147483647, %v4695_v9  ;;  %3073 = vmatmul.bf16.gmra.mxu2 %v7339_v17  ;;  %v4953_v7 = vand.u32 2147483647, %v4697_v23 }
 0x3e6   : > { %v4952_v15 = vand.u32 2147483647, %v4696_v3  ;;  %3242 = vmatmul.bf16.gmra.mxu3 %v7339_v17  ;;  %v4954_v49 = vand.u32 2147483647, %v4698_v44 }
 0x3e7   : > { %v5243_v19 = vadd.f32 %v5242_v62, %v4951_v48  ;;  %v5106_v29 = vadd.f32 %v5105_v51, %v4953_v7 }
 0x3e8   : > { %v5312_v57 = vadd.f32 %v5311_v56, %v4952_v15  ;;  %v3034_v1 = vpop.f32.mrf.mxu2  ;;  %v5175_v50 = vadd.f32 %v5174_v8, %v4954_v49  ;;  %v2698_v25 = vpop.f32.mrf.mxu0  ;;  %v7347_v8 = vld [vmem:[#allocation132_spill] sm:$0xff]  ;;  %v7349_v15 = vld [vmem:[#allocation133_spill] sm:$0xff] }
 0x3e9   : > { %v4443_v12 = vsub.f32 %v7340_v2, %v3034_v1  ;;  %v3203_v4 = vpop.f32.mrf.mxu3  ;;  %v4445_v35 = vsub.f32 %v7342_v13, %v2698_v25  ;;  %v2867_v24 = vpop.f32.mrf.mxu1 }
 0x3ea   : > { %v4444_v61 = vsub.f32 %v7341_v20, %v3203_v4  ;;  %v4446_v34 = vsub.f32 %v7343_v14, %v2867_v24  ;;  %v7351_v14 = vld [vmem:[#allocation135_spill] sm:$0xff] }
 0x3eb   : > { %v4699_v38 = vmul.f32 0.00048828125, %v4443_v12  ;;  %v4701_v42 = vmul.f32 0.00048828125, %v4445_v35 }
 0x3ec   : > { %v4700_v39 = vmul.f32 0.00048828125, %v4444_v61  ;;  %v4702_v16 = vmul.f32 0.00048828125, %v4446_v34 }
 0x3ed   : > { %v4955_v47 = vand.u32 2147483647, %v4699_v38  ;;  %v4957_v63 = vand.u32 2147483647, %v4701_v42 }
 0x3ee   : > { %v4956_v36 = vand.u32 2147483647, %v4700_v39  ;;  %v4958_v5 = vand.u32 2147483647, %v4702_v16 }
 0x3ef   : > { %v5244_v30 = vadd.f32 %v5243_v19, %v4955_v47  ;;  %v5107_v40 = vadd.f32 %v5106_v29, %v4957_v63  ;;  %v7350_v19 = vld [vmem:[#allocation134_spill] sm:$0xff]  ;;  %v7352_v47 = vld [vmem:[#allocation136_spill] sm:$0xff] }
 0x3f0   : > { %v5313_v43 = vadd.f32 %v5312_v57, %v4956_v36  ;;  %v3036_v31 = vpop.f32.mrf.mxu2  ;;  %v5176_v46 = vadd.f32 %v5175_v50, %v4958_v5  ;;  %v2701_v26 = vpop.f32.mrf.mxu0  ;;  %v7353_v36 = vld [vmem:[#allocation137_spill] sm:$0xff]  ;;  %v7354_v5 = vld [vmem:[#allocation138_spill] sm:$0xff] }
 0x3f1   : > { %v4447_v18 = vsub.f32 %v7344_v22, %v3036_v31  ;;  %v3205_v6 = vpop.f32.mrf.mxu3  ;;  %v4449_v56 = vsub.f32 %v7346_v41, %v2701_v26  ;;  %v2870_v51 = vpop.f32.mrf.mxu1 }
 0x3f2   : > { %v4448_v62 = vsub.f32 %v7345_v55, %v3205_v6  ;;  %v4450_v28 = vsub.f32 %v7347_v8, %v2870_v51 }
 0x3f3   : > { %v4703_v45 = vmul.f32 0.00048828125, %v4447_v18  ;;  %v4705_v10 = vmul.f32 0.00048828125, %v4449_v56  ;;  %2740 = vmatmul.bf16.gmra.mxu0 %v7348_v32 }
 0x3f4   : > { %v4704_v21 = vmul.f32 0.00048828125, %v4448_v62  ;;  %v4706_v37 = vmul.f32 0.00048828125, %v4450_v28  ;;  %2909 = vmatmul.bf16.gmra.mxu1 %v7348_v32 }
 0x3f5   : > { %v4959_v53 = vand.u32 2147483647, %v4703_v45  ;;  %3078 = vmatmul.bf16.gmra.mxu2 %v7348_v32  ;;  %v4961_v54 = vand.u32 2147483647, %v4705_v10  ;;  %v7356_v10 = vld [vmem:[#allocation139_spill] sm:$0xff] }
 0x3f6   : > { %v4960_v27 = vand.u32 2147483647, %v4704_v21  ;;  %3247 = vmatmul.bf16.gmra.mxu3 %v7348_v32  ;;  %v4962_v9 = vand.u32 2147483647, %v4706_v37 }
 0x3f7   : > { %v5245_v11 = vadd.f32 %v5244_v30, %v4959_v53  ;;  %v5108_v58 = vadd.f32 %v5107_v40, %v4961_v54  ;;  %v7357_v53 = vld [vmem:[#allocation140_spill] sm:$0xff] }
 0x3f8   : > { %v5314_v0 = vadd.f32 %v5313_v43, %v4960_v27  ;;  %v3039_v3 = vpop.f32.mrf.mxu2  ;;  %v5177_v23 = vadd.f32 %v5176_v46, %v4962_v9  ;;  %v2703_v44 = vpop.f32.mrf.mxu0  ;;  %v7355_v46 = vld [vmem:[#allocation38_spill] sm:$0xff] }
 0x3f9   : > { %v4451_v17 = vsub.f32 %v6238_v52, %v3039_v3  ;;  %v3208_v48 = vpop.f32.mrf.mxu3  ;;  %v4453_v49 = vsub.f32 %v7350_v19, %v2703_v44  ;;  %v2872_v57 = vpop.f32.mrf.mxu1 }
 0x3fa   : > { %v4452_v7 = vsub.f32 %v7349_v15, %v3208_v48  ;;  %v4454_v1 = vsub.f32 %v6250_v33, %v2872_v57  ;;  %v7359_v57 = vld [vmem:[#allocation142_spill] sm:$0xff] }
 0x3fb   : > { %v4707_v29 = vmul.f32 0.00048828125, %v4451_v17  ;;  %v4709_v2 = vmul.f32 0.00048828125, %v4453_v49 }
 0x3fc   : > { %v4708_v50 = vmul.f32 0.00048828125, %v4452_v7  ;;  %v4710_v4 = vmul.f32 0.00048828125, %v4454_v1 }
 0x3fd   : > { %v4963_v12 = vand.u32 2147483647, %v4707_v29  ;;  %v4965_v20 = vand.u32 2147483647, %v4709_v2  ;;  %v7360_v2 = vld [vmem:[#allocation143_spill] sm:$0xff] }
 0x3fe   : > { %v4964_v25 = vand.u32 2147483647, %v4708_v50  ;;  %v4966_v13 = vand.u32 2147483647, %v4710_v4  ;;  %v7361_v4 = vld [vmem:[#allocation144_spill] sm:$0xff] }
 0x3ff   : > { %v5246_v61 = vadd.f32 %v5245_v11, %v4963_v12  ;;  %v5109_v52 = vadd.f32 %v5108_v58, %v4965_v20  ;;  %v7358_v11 = vld [vmem:[#allocation141_spill] sm:$0xff] }
 0x400   : > { %v5315_v35 = vadd.f32 %v5314_v0, %v4964_v25  ;;  %v3041_v24 = vpop.f32.mrf.mxu2  ;;  %v5178_v38 = vadd.f32 %v5177_v23, %v4966_v13  ;;  %v2706_v42 = vpop.f32.mrf.mxu0  ;;  %v7362_v13 = vld [vmem:[#allocation145_spill] sm:$0xff] }
 0x401   : > { %v4455_v34 = vsub.f32 %v7351_v14, %v3041_v24  ;;  %v3210_v39 = vpop.f32.mrf.mxu3  ;;  %v4457_v33 = vsub.f32 %v7353_v36, %v2706_v42  ;;  %v2875_v63 = vpop.f32.mrf.mxu1 }
 0x402   : > { %v4456_v16 = vsub.f32 %v7352_v47, %v3210_v39  ;;  %v4458_v43 = vsub.f32 %v7354_v5, %v2875_v63 }
 0x403   : > { %v4711_v30 = vmul.f32 0.00048828125, %v4455_v34  ;;  %v4713_v31 = vmul.f32 0.00048828125, %v4457_v33  ;;  %2745 = vmatmul.bf16.gmra.mxu0 %v7355_v46 }
 0x404   : > { %v4712_v40 = vmul.f32 0.00048828125, %v4456_v16  ;;  %v4714_v18 = vmul.f32 0.00048828125, %v4458_v43  ;;  %2914 = vmatmul.bf16.gmra.mxu1 %v7355_v46 }
 0x405   : > { %v4967_v22 = vand.u32 2147483647, %v4711_v30  ;;  %3083 = vmatmul.bf16.gmra.mxu2 %v7355_v46  ;;  %v4969_v26 = vand.u32 2147483647, %v4713_v31  ;;  %v7364_v31 = vld [vmem:[#allocation146_spill] sm:$0xff] }
 0x406   : > { %v4968_v6 = vand.u32 2147483647, %v4712_v40  ;;  %3252 = vmatmul.bf16.gmra.mxu3 %v7355_v46  ;;  %v4970_v62 = vand.u32 2147483647, %v4714_v18 }
 0x407   : > { %v5247_v55 = vadd.f32 %v5246_v61, %v4967_v22  ;;  %v5110_v56 = vadd.f32 %v5109_v52, %v4969_v26  ;;  %v7365_v22 = vld [vmem:[#allocation147_spill] sm:$0xff] }
 0x408   : > { %v5316_v41 = vadd.f32 %v5315_v35, %v4968_v6  ;;  %v3044_v51 = vpop.f32.mrf.mxu2  ;;  %v5179_v45 = vadd.f32 %v5178_v38, %v4970_v62  ;;  %v2708_v21 = vpop.f32.mrf.mxu0  ;;  %v7363_v38 = vld [vmem:[#allocation14_spill] sm:$0xff] }
 0x409   : > { %v4459_v8 = vsub.f32 %v6272_v60, %v3044_v51  ;;  %v3213_v28 = vpop.f32.mrf.mxu3  ;;  %v4461_v37 = vsub.f32 %v7357_v53, %v2708_v21  ;;  %v2877_v27 = vpop.f32.mrf.mxu1 }
 0x40a   : > { %v4460_v32 = vsub.f32 %v7356_v10, %v3213_v28  ;;  %v4462_v9 = vsub.f32 %v7358_v11, %v2877_v27  ;;  %v7367_v27 = vld [vmem:[#allocation149_spill] sm:$0xff] }
 0x40b   : > { %v4715_v54 = vmul.f32 0.00048828125, %v4459_v8  ;;  %v4717_v58 = vmul.f32 0.00048828125, %v4461_v37 }
 0x40c   : > { %v4716_v0 = vmul.f32 0.00048828125, %v4460_v32  ;;  %v4718_v23 = vmul.f32 0.00048828125, %v4462_v9 }
 0x40d   : > { %v4971_v3 = vand.u32 2147483647, %v4715_v54  ;;  %v4973_v48 = vand.u32 2147483647, %v4717_v58 }
 0x40e   : > { %v4972_v17 = vand.u32 2147483647, %v4716_v0  ;;  %v4974_v15 = vand.u32 2147483647, %v4718_v23  ;;  %v7368_v0 = vld [vmem:[#allocation150_spill] sm:$0xff] }
 0x40f   : > { %v5248_v44 = vadd.f32 %v5247_v55, %v4971_v3  ;;  %v5111_v60 = vadd.f32 %v5110_v56, %v4973_v48  ;;  %v7366_v55 = vld [vmem:[#allocation148_spill] sm:$0xff]  ;;  %v7369_v3 = vld [vmem:[#allocation151_spill] sm:$0xff] }
 0x410   : > { %v5317_v7 = vadd.f32 %v5316_v41, %v4972_v17  ;;  %v3046_v19 = vpop.f32.mrf.mxu2  ;;  %v5180_v49 = vadd.f32 %v5179_v45, %v4974_v15  ;;  %v2711_v50 = vpop.f32.mrf.mxu0 }
 0x411   : > { %v4463_v29 = vsub.f32 %v7359_v57, %v3046_v19  ;;  %v3215_v1 = vpop.f32.mrf.mxu3  ;;  %v4465_v25 = vsub.f32 %v7361_v4, %v2711_v50  ;;  %v2880_v20 = vpop.f32.mrf.mxu1  ;;  %v7371_v19 = vld [vmem:[#allocation11_spill] sm:$0xff] }
 0x412   : > { %v4464_v12 = vsub.f32 %v7360_v2, %v3215_v1  ;;  %v4466_v35 = vsub.f32 %v7362_v13, %v2880_v20 }
 0x413   : > { %v4719_v61 = vmul.f32 0.00048828125, %v4463_v29  ;;  %v4721_v24 = vmul.f32 0.00048828125, %v4465_v25  ;;  %2750 = vmatmul.bf16.gmra.mxu0 %v7363_v38 }
 0x414   : > { %v4720_v52 = vmul.f32 0.00048828125, %v4464_v12  ;;  %v4722_v34 = vmul.f32 0.00048828125, %v4466_v35  ;;  %2919 = vmatmul.bf16.gmra.mxu1 %v7363_v38 }
 0x415   : > { %v4975_v14 = vand.u32 2147483647, %v4719_v61  ;;  %3088 = vmatmul.bf16.gmra.mxu2 %v7363_v38  ;;  %v4977_v42 = vand.u32 2147483647, %v4721_v24  ;;  %v7372_v61 = vld [vmem:[#allocation153_spill] sm:$0xff]  ;;  %v7373_v24 = vld [vmem:[#allocation154_spill] sm:$0xff] }
 0x416   : > { %v4976_v39 = vand.u32 2147483647, %v4720_v52  ;;  %3257 = vmatmul.bf16.gmra.mxu3 %v7363_v38  ;;  %v4978_v16 = vand.u32 2147483647, %v4722_v34 }
 0x417   : > { %v5249_v47 = vadd.f32 %v5248_v44, %v4975_v14  ;;  %v5112_v33 = vadd.f32 %v5111_v60, %v4977_v42  ;;  %v7370_v44 = vld [vmem:[#allocation152_spill] sm:$0xff]  ;;  %v7374_v14 = vld [vmem:[#allocation155_spill] sm:$0xff] }
 0x418   : > { %v5318_v36 = vadd.f32 %v5317_v7, %v4976_v39  ;;  %v3049_v63 = vpop.f32.mrf.mxu2  ;;  %v5181_v30 = vadd.f32 %v5180_v49, %v4978_v16  ;;  %v2713_v40 = vpop.f32.mrf.mxu0 }
 0x419   : > { %v4467_v5 = vsub.f32 %v6292_v59, %v3049_v63  ;;  %v3218_v43 = vpop.f32.mrf.mxu3  ;;  %v4469_v18 = vsub.f32 %v7365_v22, %v2713_v40  ;;  %v2882_v6 = vpop.f32.mrf.mxu1 }
 0x41a   : > { %v4468_v46 = vsub.f32 %v7364_v31, %v3218_v43  ;;  %v4470_v62 = vsub.f32 %v7366_v55, %v2882_v6 }
 0x41b   : > { %v4723_v26 = vmul.f32 0.00048828125, %v4467_v5  ;;  %v4725_v56 = vmul.f32 0.00048828125, %v4469_v18 }
 0x41c   : > { %v4724_v41 = vmul.f32 0.00048828125, %v4468_v46  ;;  %v4726_v45 = vmul.f32 0.00048828125, %v4470_v62 }
 0x41d   : > { %v4979_v51 = vand.u32 2147483647, %v4723_v26  ;;  %v4981_v28 = vand.u32 2147483647, %v4725_v56  ;;  %v7376_v26 = vld [vmem:[#allocation157_spill] sm:$0xff]  ;;  %v7377_v56 = vld [vmem:[#allocation158_spill] sm:$0xff] }
 0x41e   : > { %v4980_v8 = vand.u32 2147483647, %v4724_v41  ;;  %v4982_v10 = vand.u32 2147483647, %v4726_v45  ;;  %v7378_v45 = vld [vmem:[#allocation159_spill] sm:$0xff] }
 0x41f   : > { %v5250_v21 = vadd.f32 %v5249_v47, %v4979_v51  ;;  %v5113_v59 = vadd.f32 %v5112_v33, %v4981_v28  ;;  %v7375_v47 = vld [vmem:[#allocation156_spill] sm:$0xff] }
 0x420   : > { %v5319_v32 = vadd.f32 %v5318_v36, %v4980_v8  ;;  %v3051_v53 = vpop.f32.mrf.mxu2  ;;  %v5182_v37 = vadd.f32 %v5181_v30, %v4982_v10  ;;  %v2716_v9 = vpop.f32.mrf.mxu0  ;;  %v7379_v10 = vld [vmem:[#allocation160_spill] sm:$0xff] }
 0x421   : > { %v4471_v54 = vsub.f32 %v7367_v27, %v3051_v53  ;;  %v3220_v11 = vpop.f32.mrf.mxu3  ;;  %v4473_v23 = vsub.f32 %v7369_v3, %v2716_v9  ;;  %v2885_v17 = vpop.f32.mrf.mxu1 }
 0x422   : > { %v4472_v58 = vsub.f32 %v7368_v0, %v3220_v11  ;;  %v4474_v15 = vsub.f32 %v7370_v44, %v2885_v17  ;;  %v7381_v44 = vld [vmem:[#allocation161_spill] sm:$0xff] }
 0x423   : > { %v4727_v48 = vmul.f32 0.00048828125, %v4471_v54  ;;  %v4729_v60 = vmul.f32 0.00048828125, %v4473_v23  ;;  %2755 = vmatmul.bf16.gmra.mxu0 %v7371_v19 }
 0x424   : > { %v4728_v7 = vmul.f32 0.00048828125, %v4472_v58  ;;  %v4730_v57 = vmul.f32 0.00048828125, %v4474_v15  ;;  %2924 = vmatmul.bf16.gmra.mxu1 %v7371_v19 }
 0x425   : > { %v4983_v49 = vand.u32 2147483647, %v4727_v48  ;;  %3093 = vmatmul.bf16.gmra.mxu2 %v7371_v19  ;;  %v4985_v1 = vand.u32 2147483647, %v4729_v60 }
 0x426   : > { %v4984_v29 = vand.u32 2147483647, %v4728_v7  ;;  %3262 = vmatmul.bf16.gmra.mxu3 %v7371_v19  ;;  %v4986_v2 = vand.u32 2147483647, %v4730_v57  ;;  %v7382_v19 = vld [vmem:[#allocation162_spill] sm:$0xff]  ;;  %v7383_v57 = vld [vmem:[#allocation163_spill] sm:$0xff] }
 0x427   : > { %v5251_v50 = vadd.f32 %v5250_v21, %v4983_v49  ;;  %v5114_v4 = vadd.f32 %v5113_v59, %v4985_v1 }
 0x428   : > { %v5320_v12 = vadd.f32 %v5319_v32, %v4984_v29  ;;  %v3054_v25 = vpop.f32.mrf.mxu2  ;;  %v5183_v20 = vadd.f32 %v5182_v37, %v4986_v2  ;;  %v2718_v52 = vpop.f32.mrf.mxu0  ;;  %v7380_v37 = vld [vmem:[#allocation8_spill] sm:$0xff] }
 0x429   : > { %v4475_v13 = vsub.f32 %v7372_v61, %v3054_v25  ;;  %v3223_v35 = vpop.f32.mrf.mxu3  ;;  %v4477_v34 = vsub.f32 %v7374_v14, %v2718_v52  ;;  %v2887_v39 = vpop.f32.mrf.mxu1  ;;  %v7384_v2 = vld [vmem:[#allocation164_spill] sm:$0xff] }
 0x42a   : > { %v4476_v38 = vsub.f32 %v7373_v24, %v3223_v35  ;;  %v4478_v16 = vsub.f32 %v7375_v47, %v2887_v39 }
 0x42b   : > { %v4731_v42 = vmul.f32 0.00048828125, %v4475_v13  ;;  %v4733_v33 = vmul.f32 0.00048828125, %v4477_v34 }
 0x42c   : > { %v4732_v36 = vmul.f32 0.00048828125, %v4476_v38  ;;  %v4734_v30 = vmul.f32 0.00048828125, %v4478_v16 }
 0x42d   : > { %v4987_v63 = vand.u32 2147483647, %v4731_v42  ;;  %v4989_v43 = vand.u32 2147483647, %v4733_v33  ;;  %v7385_v42 = vld [vmem:[#allocation165_spill] sm:$0xff]  ;;  %v7386_v33 = vld [vmem:[#allocation166_spill] sm:$0xff] }
 0x42e   : > { %v4988_v5 = vand.u32 2147483647, %v4732_v36  ;;  %v4990_v31 = vand.u32 2147483647, %v4734_v30  ;;  %v7387_v30 = vld [vmem:[#allocation167_spill] sm:$0xff] }
 0x42f   : > { %v5252_v40 = vadd.f32 %v5251_v50, %v4987_v63  ;;  %v5115_v22 = vadd.f32 %v5114_v4, %v4989_v43 }
 0x430   : > { %v5321_v46 = vadd.f32 %v5320_v12, %v4988_v5  ;;  %v3056_v18 = vpop.f32.mrf.mxu2  ;;  %v5184_v6 = vadd.f32 %v5183_v20, %v4990_v31  ;;  %v2721_v41 = vpop.f32.mrf.mxu0  ;;  %v7388_v31 = vld [vmem:[#allocation168_spill] sm:$0xff] }
 0x431   : > { %v4479_v55 = vsub.f32 %v7376_v26, %v3056_v18  ;;  %v3225_v62 = vpop.f32.mrf.mxu3  ;;  %v4481_v8 = vsub.f32 %v7378_v45, %v2721_v41  ;;  %v2890_v28 = vpop.f32.mrf.mxu1 }
 0x432   : > { %v4480_v51 = vsub.f32 %v7377_v56, %v3225_v62  ;;  %v4482_v32 = vsub.f32 %v7379_v10, %v2890_v28  ;;  %v7390_v10 = vld [vmem:[#allocation169_spill] sm:$0xff] }
 0x433   : > { %v4735_v21 = vmul.f32 0.00048828125, %v4479_v55  ;;  %v4737_v53 = vmul.f32 0.00048828125, %v4481_v8  ;;  %2760 = vmatmul.bf16.gmra.mxu0 %v7380_v37 }
 0x434   : > { %v4736_v59 = vmul.f32 0.00048828125, %v4480_v51  ;;  %v4738_v54 = vmul.f32 0.00048828125, %v4482_v32  ;;  %2929 = vmatmul.bf16.gmra.mxu1 %v7380_v37 }
 0x435   : > { %v4991_v27 = vand.u32 2147483647, %v4735_v21  ;;  %3098 = vmatmul.bf16.gmra.mxu2 %v7380_v37  ;;  %v4993_v9 = vand.u32 2147483647, %v4737_v53 }
 0x436   : > { %v4992_v11 = vand.u32 2147483647, %v4736_v59  ;;  %3267 = vmatmul.bf16.gmra.mxu3 %v7380_v37  ;;  %v4994_v58 = vand.u32 2147483647, %v4738_v54  ;;  %v7391_v37 = vld [vmem:[#allocation170_spill] sm:$0xff]  ;;  %v7392_v54 = vld [vmem:[#allocation171_spill] sm:$0xff] }
 0x437   : > { %v5253_v0 = vadd.f32 %v5252_v40, %v4991_v27  ;;  %v5116_v23 = vadd.f32 %v5115_v22, %v4993_v9 }
 0x438   : > { %v5322_v3 = vadd.f32 %v5321_v46, %v4992_v11  ;;  %v3059_v17 = vpop.f32.mrf.mxu2  ;;  %v5185_v48 = vadd.f32 %v5184_v6, %v4994_v58  ;;  %v2723_v60 = vpop.f32.mrf.mxu0  ;;  %v7389_v6 = vld [vmem:[#allocation5_spill] sm:$0xff]  ;;  %v7393_v58 = vld [vmem:[#allocation172_spill] sm:$0xff] }
 0x439   : > { %v4483_v15 = vsub.f32 %v7381_v44, %v3059_v17  ;;  %v3228_v7 = vpop.f32.mrf.mxu3  ;;  %v4485_v29 = vsub.f32 %v7383_v57, %v2723_v60  ;;  %v2892_v1 = vpop.f32.mrf.mxu1 }
 0x43a   : > { %v4484_v49 = vsub.f32 %v7382_v19, %v3228_v7  ;;  %v4486_v12 = vsub.f32 %v7384_v2, %v2892_v1 }
 0x43b   : > { %v4739_v50 = vmul.f32 0.00048828125, %v4483_v15  ;;  %v4741_v25 = vmul.f32 0.00048828125, %v4485_v29 }
 0x43c   : > { %v4740_v4 = vmul.f32 0.00048828125, %v4484_v49  ;;  %v4742_v61 = vmul.f32 0.00048828125, %v4486_v12 }
 0x43d   : > { %v4995_v20 = vand.u32 2147483647, %v4739_v50  ;;  %v4997_v35 = vand.u32 2147483647, %v4741_v25  ;;  %v7394_v50 = vld [vmem:[#allocation173_spill] sm:$0xff]  ;;  %v7395_v25 = vld [vmem:[#allocation174_spill] sm:$0xff] }
 0x43e   : > { %v4996_v13 = vand.u32 2147483647, %v4740_v4  ;;  %v4998_v24 = vand.u32 2147483647, %v4742_v61  ;;  %v7396_v61 = vld [vmem:[#allocation175_spill] sm:$0xff] }
 0x43f   : > { %v5254_v52 = vadd.f32 %v5253_v0, %v4995_v20  ;;  %v5117_v14 = vadd.f32 %v5116_v23, %v4997_v35 }
 0x440   : > { %v5323_v38 = vadd.f32 %v5322_v3, %v4996_v13  ;;  %v3061_v34 = vpop.f32.mrf.mxu2  ;;  %v5186_v39 = vadd.f32 %v5185_v48, %v4998_v24  ;;  %v2726_v36 = vpop.f32.mrf.mxu0  ;;  %v7397_v24 = vld [vmem:[#allocation176_spill] sm:$0xff] }
 0x441   : > { %v4487_v47 = vsub.f32 %v7385_v42, %v3061_v34  ;;  %v3230_v16 = vpop.f32.mrf.mxu3  ;;  %v4489_v5 = vsub.f32 %v7387_v30, %v2726_v36  ;;  %v2895_v43 = vpop.f32.mrf.mxu1 }
 0x442   : > { %v4488_v63 = vsub.f32 %v7386_v33, %v3230_v16  ;;  %v4490_v46 = vsub.f32 %v7388_v31, %v2895_v43 }
 0x443   : > { %v4743_v40 = vmul.f32 0.00048828125, %v4487_v47  ;;  %v4745_v18 = vmul.f32 0.00048828125, %v4489_v5  ;;  %2765 = vmatmul.bf16.gmra.mxu0 %v7389_v6 }
 0x444   : > { %v4744_v22 = vmul.f32 0.00048828125, %v4488_v63  ;;  %v4746_v55 = vmul.f32 0.00048828125, %v4490_v46  ;;  %2934 = vmatmul.bf16.gmra.mxu1 %v7389_v6 }
 0x445   : > { %v4999_v26 = vand.u32 2147483647, %v4743_v40  ;;  %3103 = vmatmul.bf16.gmra.mxu2 %v7389_v6  ;;  %v5001_v41 = vand.u32 2147483647, %v4745_v18  ;;  %v7398_v40 = vld [vmem:[#allocation177_spill] sm:$0xff]  ;;  %v7399_v18 = vld [vmem:[#allocation178_spill] sm:$0xff] }
 0x446   : > { %v5000_v62 = vand.u32 2147483647, %v4744_v22  ;;  %3272 = vmatmul.bf16.gmra.mxu3 %v7389_v6  ;;  %v5002_v51 = vand.u32 2147483647, %v4746_v55 }
 0x447   : > { %v5255_v56 = vadd.f32 %v5254_v52, %v4999_v26  ;;  %v5118_v8 = vadd.f32 %v5117_v14, %v5001_v41  ;;  %v7400_v26 = vld [vmem:[#allocation179_spill] sm:$0xff] }
 0x448   : > { %v5324_v45 = vadd.f32 %v5323_v38, %v5000_v62  ;;  %v3064_v28 = vpop.f32.mrf.mxu2  ;;  %v5187_v21 = vadd.f32 %v5186_v39, %v5002_v51  ;;  %v2728_v53 = vpop.f32.mrf.mxu0 }
 0x449   : > { %v4491_v32 = vsub.f32 %v7390_v10, %v3064_v28  ;;  %v3233_v59 = vpop.f32.mrf.mxu3  ;;  %v4493_v11 = vsub.f32 %v7392_v54, %v2728_v53  ;;  %v2897_v9 = vpop.f32.mrf.mxu1 }
 0x44a   : > { %v4492_v27 = vsub.f32 %v7391_v37, %v3233_v59  ;;  %v4494_v3 = vsub.f32 %v7393_v58, %v2897_v9  ;;  %v7402_v9 = vld [vmem:[#allocation181_spill] sm:$0xff] }
 0x44b   : > { %v4747_v0 = vmul.f32 0.00048828125, %v4491_v32  ;;  %v4749_v17 = vmul.f32 0.00048828125, %v4493_v11 }
 0x44c   : > { %v4748_v23 = vmul.f32 0.00048828125, %v4492_v27  ;;  %v4750_v44 = vmul.f32 0.00048828125, %v4494_v3 }
 0x44d   : > { %v5003_v48 = vand.u32 2147483647, %v4747_v0  ;;  %v5005_v7 = vand.u32 2147483647, %v4749_v17 }
 0x44e   : > { %v5004_v15 = vand.u32 2147483647, %v4748_v23  ;;  %v5006_v19 = vand.u32 2147483647, %v4750_v44  ;;  %v7403_v23 = vld [vmem:[#allocation182_spill] sm:$0xff] }
 0x44f   : > { %v5256_v60 = vadd.f32 %v5255_v56, %v5003_v48  ;;  %v5119_v57 = vadd.f32 %v5118_v8, %v5005_v7  ;;  %v7401_v56 = vld [vmem:[#allocation180_spill] sm:$0xff]  ;;  %v7404_v48 = vld [vmem:[#allocation183_spill] sm:$0xff] }
 0x450   : > { %v5325_v49 = vadd.f32 %v5324_v45, %v5004_v15  ;;  %v3066_v29 = vpop.f32.mrf.mxu2  ;;  %v5188_v1 = vadd.f32 %v5187_v21, %v5006_v19  ;;  %v2731_v4 = vpop.f32.mrf.mxu0 }
 0x451   : > { %v4495_v2 = vsub.f32 %v7394_v50, %v3066_v29  ;;  %v3235_v12 = vpop.f32.mrf.mxu3  ;;  %v4497_v13 = vsub.f32 %v7396_v61, %v2731_v4  ;;  %v2900_v35 = vpop.f32.mrf.mxu1 }
 0x452   : > { %v4496_v20 = vsub.f32 %v7395_v25, %v3235_v12  ;;  %v4498_v38 = vsub.f32 %v7397_v24, %v2900_v35  ;;  %v7406_v35 = vld [vmem:[#allocation185_spill] sm:$0xff] }
 0x453   : > { %v4751_v52 = vmul.f32 0.00048828125, %v4495_v2  ;;  %v4753_v34 = vmul.f32 0.00048828125, %v4497_v13 }
 0x454   : > { %v4752_v14 = vmul.f32 0.00048828125, %v4496_v20  ;;  %v4754_v42 = vmul.f32 0.00048828125, %v4498_v38 }
 0x455   : > { %v5007_v39 = vand.u32 2147483647, %v4751_v52  ;;  %v5009_v16 = vand.u32 2147483647, %v4753_v34 }
 0x456   : > { %v5008_v47 = vand.u32 2147483647, %v4752_v14  ;;  %v5010_v33 = vand.u32 2147483647, %v4754_v42  ;;  %v7407_v14 = vld [vmem:[#allocation186_spill] sm:$0xff] }
 0x457   : > { %v5257_v36 = vadd.f32 %v5256_v60, %v5007_v39  ;;  %v5120_v30 = vadd.f32 %v5119_v57, %v5009_v16  ;;  %v7405_v60 = vld [vmem:[#allocation184_spill] sm:$0xff]  ;;  %v7408_v39 = vld [vmem:[#allocation187_spill] sm:$0xff] }
 0x458   : > { %v5326_v63 = vadd.f32 %v5325_v49, %v5008_v47  ;;  %v3069_v5 = vpop.f32.mrf.mxu2  ;;  %v5189_v43 = vadd.f32 %v5188_v1, %v5010_v33  ;;  %v2733_v22 = vpop.f32.mrf.mxu0 }
 0x459   : > { %v4499_v31 = vsub.f32 %v7398_v40, %v3069_v5  ;;  %v3238_v46 = vpop.f32.mrf.mxu3  ;;  %v4501_v55 = vsub.f32 %v7400_v26, %v2733_v22  ;;  %v2902_v62 = vpop.f32.mrf.mxu1 }
 0x45a   : > { %v4500_v6 = vsub.f32 %v7399_v18, %v3238_v46  ;;  %v4502_v51 = vsub.f32 %v7401_v56, %v2902_v62  ;;  %v7410_v62 = vld [vmem:[#allocation189_spill] sm:$0xff] }
 0x45b   : > { %v4755_v41 = vmul.f32 0.00048828125, %v4499_v31  ;;  %v4757_v8 = vmul.f32 0.00048828125, %v4501_v55 }
 0x45c   : > { %v4756_v45 = vmul.f32 0.00048828125, %v4500_v6  ;;  %v4758_v21 = vmul.f32 0.00048828125, %v4502_v51 }
 0x45d   : > { %v5011_v28 = vand.u32 2147483647, %v4755_v41  ;;  %v5013_v32 = vand.u32 2147483647, %v4757_v8 }
 0x45e   : > { %v5012_v10 = vand.u32 2147483647, %v4756_v45  ;;  %v5014_v53 = vand.u32 2147483647, %v4758_v21  ;;  %v7411_v45 = vld [vmem:[#allocation190_spill] sm:$0xff] }
 0x45f   : > { %v5258_v59 = vadd.f32 %v5257_v36, %v5011_v28  ;;  %v5121_v27 = vadd.f32 %v5120_v30, %v5013_v32  ;;  %v7409_v36 = vld [vmem:[#allocation188_spill] sm:$0xff]  ;;  %v7412_v28 = vld [vmem:[#allocation191_spill] sm:$0xff] }
 0x460   : > { %v5327_v37 = vadd.f32 %v5326_v63, %v5012_v10  ;;  %v3071_v54 = vpop.f32.mrf.mxu2  ;;  %v5190_v11 = vadd.f32 %v5189_v43, %v5014_v53  ;;  %v2736_v3 = vpop.f32.mrf.mxu0 }
 0x461   : > { %v4503_v0 = vsub.f32 %v7402_v9, %v3071_v54  ;;  %v3240_v58 = vpop.f32.mrf.mxu3  ;;  %v4505_v44 = vsub.f32 %v7404_v48, %v2736_v3  ;;  %v2905_v15 = vpop.f32.mrf.mxu1 }
 0x462   : > { %v4504_v17 = vsub.f32 %v7403_v23, %v3240_v58  ;;  %v4506_v19 = vsub.f32 %v7405_v60, %v2905_v15  ;;  %v7414_v15 = vld [vmem:[#allocation193_spill] sm:$0xff] }
 0x463   : > { %v4759_v7 = vmul.f32 0.00048828125, %v4503_v0  ;;  %v4761_v57 = vmul.f32 0.00048828125, %v4505_v44 }
 0x464   : > { %v4760_v49 = vmul.f32 0.00048828125, %v4504_v17  ;;  %v4762_v1 = vmul.f32 0.00048828125, %v4506_v19 }
 0x465   : > { %v5015_v29 = vand.u32 2147483647, %v4759_v7  ;;  %v5017_v2 = vand.u32 2147483647, %v4761_v57 }
 0x466   : > { %v5016_v50 = vand.u32 2147483647, %v4760_v49  ;;  %v5018_v4 = vand.u32 2147483647, %v4762_v1  ;;  %v7415_v49 = vld [vmem:[#allocation194_spill] sm:$0xff] }
 0x467   : > { %v5259_v12 = vadd.f32 %v5258_v59, %v5015_v29  ;;  %v5122_v20 = vadd.f32 %v5121_v27, %v5017_v2  ;;  %v7413_v59 = vld [vmem:[#allocation192_spill] sm:$0xff] }
 0x468   : > { %v5328_v25 = vadd.f32 %v5327_v37, %v5016_v50  ;;  %v3074_v61 = vpop.f32.mrf.mxu2  ;;  %v5191_v13 = vadd.f32 %v5190_v11, %v5018_v4  ;;  %v2738_v38 = vpop.f32.mrf.mxu0 }
 0x469   : > { %v4507_v52 = vsub.f32 %v7406_v35, %v3074_v61  ;;  %v3243_v24 = vpop.f32.mrf.mxu3  ;;  %v4509_v42 = vsub.f32 %v7408_v39, %v2738_v38  ;;  %v2907_v47 = vpop.f32.mrf.mxu1 }
 0x46a   : > { %v4508_v34 = vsub.f32 %v7407_v14, %v3243_v24  ;;  %v4510_v33 = vsub.f32 %v7409_v36, %v2907_v47 }
 0x46b   : > { %v4763_v16 = vmul.f32 0.00048828125, %v4507_v52  ;;  %v4765_v30 = vmul.f32 0.00048828125, %v4509_v42 }
 0x46c   : > { %v4764_v63 = vmul.f32 0.00048828125, %v4508_v34  ;;  %v4766_v43 = vmul.f32 0.00048828125, %v4510_v33 }
 0x46d   : > { %v5019_v5 = vand.u32 2147483647, %v4763_v16  ;;  %v5021_v31 = vand.u32 2147483647, %v4765_v30 }
 0x46e   : > { %v5020_v40 = vand.u32 2147483647, %v4764_v63  ;;  %v5022_v22 = vand.u32 2147483647, %v4766_v43 }
 0x46f   : > { %v5260_v46 = vadd.f32 %v5259_v12, %v5019_v5  ;;  %v5123_v6 = vadd.f32 %v5122_v20, %v5021_v31  ;;  %v7416_v31 = vld [vmem:[#allocation195_spill] sm:$0xff] }
 0x470   : > { %v5329_v18 = vadd.f32 %v5328_v25, %v5020_v40  ;;  %v3076_v26 = vpop.f32.mrf.mxu2  ;;  %v5192_v55 = vadd.f32 %v5191_v13, %v5022_v22  ;;  %v2741_v51 = vpop.f32.mrf.mxu0  ;;  %v7417_v22 = vld [vmem:[#allocation196_spill] sm:$0xff] }
 0x471   : > { %v4511_v41 = vsub.f32 %v7410_v62, %v3076_v26  ;;  %v3245_v56 = vpop.f32.mrf.mxu3  ;;  %v4513_v21 = vsub.f32 %v7412_v28, %v2741_v51  ;;  %v2910_v10 = vpop.f32.mrf.mxu1 }
 0x472   : > { %v4512_v8 = vsub.f32 %v7411_v45, %v3245_v56  ;;  %v4514_v53 = vsub.f32 %v7413_v59, %v2910_v10  ;;  %v7420_v56 = vld [vmem:[#allocation199_spill] sm:$0xff] }
 0x473   : > { %v4767_v32 = vmul.f32 0.00048828125, %v4511_v41  ;;  %v4769_v27 = vmul.f32 0.00048828125, %v4513_v21 }
 0x474   : > { %v4768_v37 = vmul.f32 0.00048828125, %v4512_v8  ;;  %v4770_v11 = vmul.f32 0.00048828125, %v4514_v53  ;;  %v7421_v8 = vld [vmem:[#allocation200_spill] sm:$0xff] }
 0x475   : > { %v5023_v54 = vand.u32 2147483647, %v4767_v32  ;;  %v5025_v0 = vand.u32 2147483647, %v4769_v27  ;;  %v7422_v32 = vld [vmem:[#allocation201_spill] sm:$0xff] }
 0x476   : > { %v5024_v9 = vand.u32 2147483647, %v4768_v37  ;;  %v5026_v3 = vand.u32 2147483647, %v4770_v11 }
 0x477   : > { %v5261_v58 = vadd.f32 %v5260_v46, %v5023_v54  ;;  %v5124_v17 = vadd.f32 %v5123_v6, %v5025_v0  ;;  %v7418_v6 = vld [vmem:[#allocation197_spill] sm:$0xff]  ;;  %v7423_v54 = vld [vmem:[#allocation202_spill] sm:$0xff] }
 0x478   : > { %v5330_v23 = vadd.f32 %v5329_v18, %v5024_v9  ;;  %v3079_v48 = vpop.f32.mrf.mxu2  ;;  %v6830_v44 = vadd.f32 %v5192_v55, %v5026_v3  ;;  %v2743_v19 = vpop.f32.mrf.mxu0  ;;  %v7419_v55 = vld [vmem:[#allocation198_spill] sm:$0xff]  ;;  %v7424_v9 = vld [vmem:[#allocation203_spill] sm:$0xff] }
 0x479   : > { %v4515_v7 = vsub.f32 %v7414_v15, %v3079_v48  ;;  %v3248_v60 = vpop.f32.mrf.mxu3  ;;  %v2912_v29 = vpop.f32.mrf.mxu1  ;;  %v4517_v46 = vsub.f32 %v7416_v31, %v2743_v19  ;;  %v7425_v48 = vld [vmem:[#allocation204_spill] sm:$0xff] }
 0x47a   : > { %v4516_v57 = vsub.f32 %v7415_v49, %v3248_v60  ;;  %v4518_v18 = vsub.f32 %v7417_v22, %v2912_v29  ;;  %v7429_v31 = vld [vmem:[#allocation208_spill] sm:$0xff] }
 0x47b   : > { %v4771_v1 = vmul.f32 0.00048828125, %v4515_v7  ;;  %v4773_v41 = vmul.f32 0.00048828125, %v4517_v46 }
 0x47c   : > { %v4772_v50 = vmul.f32 0.00048828125, %v4516_v57  ;;  %v4774_v45 = vmul.f32 0.00048828125, %v4518_v18  ;;  %v7426_v57 = vld [vmem:[#allocation205_spill] sm:$0xff] }
 0x47d   : > { %v5027_v2 = vand.u32 2147483647, %v4771_v1  ;;  %v5029_v3 = vand.u32 2147483647, %v4773_v41 }
 0x47e   : > { %v5028_v12 = vand.u32 2147483647, %v4772_v50  ;;  %v5030_v7 = vand.u32 2147483647, %v4774_v45 }
 0x47f   : > { %v5262_v4 = vadd.f32 %v5261_v58, %v5027_v2 }
 0x480   : > { %v6834_v25 = vadd.f32 %v5330_v23, %v5028_v12  ;;  %v3081_v20 = vpop.f32.mrf.mxu2  ;;  %v2746_v13 = vpop.f32.mrf.mxu0  ;;  %v5125_v12 = vadd.f32 %v5124_v17, %v5029_v3  ;;  %v7430_v17 = vld [vmem:[#allocation209_spill] sm:$0xff] }
 0x481   : > { %v3250_v61 = vpop.f32.mrf.mxu3  ;;  %v2915_v35 = vpop.f32.mrf.mxu1  ;;  %v4519_v26 = vsub.f32 %v7418_v6, %v3081_v20  ;;  %v4521_v51 = vsub.f32 %v7420_v56, %v2746_v13  ;;  %v7427_v13 = vld [vmem:[#allocation206_spill] sm:$0xff] }
 0x482   : > { %v4520_v62 = vsub.f32 %v7419_v55, %v3250_v61  ;;  %v4522_v28 = vsub.f32 %v7421_v8, %v2915_v35  ;;  %v7432_v8 = vld [vmem:[#allocation211_spill] sm:$0xff] }
 0x483   : > { %v4775_v10 = vmul.f32 0.00048828125, %v4519_v26  ;;  %v4777_v23 = vmul.f32 0.00048828125, %v4521_v51 }
 0x484   : > { %v4776_v27 = vmul.f32 0.00048828125, %v4520_v62  ;;  %v4778_v60 = vmul.f32 0.00048828125, %v4522_v28 }
 0x485   : > { %v5031_v19 = vand.u32 2147483647, %v4775_v10  ;;  %v5033_v20 = vand.u32 2147483647, %v4777_v23 }
 0x486   : > { %v5032_v1 = vand.u32 2147483647, %v4776_v27 }
 0x487   : > { %v5126_v51 = vadd.f32 %v5125_v12, %v5033_v20 }
 0x488   : > { %v3084_v52 = vpop.f32.mrf.mxu2  ;;  %v2748_v38 = vpop.f32.mrf.mxu0 }
 0x489   : > { %v3253_v24 = vpop.f32.mrf.mxu3  ;;  %v2917_v14 = vpop.f32.mrf.mxu1  ;;  %v4523_v59 = vsub.f32 %v7422_v32, %v3084_v52  ;;  %v4525_v0 = vsub.f32 %v7424_v9, %v2748_v38  ;;  %v5194_v52 = vadd.f32 %v6830_v44, %v5030_v7  ;;  %v7428_v38 = vld [vmem:[#allocation207_spill] sm:$0xff]  ;;  %v5332_v44 = vadd.f32 %v6834_v25, %v5032_v1  ;;  %v7434_v9 = vld [vmem:[#allocation213_spill] sm:$0xff]  ;;  %v7437_v1 = vld [vmem:[#allocation216_spill] sm:$0xff] }
 0x48a   : > { %v4524_v11 = vsub.f32 %v7423_v54, %v3253_v24  ;;  %v4526_v15 = vsub.f32 %v7425_v48, %v2917_v14  ;;  %v5034_v24 = vand.u32 2147483647, %v4778_v60  ;;  %v7435_v48 = vld [vmem:[#allocation214_spill] sm:$0xff] }
 0x48b   : > { %v4779_v49 = vmul.f32 0.00048828125, %v4523_v59  ;;  %v4781_v2 = vmul.f32 0.00048828125, %v4525_v0  ;;  %v7433_v59 = vld [vmem:[#allocation212_spill] sm:$0xff] }
 0x48c   : > { %v4780_v50 = vmul.f32 0.00048828125, %v4524_v11  ;;  %v4782_v61 = vmul.f32 0.00048828125, %v4526_v15 }
 0x48d   : > { %v5035_v18 = vand.u32 2147483647, %v4779_v49  ;;  %v5037_v41 = vand.u32 2147483647, %v4781_v2 }
 0x48e   : > { %v5036_v62 = vand.u32 2147483647, %v4780_v50 }
 0x48f   : > { %v5127_v3 = vadd.f32 %v5126_v51, %v5037_v41  ;;  %v7442_v51 = vld [vmem:[#allocation223_spill] sm:$0xff] }
 0x490   : > { %v3086_v34 = vpop.f32.mrf.mxu2  ;;  %v6836_v42 = vpop.f32.mrf.mxu0  ;;  %v5333_v0 = vadd.f32 %v5332_v44, %v5036_v62 }
 0x491   : > { %v3255_v39 = vpop.f32.mrf.mxu3  ;;  %v6838_v47 = vpop.f32.mrf.mxu1  ;;  %v4527_v29 = vsub.f32 %v7426_v57, %v3086_v34  ;;  %v4529_v14 = vsub.f32 %v7428_v38, %v6836_v42  ;;  %v5263_v34 = vadd.f32 %v5262_v4, %v5031_v19  ;;  %v7431_v42 = vld [vmem:[#allocation210_spill] sm:$0xff]  ;;  %v5038_v4 = vand.u32 2147483647, %v4782_v61  ;;  %v7436_v19 = vld [vmem:[#allocation215_spill] sm:$0xff]  ;;  %v7438_v61 = vld [vmem:[#allocation217_spill] sm:$0xff] }
 0x492   : > { %v4528_v35 = vsub.f32 %v7427_v13, %v3255_v39  ;;  %v4530_v46 = vsub.f32 %v7429_v31, %v6838_v47 }
 0x493   : > { %v4783_v6 = vmul.f32 0.00048828125, %v4527_v29  ;;  %v4785_v10 = vmul.f32 0.00048828125, %v4529_v14  ;;  %v5264_v25 = vadd.f32 %v5263_v34, %v5035_v18  ;;  %v7440_v14 = vld [vmem:[#allocation219_spill] sm:$0xff] }
 0x494   : > { %v4784_v45 = vmul.f32 0.00048828125, %v4528_v35  ;;  %v4786_v32 = vmul.f32 0.00048828125, %v4530_v46 }
 0x495   : > { %v5039_v54 = vand.u32 2147483647, %v4783_v6  ;;  %v5041_v57 = vand.u32 2147483647, %v4785_v10  ;;  %v7441_v6 = vld [vmem:[#allocation220_spill] sm:$0xff] }
 0x498   : > { %v6840_v16 = vpop.f32.mrf.mxu2  ;;  %v6844_v33 = vpop.f32.mrf.mxu0 }
 0x499   : > { %v6842_v36 = vpop.f32.mrf.mxu3  ;;  %v6846_v63 = vpop.f32.mrf.mxu1  ;;  %v4531_v26 = vsub.f32 %v7430_v17, %v6840_v16  ;;  %v4533_v28 = vsub.f32 %v7432_v8, %v6844_v33  ;;  %v5195_v16 = vadd.f32 %v5194_v52, %v5034_v24  ;;  %v5040_v33 = vand.u32 2147483647, %v4784_v45 }
 0x49a   : > { %v4532_v56 = vsub.f32 %v7431_v42, %v6842_v36  ;;  %v4534_v27 = vsub.f32 %v7433_v59, %v6846_v63  ;;  %v5042_v63 = vand.u32 2147483647, %v4786_v32  ;;  %v7443_v32 = vld [vmem:[#allocation224_spill] sm:$0xff] }
 0x49b   : > { %v4787_v11 = vmul.f32 0.00048828125, %v4531_v26  ;;  %v5196_v7 = vadd.f32 %v5195_v16, %v5038_v4  ;;  %v4789_v60 = vmul.f32 0.00048828125, %v4533_v28  ;;  %v5334_v46 = vadd.f32 %v5333_v0, %v5040_v33 }
 0x49c   : > { %v4788_v23 = vmul.f32 0.00048828125, %v4532_v56  ;;  %v4790_v29 = vmul.f32 0.00048828125, %v4534_v27  ;;  %v5128_v26 = vadd.f32 %v5127_v3, %v5041_v57 }
 0x49d   : > { %v5043_v12 = vand.u32 2147483647, %v4787_v11  ;;  %v5045_v34 = vand.u32 2147483647, %v4789_v60  ;;  %v7445_v11 = vld [vmem:[#allocation227_spill] sm:$0xff] }
 0x49e   : > { %v5044_v52 = vand.u32 2147483647, %v4788_v23  ;;  %v5046_v44 = vand.u32 2147483647, %v4790_v29  ;;  %v7446_v23 = vld [vmem:[#allocation228_spill] sm:$0xff] }
 0x49f   : > { %v5129_v28 = vadd.f32 %v5128_v26, %v5045_v34 }
 0x4a0   : > { %v6848_v30 = vpop.f32.mrf.mxu2  ;;  %v6852_v43 = vpop.f32.mrf.mxu0  ;;  %v5335_v4 = vadd.f32 %v5334_v46, %v5044_v52 }
 0x4a1   : > { %v6850_v5 = vpop.f32.mrf.mxu3  ;;  %v6854_v40 = vpop.f32.mrf.mxu1  ;;  %v4535_v36 = vsub.f32 %v7434_v9, %v6848_v30  ;;  %v4537_v49 = vsub.f32 %v7436_v19, %v6852_v43  ;;  %v5265_v30 = vadd.f32 %v5264_v25, %v5039_v54  ;;  %v7439_v43 = vld [vmem:[#allocation218_spill] sm:$0xff]  ;;  %v7444_v25 = vld [vmem:[#allocation221_spill] sm:$0xff] }
 0x4a2   : > { %v4536_v15 = vsub.f32 %v7435_v48, %v6850_v5  ;;  %v4538_v50 = vsub.f32 %v7437_v1, %v6854_v40 }
 0x4a3   : > { %v4791_v20 = vmul.f32 0.00048828125, %v4535_v36  ;;  %v4793_v18 = vmul.f32 0.00048828125, %v4537_v49  ;;  %v5266_v41 = vadd.f32 %v5265_v30, %v5043_v12  ;;  %v7447_v49 = vld [vmem:[#allocation231_spill] sm:$0xff] }
 0x4a4   : > { %v4792_v24 = vmul.f32 0.00048828125, %v4536_v15  ;;  %v4794_v62 = vmul.f32 0.00048828125, %v4538_v50 }
 0x4a5   : > { %v5047_v42 = vand.u32 2147483647, %v4791_v20  ;;  %v5049_v16 = vand.u32 2147483647, %v4793_v18  ;;  %v7449_v20 = vld [vmem:[#allocation222_spill] sm:$0xff] }
 0x4a6   : > { %v5048_v45 = vand.u32 2147483647, %v4792_v24  ;;  %v5050_v27 = vand.u32 2147483647, %v4794_v62  ;;  %v7450_v24 = vld [vmem:[#allocation225_spill] sm:$0xff] }
 0x4a7   : > { %v5267_v0 = vadd.f32 %v5266_v41, %v5047_v42  ;;  %v7453_v41 = vld [vmem:[#allocation230_spill] sm:$0xff] }
 0x4a8   : > { %v6862_v21 = vpop.f32.mrf.mxu2  ;;  %v6867_v37 = vpop.f32.mrf.mxu0  ;;  %v5336_v33 = vadd.f32 %v5335_v4, %v5048_v45  ;;  %v7454_v4 = vld [vmem:[#allocation233_spill] sm:$0xff] }
 0x4a9   : > { %v6865_v53 = vpop.f32.mrf.mxu3  ;;  %v6871_v58 = vpop.f32.mrf.mxu1  ;;  %v4539_v5 = vsub.f32 %v7438_v61, %v6862_v21  ;;  %v4541_v31 = vsub.f32 %v7440_v14, %v6867_v37  ;;  %v5197_v21 = vadd.f32 %v5196_v7, %v5042_v63  ;;  %v5130_v63 = vadd.f32 %v5129_v28, %v5049_v16  ;;  %v7455_v16 = vld [vmem:[#allocation234_spill] sm:$0xff] }
 0x4aa   : > { %v4540_v38 = vsub.f32 %v7439_v43, %v6865_v53  ;;  %v4542_v17 = vsub.f32 %v7441_v6, %v6871_v58 }
 0x4ab   : > { %v4795_v56 = vmul.f32 0.00048828125, %v4539_v5  ;;  %v4797_v8 = vmul.f32 0.00048828125, %v4541_v31  ;;  %v5198_v59 = vadd.f32 %v5197_v21, %v5046_v44 }
 0x4ac   : > { %v4796_v37 = vmul.f32 0.00048828125, %v4540_v38  ;;  %v4798_v10 = vmul.f32 0.00048828125, %v4542_v17  ;;  %v7452_v17 = vld [vmem:[#allocation229_spill] sm:$0xff] }
 0x4ad   : > { %v5053_v19 = vand.u32 2147483647, %v4797_v8  ;;  %v5199_v30 = vadd.f32 %v5198_v59, %v5050_v27 }
 0x4ae   : > { %v5052_v60 = vand.u32 2147483647, %v4796_v37  ;;  %v5054_v29 = vand.u32 2147483647, %v4798_v10 }
 0x4af   : > { %v5131_v31 = vadd.f32 %v5130_v63, %v5053_v19 }
 0x4b0   : > { %v6881_v22 = vpop.f32.mrf.mxu2  ;;  %v6887_v39 = vpop.f32.mrf.mxu0  ;;  %v5337_v14 = vadd.f32 %v5336_v33, %v5052_v60  ;;  %v5200_v18 = vadd.f32 %v5199_v30, %v5054_v29 }
 0x4b1   : > { %v6885_v55 = vpop.f32.mrf.mxu3  ;;  %v6892_v47 = vpop.f32.mrf.mxu1  ;;  %v4545_v53 = vsub.f32 %v7442_v51, %v6887_v39  ;;  %v4543_v54 = vsub.f32 %v7444_v25, %v6881_v22  ;;  %v5051_v39 = vand.u32 2147483647, %v4795_v56  ;;  %v7448_v22 = vld [vmem:[#allocation232_spill] sm:$0xff] }
 0x4b2   : > { %v4546_v58 = vsub.f32 %v7443_v32, %v6892_v47  ;;  %v4544_v61 = vsub.f32 %v7449_v20, %v6885_v55  ;;  %v7456_v32 = vld [vmem:[#allocation235_spill] sm:$0xff] }
 0x4b3   : > { %v4801_v3 = vmul.f32 0.00048828125, %v4545_v53  ;;  %v4799_v12 = vmul.f32 0.00048828125, %v4543_v54 }
 0x4b4   : > { %v4802_v1 = vmul.f32 0.00048828125, %v4546_v58  ;;  %v4800_v55 = vmul.f32 0.00048828125, %v4544_v61 }
 0x4b5   : > { %v5057_v52 = vand.u32 2147483647, %v4801_v3  ;;  %v5055_v44 = vand.u32 2147483647, %v4799_v12 }
 0x4b6   : > { %v5058_v6 = vand.u32 2147483647, %v4802_v1 }
 0x4b7   : > { %v5132_v51 = vadd.f32 %v5131_v31, %v5057_v52 }
 0x4b8   : > { %v6906_v2 = vpop.f32.mrf.mxu2  ;;  %v2763_v35 = vpop.f32.mrf.mxu0  ;;  %v5201_v27 = vadd.f32 %v5200_v18, %v5058_v6 }
 0x4b9   : > { %v6910_v13 = vpop.f32.mrf.mxu3  ;;  %v2932_v40 = vpop.f32.mrf.mxu1  ;;  %v4549_v9 = vsub.f32 %v7445_v11, %v2763_v35  ;;  %v5268_v35 = vadd.f32 %v5267_v0, %v5051_v39  ;;  %v4547_v43 = vsub.f32 %v7450_v24, %v6906_v2  ;;  %v7457_v11 = vld [vmem:[#allocation236_spill] sm:$0xff] }
 0x4ba   : > { %v4550_v48 = vsub.f32 %v7446_v23, %v2932_v40  ;;  %v7451_v40 = vld [vmem:[#allocation226_spill] sm:$0xff] }
 0x4bb   : > { %v4805_v5 = vmul.f32 0.00048828125, %v4549_v9  ;;  %v4548_v46 = vsub.f32 %v7451_v40, %v6910_v13  ;;  %v4803_v2 = vmul.f32 0.00048828125, %v4547_v43  ;;  %v7459_v40 = vld [vmem:[#allocation238_spill] sm:$0xff] }
 0x4bc   : > { %v4806_v38 = vmul.f32 0.00048828125, %v4550_v48 }
 0x4bd   : > { %v5061_v62 = vand.u32 2147483647, %v4805_v5  ;;  %v4804_v13 = vmul.f32 0.00048828125, %v4548_v46  ;;  %v5059_v23 = vand.u32 2147483647, %v4803_v2  ;;  %v7458_v5 = vld [vmem:[#allocation237_spill] sm:$0xff] }
 0x4be   : > { %v5062_v53 = vand.u32 2147483647, %v4806_v38 }
 0x4bf   : > { %v5133_v0 = vadd.f32 %v5132_v51, %v5061_v62  ;;  %v5060_v33 = vand.u32 2147483647, %v4804_v13 }
 0x4c0   : > { %v3101_v36 = vpop.f32.mrf.mxu2  ;;  %v2766_v7 = vpop.f32.mrf.mxu0  ;;  %v5202_v48 = vadd.f32 %v5201_v27, %v5062_v53 }
 0x4c1   : > { %v3270_v15 = vpop.f32.mrf.mxu3  ;;  %v4553_v47 = vsub.f32 %v7447_v49, %v2766_v7  ;;  %v2935_v57 = vpop.f32.mrf.mxu1  ;;  %v4551_v26 = vsub.f32 %v7452_v17, %v3101_v36  ;;  %v5056_v36 = vand.u32 2147483647, %v4800_v55 }
 0x4c2   : > { %v4554_v50 = vsub.f32 %v7448_v22, %v2935_v57  ;;  %v4552_v42 = vsub.f32 %v7453_v41, %v3270_v15 }
 0x4c3   : > { %v4809_v34 = vmul.f32 0.00048828125, %v4553_v47  ;;  %v4807_v25 = vmul.f32 0.00048828125, %v4551_v26  ;;  %v5269_v47 = vadd.f32 %v5268_v35, %v5055_v44  ;;  %v5338_v1 = vadd.f32 %v5337_v14, %v5056_v36 }
 0x4c4   : > { %v4810_v21 = vmul.f32 0.00048828125, %v4554_v50  ;;  %v4808_v39 = vmul.f32 0.00048828125, %v4552_v42 }
 0x4c5   : > { %v5065_v28 = vand.u32 2147483647, %v4809_v34  ;;  %v5063_v57 = vand.u32 2147483647, %v4807_v25  ;;  %v5270_v12 = vadd.f32 %v5269_v47, %v5059_v23  ;;  %v5339_v43 = vadd.f32 %v5338_v1, %v5060_v33 }
 0x4c6   : > { %v5066_v54 = vand.u32 2147483647, %v4810_v21  ;;  %v5064_v22 = vand.u32 2147483647, %v4808_v39 }
 0x4c7   : > { %v5134_v60 = vadd.f32 %v5133_v0, %v5065_v28  ;;  %v5271_v34 = vadd.f32 %v5270_v12, %v5063_v57 }
 0x4c8   : > { %v3104_v56 = vpop.f32.mrf.mxu2  ;;  %v2768_v8 = vpop.f32.mrf.mxu0  ;;  %v5203_v63 = vadd.f32 %v5202_v48, %v5066_v54  ;;  %v5340_v6 = vadd.f32 %v5339_v43, %v5064_v22 }
 0x4c9   : > { %v4555_v45 = vsub.f32 %v7454_v4, %v3104_v56  ;;  %v3273_v37 = vpop.f32.mrf.mxu3  ;;  %v4557_v58 = vsub.f32 %v7456_v32, %v2768_v8  ;;  %v2937_v59 = vpop.f32.mrf.mxu1 }
 0x4ca   : > { %v4556_v10 = vsub.f32 %v7455_v16, %v3273_v37  ;;  %v4558_v9 = vsub.f32 %v7457_v11, %v2937_v59 }
 0x4cb   : > { %v4813_v3 = vmul.f32 0.00048828125, %v4557_v58  ;;  %v4811_v15 = vmul.f32 0.00048828125, %v4555_v45 }
 0x4cc   : > { %v4814_v7 = vmul.f32 0.00048828125, %v4558_v9  ;;  %v4812_v19 = vmul.f32 0.00048828125, %v4556_v10 }
 0x4cd   : > { %v5069_v49 = vand.u32 2147483647, %v4813_v3  ;;  %v5067_v20 = vand.u32 2147483647, %v4811_v15 }
 0x4ce   : > { %v5070_v29 = vand.u32 2147483647, %v4814_v7  ;;  %v5068_v38 = vand.u32 2147483647, %v4812_v19 }
 0x4cf   : > { %v5135_v50 = vadd.f32 %v5134_v60, %v5069_v49  ;;  %v5272_v26 = vadd.f32 %v5271_v34, %v5067_v20 }
 0x4d0   : > { %v3106_v30 = vpop.f32.mrf.mxu2  ;;  %v5204_v61 = vadd.f32 %v5203_v63, %v5070_v29  ;;  %v5341_v55 = vadd.f32 %v5340_v6, %v5068_v38 }
 0x4d1   : > { %v4559_v52 = vsub.f32 %v7458_v5, %v3106_v30  ;;  %v3275_v24 = vpop.f32.mrf.mxu3  ;;  %v5136_v31 = vrot.slane %v5135_v50, 4 }
 0x4d2   : > { %v4560_v46 = vsub.f32 %v7459_v40, %v3275_v24  ;;  %v5205_v35 = vrot.slane %v5204_v61, 4 }
 0x4d3   : > { %v4815_v18 = vmul.f32 0.00048828125, %v4559_v52  ;;  %v5137_v17 = vadd.f32 %v5136_v31, %v5135_v50 }
 0x4d4   : > { %v4816_v14 = vmul.f32 0.00048828125, %v4560_v46  ;;  %v5206_v21 = vadd.f32 %v5205_v35, %v5204_v61 }
 0x4d5   : > { %v5071_v44 = vand.u32 2147483647, %v4815_v18  ;;  %v5138_v62 = vrot.slane %v5137_v17, 2 }
 0x4d6   : > { %v5072_v41 = vand.u32 2147483647, %v4816_v14  ;;  %v5207_v42 = vrot.slane %v5206_v21, 2 }
 0x4d7   : > { %v5273_v56 = vadd.f32 %v5272_v26, %v5071_v44  ;;  %v5139_v51 = vadd.f32 %v5138_v62, %v5137_v17 }
 0x4d8   : > { %v5342_v2 = vadd.f32 %v5341_v55, %v5072_v41  ;;  %v5208_v53 = vadd.f32 %v5207_v42, %v5206_v21 }
 0x4d9   : > { %v5274_v4 = vrot.slane %v5273_v56, 4  ;;  %v5140_v37 = vrot.slane %v5139_v51, 1 }
 0x4da   : > { %v5343_v45 = vrot.slane %v5342_v2, 4  ;;  %v5209_v13 = vrot.slane %v5208_v53, 1 }
 0x4db   : > { %v5275_v8 = vadd.f32 %v5274_v4, %v5273_v56  ;;  %v5141_v16 = vadd.f32 %v5140_v37, %v5139_v51 }
 0x4dc   : > { %v5344_v28 = vadd.f32 %v5343_v45, %v5342_v2  ;;  %v5210_v32 = vadd.f32 %v5209_v13, %v5208_v53 }
 0x4dd   : > { %v5276_v10 = vrot.slane %v5275_v8, 2 }
 0x4de   : > { %v5345_v58 = vrot.slane %v5344_v28, 2  ;;  %v5349_v27 = vadd.f32 %v5210_v32, %v5141_v16 }
 0x4df   : > { %v5277_v59 = vadd.f32 %v5276_v10, %v5275_v8 }
 0x4e0   : > { %v5346_v25 = vadd.f32 %v5345_v58, %v5344_v28 }
 0x4e1   : > { %v5278_v54 = vrot.slane %v5277_v59, 1 }
 0x4e2   : > { %v5347_v11 = vrot.slane %v5346_v25, 1 }
 0x4e3   : > { %v5279_v9 = vadd.f32 %v5278_v54, %v5277_v59 }
 0x4e4   : > { %v5348_v36 = vadd.f32 %v5347_v11, %v5346_v25 }
 0x4e5   : > { %v5350_v0 = vadd.f32 %v5349_v27, %v5279_v9 }
 0x4e7   : > { %v5351_v39 = vadd.f32 %v5350_v0, %v5348_v36 }
 0x4e9   : > { %5352 = vadd.xlane.f32.xlu0 %v5351_v39 }
 0x55c   : > { %v5353_v3 = vpop.xlane.xlu0 %5352 }
 0x55d   : > { %5355 = vst.msk [vmem:[%s193_s22] sm:$0x1] %vm5354_vm0, %v5353_v3 }
 0x55e PF: > { %s12_s11 = sadd.s32 1, %s5494_s11   ;;  %s7460_s9 = smov %s5490_s10 }
 0x55f   : > { %p9_p5 = scmp.ge.s32.totalorder %s12_s11, 4   ;;  %s7461_s10 = smov %s7463_s12 }
 0x561   :  { %11 = sbr.rel (!%p9_p5) target bundleno = 2 (0x2), region = 69 }

// kernel: _lambda_.5
= control target key start
LH: loop header
LB: loop body
LE: loop exit
PB: predicated region body
PF: predicated region fallthrough
CT: control target
= control target key end

     0   :  { %s127_s0 = inlined_call_operand.vmem [shape: f32[32,128], index: 0, kind: input, shape index: {}]   ;;  %s128_s1 = inlined_call_operand.vmem [shape: f32[32,128], index: 1, kind: input, shape index: {}]   ;;  %s129_s2 = inlined_call_operand.hbm [shape: f32[1,1,1], index: 2, kind: output, shape index: {}]  }
   0x1   :  { %v12_v0 = vld [vmem:[%s127_s0] sm:$0xff]  ;;  %v13_v1 = vld [vmem:[%s127_s0 + $0x8] sm:$0xff]  ;;  %v14_v2 = vld [vmem:[%s127_s0 + $0x10] sm:$0xff] }
   0x2   :  { %v15_v3 = vld [vmem:[%s127_s0 + $0x18] sm:$0xff]  ;;  %v16_v4 = vld [vmem:[%s128_s1] sm:$0xff]  ;;  %v17_v5 = vld [vmem:[%s128_s1 + $0x8] sm:$0xff] }
   0x3   :  { %v18_v6 = vld [vmem:[%s128_s1 + $0x10] sm:$0xff]  ;;  %v19_v7 = vld [vmem:[%s128_s1 + $0x18] sm:$0xff]  ;;  %v20_v8 = vsub.f32 %v12_v0, %v16_v4  ;;  %v21_v9 = vsub.f32 %v13_v1, %v17_v5 }
   0x4   :  { %7 = vsyncpa [#allocation3], 0  ;;  %v22_v10 = vsub.f32 %v14_v2, %v18_v6  ;;  %v23_v11 = vsub.f32 %v15_v3, %v19_v7  ;;  %s84_s0 = smov [#allocation2]   ;;  %s48_s27 = sshll.u32 %s129_s2, 4  ;;  %vm39_vm0 = vcmask 0   ;;  %s49_s27 = int_to_ptr.hbm [resolvable:$true] %s48_s27 }
   0x5   :  { %v24_v12 = vand.u32 2147483647, %v20_v8  ;;  %v25_v13 = vand.u32 2147483647, %v21_v9  ;;  %s46_s1 = sshll.u32 %s84_s0, 4  ;;  %s47_s1 = int_to_ptr.vmem [resolvable:$true] %s46_s1 }
   0x6   :  { %v26_v14 = vand.u32 2147483647, %v22_v10  ;;  %v27_v15 = vand.u32 2147483647, %v23_v11 }
   0x7   :  { %v28_v16 = vadd.f32 %v25_v13, %v24_v12 }
   0x9   :  { %v29_v17 = vadd.f32 %v28_v16, %v26_v14 }
   0xb   :  { %v30_v18 = vadd.f32 %v29_v17, %v27_v15 }
   0xd   :  { %v31_v19 = vrot.slane %v30_v18, 4 }
   0xf   :  { %v32_v20 = vadd.f32 %v31_v19, %v30_v18 }
  0x11   :  { %v33_v21 = vrot.slane %v32_v20, 2 }
  0x13   :  { %v34_v22 = vadd.f32 %v33_v21, %v32_v20 }
  0x15   :  { %v35_v23 = vrot.slane %v34_v22, 1 }
  0x17   :  { %v36_v24 = vadd.f32 %v35_v23, %v34_v22 }
  0x19   :  { %37 = vadd.xlane.f32.xlu0 %v36_v24 }
  0x8c   :  { %v38_v25 = vpop.xlane.xlu0 %37 }
  0x8d   :  { %40 = vst.msk [vmem:[#allocation2] sm:$0x1] %vm39_vm0, %v38_v25 }
  0x8e   :  { %51 = dma.vmem_to_hbm [thread:$0]  %s47_s1, 16, %s49_s27, [#allocation3]  }
  0x8f   :  { %82 = dma.done.wait [#allocation3], 16  }
  0x90   :  { %83 = vsyncadd [#allocation3], 4294967280 }
  0x91   :  { %56 = vsyncpa [#allocation3], 1 }

// kernel: _lambda_.4
= control target key start
LH: loop header
LB: loop body
LE: loop exit
PB: predicated region body
PF: predicated region fallthrough
CT: control target
= control target key end

     0   :  { %7 = vsyncpa [#allocation3], 0  ;;  %vm339_vm0 = vcmask 0   ;;  %s787_s0 = inlined_call_operand.vmem [shape: f32[512,128], index: 0, kind: input, shape index: {}]   ;;  %s788_s1 = inlined_call_operand.vmem [shape: f32[512,128], index: 1, kind: input, shape index: {}]   ;;  %s789_s2 = inlined_call_operand.hbm [shape: f32[1,1,1], index: 2, kind: output, shape index: {}]  }
   0x1   :  { %v12_v0 = vld [vmem:[%s787_s0] sm:$0xff]  ;;  %v13_v1 = vld [vmem:[%s787_s0 + $0x8] sm:$0xff]  ;;  %v14_v4 = vld [vmem:[%s787_s0 + $0x10] sm:$0xff]  ;;  %s348_s15 = sshll.u32 %s789_s2, 4  ;;  %s349_s15 = int_to_ptr.hbm [resolvable:$true] %s348_s15 }
   0x2   :  { %v76_v2 = vld [vmem:[%s788_s1] sm:$0xff]  ;;  %v77_v3 = vld [vmem:[%s788_s1 + $0x8] sm:$0xff]  ;;  %v78_v5 = vld [vmem:[%s788_s1 + $0x10] sm:$0xff] }
   0x3   :  { %v140_v6 = vsub.f32 %v12_v0, %v76_v2  ;;  %v141_v7 = vsub.f32 %v13_v1, %v77_v3  ;;  %v15_v8 = vld [vmem:[%s787_s0 + $0x18] sm:$0xff]  ;;  %v142_v10 = vsub.f32 %v14_v4, %v78_v5  ;;  %v16_v11 = vld [vmem:[%s787_s0 + $0x20] sm:$0xff]  ;;  %v17_v16 = vld [vmem:[%s787_s0 + $0x28] sm:$0xff] }
   0x4   :  { %v79_v9 = vld [vmem:[%s788_s1 + $0x18] sm:$0xff]  ;;  %v80_v12 = vld [vmem:[%s788_s1 + $0x20] sm:$0xff]  ;;  %v81_v17 = vld [vmem:[%s788_s1 + $0x28] sm:$0xff] }
   0x5   :  { %v143_v13 = vsub.f32 %v15_v8, %v79_v9  ;;  %v204_v14 = vand.u32 2147483647, %v140_v6  ;;  %v205_v15 = vand.u32 2147483647, %v141_v7  ;;  %v144_v18 = vsub.f32 %v16_v11, %v80_v12  ;;  %v18_v20 = vld [vmem:[%s787_s0 + $0x30] sm:$0xff]  ;;  %v19_v25 = vld [vmem:[%s787_s0 + $0x38] sm:$0xff] }
   0x6   :  { %v206_v19 = vand.u32 2147483647, %v142_v10  ;;  %v82_v21 = vld [vmem:[%s788_s1 + $0x30] sm:$0xff]  ;;  %v145_v22 = vsub.f32 %v17_v16, %v81_v17  ;;  %v83_v26 = vld [vmem:[%s788_s1 + $0x38] sm:$0xff]  ;;  %v20_v30 = vld [vmem:[%s787_s0 + $0x40] sm:$0xff] }
   0x7   :  { %v207_v23 = vand.u32 2147483647, %v143_v13  ;;  %v268_v24 = vadd.f32 %v205_v15, %v204_v14  ;;  %v146_v27 = vsub.f32 %v18_v20, %v82_v21  ;;  %v208_v28 = vand.u32 2147483647, %v144_v18  ;;  %v84_v31 = vld [vmem:[%s788_s1 + $0x40] sm:$0xff]  ;;  %v21_v35 = vld [vmem:[%s787_s0 + $0x48] sm:$0xff] }
   0x8   :  { %v147_v32 = vsub.f32 %v19_v25, %v83_v26  ;;  %v209_v33 = vand.u32 2147483647, %v145_v22  ;;  %v85_v36 = vld [vmem:[%s788_s1 + $0x48] sm:$0xff]  ;;  %v148_v37 = vsub.f32 %v20_v30, %v84_v31  ;;  %v22_v40 = vld [vmem:[%s787_s0 + $0x50] sm:$0xff]  ;;  %v23_v45 = vld [vmem:[%s787_s0 + $0x58] sm:$0xff] }
   0x9   :  { %v269_v29 = vadd.f32 %v268_v24, %v206_v19  ;;  %v210_v38 = vand.u32 2147483647, %v146_v27  ;;  %v86_v41 = vld [vmem:[%s788_s1 + $0x50] sm:$0xff]  ;;  %v149_v42 = vsub.f32 %v21_v35, %v85_v36  ;;  %v87_v46 = vld [vmem:[%s788_s1 + $0x58] sm:$0xff]  ;;  %v24_v50 = vld [vmem:[%s787_s0 + $0x60] sm:$0xff] }
   0xa   :  { %v211_v43 = vand.u32 2147483647, %v147_v32  ;;  %v150_v47 = vsub.f32 %v22_v40, %v86_v41  ;;  %v212_v48 = vand.u32 2147483647, %v148_v37  ;;  %v88_v51 = vld [vmem:[%s788_s1 + $0x60] sm:$0xff]  ;;  %v151_v52 = vsub.f32 %v23_v45, %v87_v46  ;;  %v25_v55 = vld [vmem:[%s787_s0 + $0x68] sm:$0xff] }
   0xb   :  { %v270_v34 = vadd.f32 %v269_v29, %v207_v23  ;;  %v213_v53 = vand.u32 2147483647, %v149_v42  ;;  %v89_v56 = vld [vmem:[%s788_s1 + $0x68] sm:$0xff]  ;;  %v152_v57 = vsub.f32 %v24_v50, %v88_v51  ;;  %v26_v60 = vld [vmem:[%s787_s0 + $0x70] sm:$0xff]  ;;  %v27_v1 = vld [vmem:[%s787_s0 + $0x78] sm:$0xff] }
   0xc   :  { %v214_v58 = vand.u32 2147483647, %v150_v47  ;;  %v90_v61 = vld [vmem:[%s788_s1 + $0x70] sm:$0xff]  ;;  %v153_v62 = vsub.f32 %v25_v55, %v89_v56  ;;  %v215_v63 = vand.u32 2147483647, %v151_v52  ;;  %v91_v2 = vld [vmem:[%s788_s1 + $0x78] sm:$0xff] }
   0xd   :  { %v271_v39 = vadd.f32 %v270_v34, %v208_v28  ;;  %v154_v3 = vsub.f32 %v26_v60, %v90_v61  ;;  %v216_v4 = vand.u32 2147483647, %v152_v57  ;;  %v28_v6 = vld [vmem:[%s787_s0 + $0x80] sm:$0xff]  ;;  %v155_v8 = vsub.f32 %v27_v1, %v91_v2  ;;  %v29_v11 = vld [vmem:[%s787_s0 + $0x88] sm:$0xff]  ;;  %v30_v16 = vld [vmem:[%s787_s0 + $0x90] sm:$0xff] }
   0xe   :  { %v92_v7 = vld [vmem:[%s788_s1 + $0x80] sm:$0xff]  ;;  %v217_v9 = vand.u32 2147483647, %v153_v62  ;;  %v93_v12 = vld [vmem:[%s788_s1 + $0x88] sm:$0xff]  ;;  %v94_v17 = vld [vmem:[%s788_s1 + $0x90] sm:$0xff] }
   0xf   :  { %v272_v44 = vadd.f32 %v271_v39, %v209_v33  ;;  %v156_v13 = vsub.f32 %v28_v6, %v92_v7  ;;  %v218_v14 = vand.u32 2147483647, %v154_v3  ;;  %v157_v18 = vsub.f32 %v29_v11, %v93_v12  ;;  %v31_v21 = vld [vmem:[%s787_s0 + $0x98] sm:$0xff]  ;;  %v32_v26 = vld [vmem:[%s787_s0 + $0xa0] sm:$0xff]  ;;  %v33_v31 = vld [vmem:[%s787_s0 + $0xa8] sm:$0xff] }
  0x10   :  { %v219_v19 = vand.u32 2147483647, %v155_v8  ;;  %v95_v22 = vld [vmem:[%s788_s1 + $0x98] sm:$0xff]  ;;  %v158_v23 = vsub.f32 %v30_v16, %v94_v17  ;;  %v96_v27 = vld [vmem:[%s788_s1 + $0xa0] sm:$0xff]  ;;  %v97_v32 = vld [vmem:[%s788_s1 + $0xa8] sm:$0xff] }
  0x11   :  { %v273_v49 = vadd.f32 %v272_v44, %v210_v38  ;;  %v220_v24 = vand.u32 2147483647, %v156_v13  ;;  %v159_v28 = vsub.f32 %v31_v21, %v95_v22  ;;  %v221_v29 = vand.u32 2147483647, %v157_v18  ;;  %v34_v36 = vld [vmem:[%s787_s0 + $0xb0] sm:$0xff]  ;;  %v35_v41 = vld [vmem:[%s787_s0 + $0xb8] sm:$0xff] }
  0x12   :  { %v160_v33 = vsub.f32 %v32_v26, %v96_v27  ;;  %v222_v34 = vand.u32 2147483647, %v158_v23  ;;  %v98_v37 = vld [vmem:[%s788_s1 + $0xb0] sm:$0xff]  ;;  %v161_v38 = vsub.f32 %v33_v31, %v97_v32  ;;  %v99_v42 = vld [vmem:[%s788_s1 + $0xb8] sm:$0xff]  ;;  %v36_v46 = vld [vmem:[%s787_s0 + $0xc0] sm:$0xff] }
  0x13   :  { %v274_v54 = vadd.f32 %v273_v49, %v211_v43  ;;  %v223_v39 = vand.u32 2147483647, %v159_v28  ;;  %v162_v43 = vsub.f32 %v34_v36, %v98_v37  ;;  %v100_v47 = vld [vmem:[%s788_s1 + $0xc0] sm:$0xff]  ;;  %v37_v51 = vld [vmem:[%s787_s0 + $0xc8] sm:$0xff]  ;;  %v38_v56 = vld [vmem:[%s787_s0 + $0xd0] sm:$0xff] }
  0x14   :  { %v224_v44 = vand.u32 2147483647, %v160_v33  ;;  %v225_v49 = vand.u32 2147483647, %v161_v38  ;;  %v101_v52 = vld [vmem:[%s788_s1 + $0xc8] sm:$0xff]  ;;  %v102_v57 = vld [vmem:[%s788_s1 + $0xd0] sm:$0xff] }
  0x15   :  { %v275_v59 = vadd.f32 %v274_v54, %v212_v48  ;;  %v163_v48 = vsub.f32 %v35_v41, %v99_v42  ;;  %v226_v54 = vand.u32 2147483647, %v162_v43  ;;  %v39_v61 = vld [vmem:[%s787_s0 + $0xd8] sm:$0xff]  ;;  %v40_v2 = vld [vmem:[%s787_s0 + $0xe0] sm:$0xff]  ;;  %v41_v7 = vld [vmem:[%s787_s0 + $0xe8] sm:$0xff] }
  0x16   :  { %v103_v62 = vld [vmem:[%s788_s1 + $0xd8] sm:$0xff]  ;;  %v104_v3 = vld [vmem:[%s788_s1 + $0xe0] sm:$0xff]  ;;  %v105_v8 = vld [vmem:[%s788_s1 + $0xe8] sm:$0xff] }
  0x17   :  { %v276_v0 = vadd.f32 %v275_v59, %v213_v53  ;;  %v164_v53 = vsub.f32 %v36_v46, %v100_v47  ;;  %v227_v59 = vand.u32 2147483647, %v163_v48  ;;  %v42_v12 = vld [vmem:[%s787_s0 + $0xf0] sm:$0xff]  ;;  %v43_v17 = vld [vmem:[%s787_s0 + $0xf8] sm:$0xff]  ;;  %v44_v22 = vld [vmem:[%s787_s0 + $0x100] sm:$0xff] }
  0x18   :  { %v106_v13 = vld [vmem:[%s788_s1 + $0xf0] sm:$0xff]  ;;  %v107_v18 = vld [vmem:[%s788_s1 + $0xf8] sm:$0xff]  ;;  %v108_v23 = vld [vmem:[%s788_s1 + $0x100] sm:$0xff] }
  0x19   :  { %v277_v5 = vadd.f32 %v276_v0, %v214_v58  ;;  %v165_v58 = vsub.f32 %v37_v51, %v101_v52  ;;  %v228_v0 = vand.u32 2147483647, %v164_v53  ;;  %v45_v27 = vld [vmem:[%s787_s0 + $0x108] sm:$0xff]  ;;  %v46_v32 = vld [vmem:[%s787_s0 + $0x110] sm:$0xff]  ;;  %v47_v37 = vld [vmem:[%s787_s0 + $0x118] sm:$0xff] }
  0x1a   :  { %v109_v28 = vld [vmem:[%s788_s1 + $0x108] sm:$0xff]  ;;  %v110_v33 = vld [vmem:[%s788_s1 + $0x110] sm:$0xff]  ;;  %v111_v38 = vld [vmem:[%s788_s1 + $0x118] sm:$0xff] }
  0x1b   :  { %v278_v10 = vadd.f32 %v277_v5, %v215_v63  ;;  %v166_v63 = vsub.f32 %v38_v56, %v102_v57  ;;  %v229_v5 = vand.u32 2147483647, %v165_v58  ;;  %v48_v42 = vld [vmem:[%s787_s0 + $0x120] sm:$0xff]  ;;  %v49_v47 = vld [vmem:[%s787_s0 + $0x128] sm:$0xff]  ;;  %v50_v52 = vld [vmem:[%s787_s0 + $0x130] sm:$0xff] }
  0x1c   :  { %v112_v43 = vld [vmem:[%s788_s1 + $0x120] sm:$0xff]  ;;  %v113_v48 = vld [vmem:[%s788_s1 + $0x128] sm:$0xff]  ;;  %v114_v53 = vld [vmem:[%s788_s1 + $0x130] sm:$0xff] }
  0x1d   :  { %v279_v15 = vadd.f32 %v278_v10, %v216_v4  ;;  %v167_v4 = vsub.f32 %v39_v61, %v103_v62  ;;  %v230_v10 = vand.u32 2147483647, %v166_v63  ;;  %v51_v57 = vld [vmem:[%s787_s0 + $0x138] sm:$0xff]  ;;  %v52_v62 = vld [vmem:[%s787_s0 + $0x140] sm:$0xff] }
  0x1e   :  { %v115_v58 = vld [vmem:[%s788_s1 + $0x138] sm:$0xff]  ;;  %v116_v63 = vld [vmem:[%s788_s1 + $0x140] sm:$0xff] }
  0x1f   :  { %v280_v20 = vadd.f32 %v279_v15, %v217_v9  ;;  %v168_v9 = vsub.f32 %v40_v2, %v104_v3  ;;  %v231_v15 = vand.u32 2147483647, %v167_v4  ;;  %v53_v3 = vld [vmem:[%s787_s0 + $0x148] sm:$0xff] }
  0x20   :  { %v117_v4 = vld [vmem:[%s788_s1 + $0x148] sm:$0xff] }
  0x21   :  { %v281_v25 = vadd.f32 %v280_v20, %v218_v14  ;;  %v169_v14 = vsub.f32 %v41_v7, %v105_v8  ;;  %v232_v20 = vand.u32 2147483647, %v168_v9  ;;  %v54_v8 = vld [vmem:[%s787_s0 + $0x150] sm:$0xff] }
  0x22   :  { %v118_v9 = vld [vmem:[%s788_s1 + $0x150] sm:$0xff] }
  0x23   :  { %v282_v30 = vadd.f32 %v281_v25, %v219_v19  ;;  %v170_v19 = vsub.f32 %v42_v12, %v106_v13  ;;  %v233_v25 = vand.u32 2147483647, %v169_v14  ;;  %v55_v13 = vld [vmem:[%s787_s0 + $0x158] sm:$0xff] }
  0x24   :  { %v119_v14 = vld [vmem:[%s788_s1 + $0x158] sm:$0xff] }
  0x25   :  { %v283_v35 = vadd.f32 %v282_v30, %v220_v24  ;;  %v171_v24 = vsub.f32 %v43_v17, %v107_v18  ;;  %v234_v30 = vand.u32 2147483647, %v170_v19  ;;  %v56_v18 = vld [vmem:[%s787_s0 + $0x160] sm:$0xff] }
  0x26   :  { %v120_v19 = vld [vmem:[%s788_s1 + $0x160] sm:$0xff] }
  0x27   :  { %v284_v40 = vadd.f32 %v283_v35, %v221_v29  ;;  %v172_v29 = vsub.f32 %v44_v22, %v108_v23  ;;  %v235_v35 = vand.u32 2147483647, %v171_v24  ;;  %v57_v23 = vld [vmem:[%s787_s0 + $0x168] sm:$0xff] }
  0x28   :  { %v121_v24 = vld [vmem:[%s788_s1 + $0x168] sm:$0xff] }
  0x29   :  { %v285_v45 = vadd.f32 %v284_v40, %v222_v34  ;;  %v173_v34 = vsub.f32 %v45_v27, %v109_v28  ;;  %v236_v40 = vand.u32 2147483647, %v172_v29  ;;  %v58_v28 = vld [vmem:[%s787_s0 + $0x170] sm:$0xff] }
  0x2a   :  { %v122_v29 = vld [vmem:[%s788_s1 + $0x170] sm:$0xff] }
  0x2b   :  { %v286_v50 = vadd.f32 %v285_v45, %v223_v39  ;;  %v174_v39 = vsub.f32 %v46_v32, %v110_v33  ;;  %v237_v45 = vand.u32 2147483647, %v173_v34  ;;  %v59_v33 = vld [vmem:[%s787_s0 + $0x178] sm:$0xff] }
  0x2c   :  { %v123_v34 = vld [vmem:[%s788_s1 + $0x178] sm:$0xff] }
  0x2d   :  { %v287_v55 = vadd.f32 %v286_v50, %v224_v44  ;;  %v175_v44 = vsub.f32 %v47_v37, %v111_v38  ;;  %v238_v50 = vand.u32 2147483647, %v174_v39  ;;  %v60_v38 = vld [vmem:[%s787_s0 + $0x180] sm:$0xff] }
  0x2e   :  { %v124_v39 = vld [vmem:[%s788_s1 + $0x180] sm:$0xff] }
  0x2f   :  { %v288_v60 = vadd.f32 %v287_v55, %v225_v49  ;;  %v176_v49 = vsub.f32 %v48_v42, %v112_v43  ;;  %v239_v55 = vand.u32 2147483647, %v175_v44  ;;  %v61_v43 = vld [vmem:[%s787_s0 + $0x188] sm:$0xff] }
  0x30   :  { %v125_v44 = vld [vmem:[%s788_s1 + $0x188] sm:$0xff] }
  0x31   :  { %v289_v1 = vadd.f32 %v288_v60, %v226_v54  ;;  %v177_v54 = vsub.f32 %v49_v47, %v113_v48  ;;  %v240_v60 = vand.u32 2147483647, %v176_v49  ;;  %v62_v48 = vld [vmem:[%s787_s0 + $0x190] sm:$0xff] }
  0x32   :  { %v126_v49 = vld [vmem:[%s788_s1 + $0x190] sm:$0xff] }
  0x33   :  { %v290_v6 = vadd.f32 %v289_v1, %v227_v59  ;;  %v178_v59 = vsub.f32 %v50_v52, %v114_v53  ;;  %v241_v1 = vand.u32 2147483647, %v177_v54  ;;  %v63_v53 = vld [vmem:[%s787_s0 + $0x198] sm:$0xff] }
  0x34   :  { %v127_v54 = vld [vmem:[%s788_s1 + $0x198] sm:$0xff] }
  0x35   :  { %v291_v11 = vadd.f32 %v290_v6, %v228_v0  ;;  %v179_v0 = vsub.f32 %v51_v57, %v115_v58  ;;  %v242_v6 = vand.u32 2147483647, %v178_v59  ;;  %v64_v58 = vld [vmem:[%s787_s0 + $0x1a0] sm:$0xff] }
  0x36   :  { %v128_v59 = vld [vmem:[%s788_s1 + $0x1a0] sm:$0xff] }
  0x37   :  { %v292_v16 = vadd.f32 %v291_v11, %v229_v5  ;;  %v180_v5 = vsub.f32 %v52_v62, %v116_v63  ;;  %v243_v11 = vand.u32 2147483647, %v179_v0  ;;  %v65_v63 = vld [vmem:[%s787_s0 + $0x1a8] sm:$0xff] }
  0x38   :  { %v129_v0 = vld [vmem:[%s788_s1 + $0x1a8] sm:$0xff] }
  0x39   :  { %v293_v21 = vadd.f32 %v292_v16, %v230_v10  ;;  %v181_v10 = vsub.f32 %v53_v3, %v117_v4  ;;  %v244_v16 = vand.u32 2147483647, %v180_v5  ;;  %v66_v4 = vld [vmem:[%s787_s0 + $0x1b0] sm:$0xff] }
  0x3a   :  { %v130_v5 = vld [vmem:[%s788_s1 + $0x1b0] sm:$0xff] }
  0x3b   :  { %v294_v26 = vadd.f32 %v293_v21, %v231_v15  ;;  %v182_v15 = vsub.f32 %v54_v8, %v118_v9  ;;  %v245_v21 = vand.u32 2147483647, %v181_v10  ;;  %v67_v9 = vld [vmem:[%s787_s0 + $0x1b8] sm:$0xff] }
  0x3c   :  { %v131_v10 = vld [vmem:[%s788_s1 + $0x1b8] sm:$0xff] }
  0x3d   :  { %v295_v31 = vadd.f32 %v294_v26, %v232_v20  ;;  %v183_v20 = vsub.f32 %v55_v13, %v119_v14  ;;  %v246_v26 = vand.u32 2147483647, %v182_v15  ;;  %v68_v14 = vld [vmem:[%s787_s0 + $0x1c0] sm:$0xff] }
  0x3e   :  { %v132_v15 = vld [vmem:[%s788_s1 + $0x1c0] sm:$0xff] }
  0x3f   :  { %v296_v36 = vadd.f32 %v295_v31, %v233_v25  ;;  %v184_v25 = vsub.f32 %v56_v18, %v120_v19  ;;  %v247_v31 = vand.u32 2147483647, %v183_v20  ;;  %v69_v19 = vld [vmem:[%s787_s0 + $0x1c8] sm:$0xff] }
  0x40   :  { %v133_v20 = vld [vmem:[%s788_s1 + $0x1c8] sm:$0xff] }
  0x41   :  { %v297_v41 = vadd.f32 %v296_v36, %v234_v30  ;;  %v185_v30 = vsub.f32 %v57_v23, %v121_v24  ;;  %v248_v36 = vand.u32 2147483647, %v184_v25  ;;  %v70_v24 = vld [vmem:[%s787_s0 + $0x1d0] sm:$0xff] }
  0x42   :  { %v134_v25 = vld [vmem:[%s788_s1 + $0x1d0] sm:$0xff] }
  0x43   :  { %v298_v46 = vadd.f32 %v297_v41, %v235_v35  ;;  %v186_v35 = vsub.f32 %v58_v28, %v122_v29  ;;  %v249_v41 = vand.u32 2147483647, %v185_v30  ;;  %v71_v29 = vld [vmem:[%s787_s0 + $0x1d8] sm:$0xff] }
  0x44   :  { %v135_v30 = vld [vmem:[%s788_s1 + $0x1d8] sm:$0xff] }
  0x45   :  { %v299_v51 = vadd.f32 %v298_v46, %v236_v40  ;;  %v187_v40 = vsub.f32 %v59_v33, %v123_v34  ;;  %v250_v46 = vand.u32 2147483647, %v186_v35  ;;  %v72_v34 = vld [vmem:[%s787_s0 + $0x1e0] sm:$0xff] }
  0x46   :  { %v136_v35 = vld [vmem:[%s788_s1 + $0x1e0] sm:$0xff] }
  0x47   :  { %v300_v56 = vadd.f32 %v299_v51, %v237_v45  ;;  %v188_v45 = vsub.f32 %v60_v38, %v124_v39  ;;  %v251_v51 = vand.u32 2147483647, %v187_v40  ;;  %v73_v39 = vld [vmem:[%s787_s0 + $0x1e8] sm:$0xff] }
  0x48   :  { %v137_v40 = vld [vmem:[%s788_s1 + $0x1e8] sm:$0xff] }
  0x49   :  { %v301_v61 = vadd.f32 %v300_v56, %v238_v50  ;;  %v189_v50 = vsub.f32 %v61_v43, %v125_v44  ;;  %v252_v56 = vand.u32 2147483647, %v188_v45  ;;  %v74_v44 = vld [vmem:[%s787_s0 + $0x1f0] sm:$0xff] }
  0x4a   :  { %v138_v45 = vld [vmem:[%s788_s1 + $0x1f0] sm:$0xff] }
  0x4b   :  { %v302_v2 = vadd.f32 %v301_v61, %v239_v55  ;;  %v190_v55 = vsub.f32 %v62_v48, %v126_v49  ;;  %v253_v61 = vand.u32 2147483647, %v189_v50  ;;  %v75_v49 = vld [vmem:[%s787_s0 + $0x1f8] sm:$0xff]  ;;  %s384_s0 = smov [#allocation2]  }
  0x4c   :  { %v139_v50 = vld [vmem:[%s788_s1 + $0x1f8] sm:$0xff]  ;;  %s346_s1 = sshll.u32 %s384_s0, 4  ;;  %s347_s1 = int_to_ptr.vmem [resolvable:$true] %s346_s1 }
  0x4d   :  { %v303_v7 = vadd.f32 %v302_v2, %v240_v60  ;;  %v191_v60 = vsub.f32 %v63_v53, %v127_v54  ;;  %v254_v2 = vand.u32 2147483647, %v190_v55  ;;  %v203_v54 = vsub.f32 %v75_v49, %v139_v50 }
  0x4f   :  { %v304_v12 = vadd.f32 %v303_v7, %v241_v1  ;;  %v192_v1 = vsub.f32 %v64_v58, %v128_v59  ;;  %v255_v7 = vand.u32 2147483647, %v191_v60  ;;  %v267_v59 = vand.u32 2147483647, %v203_v54 }
  0x51   :  { %v305_v17 = vadd.f32 %v304_v12, %v242_v6  ;;  %v193_v6 = vsub.f32 %v65_v63, %v129_v0  ;;  %v256_v12 = vand.u32 2147483647, %v192_v1 }
  0x53   :  { %v306_v22 = vadd.f32 %v305_v17, %v243_v11  ;;  %v194_v11 = vsub.f32 %v66_v4, %v130_v5  ;;  %v257_v17 = vand.u32 2147483647, %v193_v6 }
  0x55   :  { %v307_v27 = vadd.f32 %v306_v22, %v244_v16  ;;  %v195_v16 = vsub.f32 %v67_v9, %v131_v10  ;;  %v258_v22 = vand.u32 2147483647, %v194_v11 }
  0x57   :  { %v308_v32 = vadd.f32 %v307_v27, %v245_v21  ;;  %v196_v21 = vsub.f32 %v68_v14, %v132_v15  ;;  %v259_v27 = vand.u32 2147483647, %v195_v16 }
  0x59   :  { %v309_v37 = vadd.f32 %v308_v32, %v246_v26  ;;  %v197_v26 = vsub.f32 %v69_v19, %v133_v20  ;;  %v260_v32 = vand.u32 2147483647, %v196_v21 }
  0x5b   :  { %v310_v42 = vadd.f32 %v309_v37, %v247_v31  ;;  %v198_v31 = vsub.f32 %v70_v24, %v134_v25  ;;  %v261_v37 = vand.u32 2147483647, %v197_v26 }
  0x5d   :  { %v311_v47 = vadd.f32 %v310_v42, %v248_v36  ;;  %v199_v36 = vsub.f32 %v71_v29, %v135_v30  ;;  %v262_v42 = vand.u32 2147483647, %v198_v31 }
  0x5f   :  { %v312_v52 = vadd.f32 %v311_v47, %v249_v41  ;;  %v200_v41 = vsub.f32 %v72_v34, %v136_v35  ;;  %v263_v47 = vand.u32 2147483647, %v199_v36 }
  0x61   :  { %v313_v57 = vadd.f32 %v312_v52, %v250_v46  ;;  %v201_v46 = vsub.f32 %v73_v39, %v137_v40  ;;  %v264_v52 = vand.u32 2147483647, %v200_v41 }
  0x63   :  { %v314_v62 = vadd.f32 %v313_v57, %v251_v51  ;;  %v202_v51 = vsub.f32 %v74_v44, %v138_v45  ;;  %v265_v55 = vand.u32 2147483647, %v201_v46 }
  0x65   :  { %v315_v3 = vadd.f32 %v314_v62, %v252_v56  ;;  %v266_v57 = vand.u32 2147483647, %v202_v51 }
  0x67   :  { %v316_v8 = vadd.f32 %v315_v3, %v253_v61 }
  0x69   :  { %v317_v13 = vadd.f32 %v316_v8, %v254_v2 }
  0x6b   :  { %v318_v18 = vadd.f32 %v317_v13, %v255_v7 }
  0x6d   :  { %v319_v23 = vadd.f32 %v318_v18, %v256_v12 }
  0x6f   :  { %v320_v28 = vadd.f32 %v319_v23, %v257_v17 }
  0x71   :  { %v321_v33 = vadd.f32 %v320_v28, %v258_v22 }
  0x73   :  { %v322_v38 = vadd.f32 %v321_v33, %v259_v27 }
  0x75   :  { %v323_v43 = vadd.f32 %v322_v38, %v260_v32 }
  0x77   :  { %v324_v48 = vadd.f32 %v323_v43, %v261_v37 }
  0x79   :  { %v325_v53 = vadd.f32 %v324_v48, %v262_v42 }
  0x7b   :  { %v326_v56 = vadd.f32 %v325_v53, %v263_v47 }
  0x7d   :  { %v327_v58 = vadd.f32 %v326_v56, %v264_v52 }
  0x7f   :  { %v328_v60 = vadd.f32 %v327_v58, %v265_v55 }
  0x81   :  { %v329_v61 = vadd.f32 %v328_v60, %v266_v57 }
  0x83   :  { %v330_v62 = vadd.f32 %v329_v61, %v267_v59 }
  0x85   :  { %v331_v63 = vrot.slane %v330_v62, 4 }
  0x87   :  { %v332_v0 = vadd.f32 %v331_v63, %v330_v62 }
  0x89   :  { %v333_v1 = vrot.slane %v332_v0, 2 }
  0x8b   :  { %v334_v2 = vadd.f32 %v333_v1, %v332_v0 }
  0x8d   :  { %v335_v3 = vrot.slane %v334_v2, 1 }
  0x8f   :  { %v336_v4 = vadd.f32 %v335_v3, %v334_v2 }
  0x91   :  { %337 = vadd.xlane.f32.xlu0 %v336_v4 }
 0x104   :  { %v338_v5 = vpop.xlane.xlu0 %337 }
 0x105   :  { %340 = vst.msk [vmem:[#allocation2] sm:$0x1] %vm339_vm0, %v338_v5 }
 0x106   :  { %351 = dma.vmem_to_hbm [thread:$0]  %s347_s1, 16, %s349_s15, [#allocation3]  }
 0x107   :  { %382 = dma.done.wait [#allocation3], 16  }
 0x108   :  { %383 = vsyncadd [#allocation3], 4294967280 }
 0x109   :  { %356 = vsyncpa [#allocation3], 1 }

</bundles_post_ra>
